<compile_context>
chip_gen: v7x
topology: tpu7x:2x2x1
jax: 0.10.0
libtpu: 0.0.40
codegen_flags: <defaults>
</compile_context>

<pallas_src>
import functools

import jax
import jax.numpy as jnp
from jax.experimental import pallas as pl
from jax.experimental.pallas import tpu as pltpu

# ---- model dimensions (from CVAE.__init__) ----
INPUT_DIM = 28 * 28            # 784
PAD_INPUT_DIM = 896            # 7 * 128, lane-dense padding of INPUT_DIM
HIDDEN_DIM = 256
LATENT_DIM = 64
HEAD_DIM = 2 * LATENT_DIM      # fused [mu | log_var] head width = 128
N_CLASSES = 10
BATCH = 512                    # demo batch (multiple batch tiles in the grid)
TILE_B = 128                   # rows per grid step


def _round_up(a, b):
    return (a + b - 1) // b * b


def cvae_kernel(x_ref, eps_ref, encb_ref, decb_ref,
                w1x_ref, wml_ref, bml_ref, wd1z_ref, wd2_ref, bd2_ref,
                rec_ref, mulv_ref):
    # ----- Encoder: relu(x @ W1x + class_bias); class_bias = y @ W1y + b1 (precomputed) -----
    h = jnp.dot(x_ref[...], w1x_ref[...],
                preferred_element_type=jnp.float32) + encb_ref[...]
    h = jnp.maximum(h, 0.0)

    # ----- fused mu|log_var head: one lane-dense N=128 matmul -----
    ml = jnp.dot(h, wml_ref[...],
                 preferred_element_type=jnp.float32) + bml_ref[...]
    mulv_ref[...] = ml
    mu = ml[:, :LATENT_DIM]
    lv = ml[:, LATENT_DIM:]

    # ----- reparameterization: z = eps * exp(0.5 * log_var) + mu -----
    z = eps_ref[...] * jnp.exp(lv * 0.5) + mu

    # ----- Decoder: relu(z @ Wd1z + class_bias) ; sigmoid(hd @ Wd2 + bd2) -----
    hd = jnp.dot(z, wd1z_ref[...],
                 preferred_element_type=jnp.float32) + decb_ref[...]
    hd = jnp.maximum(hd, 0.0)
    logits = jnp.dot(hd, wd2_ref[...],
                     preferred_element_type=jnp.float32) + bd2_ref[...]
    rec_ref[...] = jax.nn.sigmoid(logits)


@functools.partial(jax.jit, static_argnames=("tile_b",))
def cvae_forward(x, y, eps, params, *, tile_b=TILE_B):
    """x: (B, 784), y: (B, 10) one-hot, eps: (B, 64). Returns (rec, mu, log_var)."""
    p = params
    B = x.shape[0]
    tile_b = min(tile_b, _round_up(B, 8))
    Bp = _round_up(B, tile_b)
    n_tiles = Bp // tile_b
    pad_f = PAD_INPUT_DIM - INPUT_DIM
    pad_b = Bp - B

    # --- class-conditional biases (replaces the in-kernel K=10 one-hot matmuls) ---
    enc_bias = y @ p["w1y"] + p["b1"]          # (B, HIDDEN_DIM)
    dec_bias = y @ p["wd1y"] + p["bd1"]        # (B, HIDDEN_DIM)

    # --- fuse mu / log_var heads into one N=128 weight/bias ---
    wml = jnp.concatenate([p["wmu"], p["wlv"]], axis=1)   # (HIDDEN_DIM, 128)
    bml = jnp.concatenate([p["bmu"], p["blv"]], axis=1)   # (1, 128)

    # --- pad the 784 feature axis to 896 (zero padding -> no effect on result) ---
    w1x = jnp.pad(p["w1x"], ((0, pad_f), (0, 0)))
    wd2 = jnp.pad(p["wd2"], ((0, 0), (0, pad_f)))
    bd2 = jnp.pad(p["bd2"], ((0, 0), (0, pad_f)))

    # --- pad batch to a multiple of the batch tile ---
    x_p = jnp.pad(x, ((0, pad_b), (0, pad_f)))
    eps_p = jnp.pad(eps, ((0, pad_b), (0, 0)))
    encb_p = jnp.pad(enc_bias, ((0, pad_b), (0, 0)))
    decb_p = jnp.pad(dec_bias, ((0, pad_b), (0, 0)))

    weight_elems = (PAD_INPUT_DIM * HIDDEN_DIM + HIDDEN_DIM * HEAD_DIM + HEAD_DIM
                    + LATENT_DIM * HIDDEN_DIM + HIDDEN_DIM * PAD_INPUT_DIM
                    + PAD_INPUT_DIM)
    act_elems = Bp * (2 * PAD_INPUT_DIM + LATENT_DIM + 2 * HIDDEN_DIM + HEAD_DIM)
    cost = pl.CostEstimate(
        flops=2 * Bp * (PAD_INPUT_DIM * HIDDEN_DIM + HIDDEN_DIM * HEAD_DIM
                        + LATENT_DIM * HIDDEN_DIM + HIDDEN_DIM * PAD_INPUT_DIM),
        transcendentals=Bp * (LATENT_DIM + PAD_INPUT_DIM),
        bytes_accessed=4 * (weight_elems + act_elems),
    )

    rec_p, mulv = pl.pallas_call(
        cvae_kernel,
        out_shape=(
            jax.ShapeDtypeStruct((Bp, PAD_INPUT_DIM), jnp.float32),   # rec (padded)
            jax.ShapeDtypeStruct((Bp, HEAD_DIM), jnp.float32),        # [mu | log_var]
        ),
        grid=(n_tiles,),
        in_specs=[
            # batch-tiled activations
            pl.BlockSpec((tile_b, PAD_INPUT_DIM), lambda b: (b, 0)),  # x
            pl.BlockSpec((tile_b, LATENT_DIM),    lambda b: (b, 0)),  # eps
            pl.BlockSpec((tile_b, HIDDEN_DIM),    lambda b: (b, 0)),  # enc class bias
            pl.BlockSpec((tile_b, HIDDEN_DIM),    lambda b: (b, 0)),  # dec class bias
            # weights: constant block index -> DMA'd once, resident in VMEM
            pl.BlockSpec((PAD_INPUT_DIM, HIDDEN_DIM), lambda b: (0, 0)),  # w1x
            pl.BlockSpec((HIDDEN_DIM, HEAD_DIM),      lambda b: (0, 0)),  # wml
            pl.BlockSpec((1, HEAD_DIM),               lambda b: (0, 0)),  # bml
            pl.BlockSpec((LATENT_DIM, HIDDEN_DIM),    lambda b: (0, 0)),  # wd1z
            pl.BlockSpec((HIDDEN_DIM, PAD_INPUT_DIM), lambda b: (0, 0)),  # wd2
            pl.BlockSpec((1, PAD_INPUT_DIM),          lambda b: (0, 0)),  # bd2
        ],
        out_specs=(
            pl.BlockSpec((tile_b, PAD_INPUT_DIM), lambda b: (b, 0)),
            pl.BlockSpec((tile_b, HEAD_DIM),      lambda b: (b, 0)),
        ),
        compiler_params=pltpu.CompilerParams(
            dimension_semantics=("parallel",)),
        cost_estimate=cost,
    )(x_p, eps_p, encb_p, decb_p, w1x, wml, bml, p["wd1z"], wd2, bd2)

    rec = rec_p[:B, :INPUT_DIM]
    mu = mulv[:B, :LATENT_DIM]
    log_var = mulv[:B, LATENT_DIM:]
    return rec, mu, log_var


# ----------------------------- parameters ------------------------------------
def _linear_init(key, in_dim, out_dim):
    """PyTorch nn.Linear default init: U(-1/sqrt(in), 1/sqrt(in))."""
    kw, kb = jax.random.split(key)
    bound = 1.0 / jnp.sqrt(jnp.float32(in_dim))
    w = jax.random.uniform(kw, (in_dim, out_dim), jnp.float32, -bound, bound)
    b = jax.random.uniform(kb, (1, out_dim), jnp.float32, -bound, bound)
    return w, b


def init_params(key):
    keys = jax.random.split(key, 5)
    # Encoder first layer acts on concat([x, y]) -> split into x-part and y-part.
    w1, b1 = _linear_init(keys[0], INPUT_DIM + N_CLASSES, HIDDEN_DIM)
    wmu, bmu = _linear_init(keys[1], HIDDEN_DIM, LATENT_DIM)
    wlv, blv = _linear_init(keys[2], HIDDEN_DIM, LATENT_DIM)
    # Decoder first layer acts on concat([z, y]) -> split.
    wd1, bd1 = _linear_init(keys[3], LATENT_DIM + N_CLASSES, HIDDEN_DIM)
    wd2, bd2 = _linear_init(keys[4], HIDDEN_DIM, INPUT_DIM)
    return dict(
        w1x=w1[:INPUT_DIM], w1y=w1[INPUT_DIM:], b1=b1,
        wmu=wmu, bmu=bmu, wlv=wlv, blv=blv,
        wd1z=wd1[:LATENT_DIM], wd1y=wd1[LATENT_DIM:], bd1=bd1,
        wd2=wd2, bd2=bd2,
    )


def reference_forward(x, y, eps, params):
    """Pure-JAX reference; math identical to CVAE.forward with eps passed in."""
    p = params
    h = jnp.maximum(x @ p["w1x"] + y @ p["w1y"] + p["b1"], 0.0)
    mu = h @ p["wmu"] + p["bmu"]
    lv = h @ p["wlv"] + p["blv"]
    z = eps * jnp.exp(0.5 * lv) + mu
    hd = jnp.maximum(z @ p["wd1z"] + y @ p["wd1y"] + p["bd1"], 0.0)
    rec = jax.nn.sigmoid(hd @ p["wd2"] + p["bd2"])
    return rec, mu, lv


if __name__ == "__main__":
    root = jax.random.PRNGKey(0)
    k_params, k_x, k_y, k_eps = jax.random.split(root, 4)

    params = init_params(k_params)

    # x in [0, 1] like flattened MNIST pixels (B, 784)
    x = jax.random.uniform(k_x, (BATCH, INPUT_DIM), jnp.float32, 0.0, 1.0)
    # one-hot class labels (B, 10)
    labels = jax.random.randint(k_y, (BATCH,), 0, N_CLASSES)
    y = jax.nn.one_hot(labels, N_CLASSES, dtype=jnp.float32)
    # eps = torch.randn_like(std); sampled here and passed into the kernel
    eps = jax.random.normal(k_eps, (BATCH, LATENT_DIM), jnp.float32)

    rec, mu, log_var = jax.block_until_ready(cvae_forward(x, y, eps, params))

    rec_ref, mu_ref, lv_ref = reference_forward(x, y, eps, params)
    assert rec.shape == (BATCH, INPUT_DIM)
    assert mu.shape == (BATCH, LATENT_DIM)
    assert log_var.shape == (BATCH, LATENT_DIM)
    assert jnp.allclose(rec, rec_ref, atol=2e-5)
    assert jnp.allclose(mu, mu_ref, atol=2e-5)
    assert jnp.allclose(log_var, lv_ref, atol=2e-5)

    print("KERNEL_OK")
</pallas_src>

<mosaic_0001>
module attributes {stable_mosaic.version = 11 : i64} {
  func.func @cvae_kernel(%arg0: i32, %arg1: memref<128x896xf32, #tpu.memory_space<vmem>>, %arg2: memref<128x64xf32, #tpu.memory_space<vmem>>, %arg3: memref<128x256xf32, #tpu.memory_space<vmem>>, %arg4: memref<128x256xf32, #tpu.memory_space<vmem>>, %arg5: memref<896x256xf32, #tpu.memory_space<vmem>>, %arg6: memref<256x128xf32, #tpu.memory_space<vmem>>, %arg7: memref<1x128xf32, #tpu.memory_space<vmem>>, %arg8: memref<64x256xf32, #tpu.memory_space<vmem>>, %arg9: memref<256x896xf32, #tpu.memory_space<vmem>>, %arg10: memref<1x896xf32, #tpu.memory_space<vmem>>, %arg11: memref<128x896xf32, #tpu.memory_space<vmem>>, %arg12: memref<128x128xf32, #tpu.memory_space<vmem>>) attributes {dimension_semantics = [#tpu.dimension_semantics<parallel>], iteration_bounds = array<i64: 4>, scalar_prefetch = 0 : i64, scratch_operands = 0 : i64, tpu.core_type = #tpu.core_type<tc>, window_params = [{transform_indices = @transform_0, window_bounds = array<i64: 128, 896>}, {transform_indices = @transform_1, window_bounds = array<i64: 128, 64>}, {transform_indices = @transform_2, window_bounds = array<i64: 128, 256>}, {transform_indices = @transform_3, window_bounds = array<i64: 128, 256>}, {pipeline_mode = #tpu.pipeline_mode<synchronous>, transform_indices = @transform_4, window_bounds = array<i64: 896, 256>}, {pipeline_mode = #tpu.pipeline_mode<synchronous>, transform_indices = @transform_5, window_bounds = array<i64: 256, 128>}, {pipeline_mode = #tpu.pipeline_mode<synchronous>, transform_indices = @transform_6, window_bounds = array<i64: 1, 128>}, {pipeline_mode = #tpu.pipeline_mode<synchronous>, transform_indices = @transform_7, window_bounds = array<i64: 64, 256>}, {pipeline_mode = #tpu.pipeline_mode<synchronous>, transform_indices = @transform_8, window_bounds = array<i64: 256, 896>}, {pipeline_mode = #tpu.pipeline_mode<synchronous>, transform_indices = @transform_9, window_bounds = array<i64: 1, 896>}, {transform_indices = @transform_10, window_bounds = array<i64: 128, 896>}, {transform_indices = @transform_11, window_bounds = array<i64: 128, 128>}]} {
    %c0 = arith.constant 0 : index
    %c0_0 = arith.constant 0 : index
    %0 = vector.load %arg1[%c0, %c0_0] : memref<128x896xf32, #tpu.memory_space<vmem>>, vector<128x896xf32>
    %c0_1 = arith.constant 0 : index
    %c0_2 = arith.constant 0 : index
    %1 = vector.load %arg5[%c0_1, %c0_2] : memref<896x256xf32, #tpu.memory_space<vmem>>, vector<896x256xf32>
    %cst = arith.constant dense<0.000000e+00> : vector<128x256xf32>
    %2 = tpu.matmul %0, %1, %cst {dimension_numbers = #tpu.dot_dimension_numbers<[1], [0], [0], [1], [0, 0, 1, 1], [], []>} : vector<128x896xf32>, vector<896x256xf32>, vector<128x256xf32> -> vector<128x256xf32>
    %c0_3 = arith.constant 0 : index
    %c0_4 = arith.constant 0 : index
    %3 = vector.load %arg3[%c0_3, %c0_4] : memref<128x256xf32, #tpu.memory_space<vmem>>, vector<128x256xf32>
    %4 = arith.addf %2, %3 : vector<128x256xf32>
    %cst_5 = arith.constant 0.000000e+00 : f32
    %5 = vector.broadcast %cst_5 : f32 to vector<128x256xf32>
    %6 = arith.maximumf %4, %5 : vector<128x256xf32>
    %c0_6 = arith.constant 0 : index
    %c0_7 = arith.constant 0 : index
    %7 = vector.load %arg6[%c0_6, %c0_7] : memref<256x128xf32, #tpu.memory_space<vmem>>, vector<256x128xf32>
    %cst_8 = arith.constant dense<0.000000e+00> : vector<128x128xf32>
    %8 = tpu.matmul %6, %7, %cst_8 {dimension_numbers = #tpu.dot_dimension_numbers<[1], [0], [0], [1], [0, 0, 1, 1], [], []>} : vector<128x256xf32>, vector<256x128xf32>, vector<128x128xf32> -> vector<128x128xf32>
    %c0_9 = arith.constant 0 : index
    %c0_10 = arith.constant 0 : index
    %9 = vector.load %arg7[%c0_9, %c0_10] : memref<1x128xf32, #tpu.memory_space<vmem>>, vector<1x128xf32>
    %10 = vector.broadcast %9 : vector<1x128xf32> to vector<128x128xf32>
    %11 = arith.addf %8, %10 : vector<128x128xf32>
    %c0_11 = arith.constant 0 : index
    %c0_12 = arith.constant 0 : index
    %12 = vector.load %arg12[%c0_11, %c0_12] : memref<128x128xf32, #tpu.memory_space<vmem>>, vector<128x128xf32>
    tpu.vector_store %arg12[%c0_11, %c0_12], %11 {strides = array<i32>} : memref<128x128xf32, #tpu.memory_space<vmem>>, vector<128x128xf32>,
    %13 = vector.extract_strided_slice %11 {offsets = [0, 0], sizes = [128, 64], strides = [1, 1]} : vector<128x128xf32> to vector<128x64xf32>
    %14 = vector.extract_strided_slice %11 {offsets = [0, 64], sizes = [128, 64], strides = [1, 1]} : vector<128x128xf32> to vector<128x64xf32>
    %c0_13 = arith.constant 0 : index
    %c0_14 = arith.constant 0 : index
    %15 = vector.load %arg2[%c0_13, %c0_14] : memref<128x64xf32, #tpu.memory_space<vmem>>, vector<128x64xf32>
    %cst_15 = arith.constant 5.000000e-01 : f32
    %16 = vector.broadcast %cst_15 : f32 to vector<128x64xf32>
    %17 = arith.mulf %14, %16 : vector<128x64xf32>
    %18 = math.exp %17 : vector<128x64xf32>
    %19 = arith.mulf %15, %18 : vector<128x64xf32>
    %20 = arith.addf %19, %13 : vector<128x64xf32>
    %c0_16 = arith.constant 0 : index
    %c0_17 = arith.constant 0 : index
    %21 = vector.load %arg8[%c0_16, %c0_17] : memref<64x256xf32, #tpu.memory_space<vmem>>, vector<64x256xf32>
    %cst_18 = arith.constant dense<0.000000e+00> : vector<128x256xf32>
    %22 = tpu.matmul %20, %21, %cst_18 {dimension_numbers = #tpu.dot_dimension_numbers<[1], [0], [0], [1], [0, 0, 1, 1], [], []>} : vector<128x64xf32>, vector<64x256xf32>, vector<128x256xf32> -> vector<128x256xf32>
    %c0_19 = arith.constant 0 : index
    %c0_20 = arith.constant 0 : index
    %23 = vector.load %arg4[%c0_19, %c0_20] : memref<128x256xf32, #tpu.memory_space<vmem>>, vector<128x256xf32>
    %24 = arith.addf %22, %23 : vector<128x256xf32>
    %cst_21 = arith.constant 0.000000e+00 : f32
    %25 = vector.broadcast %cst_21 : f32 to vector<128x256xf32>
    %26 = arith.maximumf %24, %25 : vector<128x256xf32>
    %c0_22 = arith.constant 0 : index
    %c0_23 = arith.constant 0 : index
    %27 = vector.load %arg9[%c0_22, %c0_23] : memref<256x896xf32, #tpu.memory_space<vmem>>, vector<256x896xf32>
    %cst_24 = arith.constant dense<0.000000e+00> : vector<128x896xf32>
    %28 = tpu.matmul %26, %27, %cst_24 {dimension_numbers = #tpu.dot_dimension_numbers<[1], [0], [0], [1], [0, 0, 1, 1], [], []>} : vector<128x256xf32>, vector<256x896xf32>, vector<128x896xf32> -> vector<128x896xf32>
    %c0_25 = arith.constant 0 : index
    %c0_26 = arith.constant 0 : index
    %29 = vector.load %arg10[%c0_25, %c0_26] : memref<1x896xf32, #tpu.memory_space<vmem>>, vector<1x896xf32>
    %30 = vector.broadcast %29 : vector<1x896xf32> to vector<128x896xf32>
    %31 = arith.addf %28, %30 : vector<128x896xf32>
    %32 = arith.negf %31 : vector<128x896xf32>
    %33 = math.exp %32 : vector<128x896xf32>
    %cst_27 = arith.constant 1.000000e+00 : f32
    %34 = vector.broadcast %cst_27 : f32 to vector<128x896xf32>
    %35 = arith.addf %34, %33 : vector<128x896xf32>
    %36 = arith.divf %34, %35 : vector<128x896xf32>
    %c0_28 = arith.constant 0 : index
    %c0_29 = arith.constant 0 : index
    %37 = vector.load %arg11[%c0_28, %c0_29] : memref<128x896xf32, #tpu.memory_space<vmem>>, vector<128x896xf32>
    tpu.vector_store %arg11[%c0_28, %c0_29], %36 {strides = array<i32>} : memref<128x896xf32, #tpu.memory_space<vmem>>, vector<128x896xf32>,
    return
  }
  func.func @transform_0(%arg0: i32) -> (i32, i32) {
    %c0_i32 = arith.constant 0 : i32
    %c0_i32_0 = arith.constant 0 : i32
    return %arg0, %c0_i32 : i32, i32
  }
  func.func @transform_1(%arg0: i32) -> (i32, i32) {
    %c0_i32 = arith.constant 0 : i32
    %c0_i32_0 = arith.constant 0 : i32
    return %arg0, %c0_i32 : i32, i32
  }
  func.func @transform_2(%arg0: i32) -> (i32, i32) {
    %c0_i32 = arith.constant 0 : i32
    %c0_i32_0 = arith.constant 0 : i32
    return %arg0, %c0_i32 : i32, i32
  }
  func.func @transform_3(%arg0: i32) -> (i32, i32) {
    %c0_i32 = arith.constant 0 : i32
    %c0_i32_0 = arith.constant 0 : i32
    return %arg0, %c0_i32 : i32, i32
  }
  func.func @transform_4(%arg0: i32) -> (i32, i32) {
    %c0_i32 = arith.constant 0 : i32
    %c0_i32_0 = arith.constant 0 : i32
    %c0_i32_1 = arith.constant 0 : i32
    return %c0_i32, %c0_i32_0 : i32, i32
  }
  func.func @transform_5(%arg0: i32) -> (i32, i32) {
    %c0_i32 = arith.constant 0 : i32
    %c0_i32_0 = arith.constant 0 : i32
    %c0_i32_1 = arith.constant 0 : i32
    return %c0_i32, %c0_i32_0 : i32, i32
  }
  func.func @transform_6(%arg0: i32) -> (i32, i32) {
    %c0_i32 = arith.constant 0 : i32
    %c0_i32_0 = arith.constant 0 : i32
    %c0_i32_1 = arith.constant 0 : i32
    return %c0_i32, %c0_i32_0 : i32, i32
  }
  func.func @transform_7(%arg0: i32) -> (i32, i32) {
    %c0_i32 = arith.constant 0 : i32
    %c0_i32_0 = arith.constant 0 : i32
    %c0_i32_1 = arith.constant 0 : i32
    return %c0_i32, %c0_i32_0 : i32, i32
  }
  func.func @transform_8(%arg0: i32) -> (i32, i32) {
    %c0_i32 = arith.constant 0 : i32
    %c0_i32_0 = arith.constant 0 : i32
    %c0_i32_1 = arith.constant 0 : i32
    return %c0_i32, %c0_i32_0 : i32, i32
  }
  func.func @transform_9(%arg0: i32) -> (i32, i32) {
    %c0_i32 = arith.constant 0 : i32
    %c0_i32_0 = arith.constant 0 : i32
    %c0_i32_1 = arith.constant 0 : i32
    return %c0_i32, %c0_i32_0 : i32, i32
  }
  func.func @transform_10(%arg0: i32) -> (i32, i32) {
    %c0_i32 = arith.constant 0 : i32
    %c0_i32_0 = arith.constant 0 : i32
    return %arg0, %c0_i32 : i32, i32
  }
  func.func @transform_11(%arg0: i32) -> (i32, i32) {
    %c0_i32 = arith.constant 0 : i32
    %c0_i32_0 = arith.constant 0 : i32
    return %arg0, %c0_i32 : i32, i32
  }
}

</mosaic_0001>

<bundles_post_ra>
// kernel: cvae_forward.1
= control target key start
LH: loop header
LB: loop body
LE: loop exit
PB: predicated region body
PF: predicated region fallthrough
CT: control target
= control target key end

     0   :  { %s5490_s17 = smov 0   ;;  %s8171_s0 = inlined_call_operand.vmem [shape: f32[512,896], index: 0, kind: input, shape index: {}]   ;;  %s8172_s1 = inlined_call_operand.vmem [shape: f32[512,64], index: 1, kind: input, shape index: {}]   ;;  %s8173_s2 = inlined_call_operand.vmem [shape: f32[512,256], index: 2, kind: input, shape index: {}]   ;;  %s8174_s3 = inlined_call_operand.vmem [shape: f32[512,256], index: 3, kind: input, shape index: {}]   ;;  %s8175_s4 = inlined_call_operand.vmem [shape: f32[896,256], index: 4, kind: input, shape index: {}]   ;;  %s8176_s5 = inlined_call_operand.vmem [shape: f32[256,128], index: 5, kind: input, shape index: {}]   ;;  %s8177_s6 = inlined_call_operand.vmem [shape: f32[1,128], index: 6, kind: input, shape index: {}]   ;;  %s8178_s7 = inlined_call_operand.vmem [shape: f32[64,256], index: 7, kind: input, shape index: {}]   ;;  %s8179_s8 = inlined_call_operand.vmem [shape: f32[256,896], index: 8, kind: input, shape index: {}]   ;;  %s8180_s9 = inlined_call_operand.vmem [shape: f32[1,896], index: 9, kind: input, shape index: {}]   ;;  %s8181_s10 = inlined_call_operand.vmem [shape: f32[512,896], index: 10, kind: output, shape index: {0}]   ;;  %s8182_s11 = inlined_call_operand.vmem [shape: f32[512,128], index: 11, kind: output, shape index: {1}]  }
   0x1 LB: > { %s3976_s18 = sadd.s32 4294967295, %s5426_s17   ;;  %p3980_p0 = scmp.ge.s32.totalorder %s5426_s17, 1  ;;  %s5426_s17 = sphi %s5490_s17, %s22_s17  }
   0x2   : > { %p377_p1 = scmp.lt.s32.totalorder %s5426_s17, 5 }
   0x4   : > { %p378_p2 = pnand %p3980_p0, %p377_p1 }
   0x5   : > { %v594_v0 = vld [vmem:[%s8175_s4 + $0x8] sm:$0xff] (!%p378_p2)  ;;  %v596_v1 = vld [vmem:[%s8175_s4 + $0x18] sm:$0xff] (!%p378_p2)  ;;  %v593_v2 = vld [vmem:[%s8175_s4] sm:$0xff] (!%p378_p2)  ;;  %s3981_s22 = sshll.u32 (!%p378_p2), %s3976_s18, 4  ;;  %vm1933_vm0 = vcmask (!%p378_p2), 523264  }
   0x6   : > { %381 = sbr.rel (%p378_p2) target bundleno = 1510 (0x5e6), region = 60  ;;  %v4288_v3 = vpack.c.bf16 (!%p378_p2), %v596_v1, %v594_v0  ;;  %v595_v4 = vld [vmem:[%s8175_s4 + $0x10] sm:$0xff] (!%p378_p2)  ;;  %v598_v5 = vld [vmem:[%s8175_s4 + $0x28] sm:$0xff] (!%p378_p2)  ;;  %v600_v6 = vld [vmem:[%s8175_s4 + $0x38] sm:$0xff] (!%p378_p2)  ;;  %p442_p3 = scmp.lt.s32.totalorder (!%p378_p2), %s3981_s22, 63 }
   0x7   : > { %v4290_v7 = vpack.c.bf16 (!%p378_p2), %v595_v4, %v593_v2  ;;  %v4292_v8 = vpack.c.bf16 (!%p378_p2), %v600_v6, %v598_v5  ;;  %v597_v9 = vld [vmem:[%s8175_s4 + $0x20] sm:$0xff] (!%p378_p2)  ;;  %v599_v10 = vld [vmem:[%s8175_s4 + $0x30] sm:$0xff] (!%p378_p2)  ;;  %v602_v11 = vld [vmem:[%s8175_s4 + $0x48] sm:$0xff] (!%p378_p2) }
   0x8   : > { %4289 = vmatprep.subr.bf16.mxu0 (!%p378_p2), %v4288_v3  ;;  %v604_v12 = vld [vmem:[%s8175_s4 + $0x58] sm:$0xff] (!%p378_p2)  ;;  %v4294_v13 = vpack.c.bf16 (!%p378_p2), %v599_v10, %v597_v9  ;;  %v601_v15 = vld [vmem:[%s8175_s4 + $0x40] sm:$0xff] (!%p378_p2)  ;;  %v603_v16 = vld [vmem:[%s8175_s4 + $0x50] sm:$0xff] (!%p378_p2) }
   0x9   : > { %4291 = vmatpush1.bf16.msra.mxu0 (!%p378_p2), %v4290_v7  ;;  %v4296_v14 = vpack.c.bf16 (!%p378_p2), %v604_v12, %v602_v11  ;;  %v606_v17 = vld [vmem:[%s8175_s4 + $0x68] sm:$0xff] (!%p378_p2)  ;;  %v608_v18 = vld [vmem:[%s8175_s4 + $0x78] sm:$0xff] (!%p378_p2)  ;;  %v4298_v19 = vpack.c.bf16 (!%p378_p2), %v603_v16, %v601_v15  ;;  %v605_v21 = vld [vmem:[%s8175_s4 + $0x60] sm:$0xff] (!%p378_p2) }
   0xa   : > { %4293 = vmatprep.subr.bf16.mxu0 (!%p378_p2), %v4292_v8  ;;  %v4300_v20 = vpack.c.bf16 (!%p378_p2), %v608_v18, %v606_v17  ;;  %v607_v22 = vld [vmem:[%s8175_s4 + $0x70] sm:$0xff] (!%p378_p2)  ;;  %v610_v23 = vld [vmem:[%s8175_s4 + $0x88] sm:$0xff] (!%p378_p2)  ;;  %v612_v24 = vld [vmem:[%s8175_s4 + $0x98] sm:$0xff] (!%p378_p2) }
   0xb   : > { %v4302_v25 = vpack.c.bf16 (!%p378_p2), %v607_v22, %v605_v21  ;;  %v4304_v26 = vpack.c.bf16 (!%p378_p2), %v612_v24, %v610_v23  ;;  %v609_v27 = vld [vmem:[%s8175_s4 + $0x80] sm:$0xff] (!%p378_p2)  ;;  %v611_v28 = vld [vmem:[%s8175_s4 + $0x90] sm:$0xff] (!%p378_p2)  ;;  %v614_v29 = vld [vmem:[%s8175_s4 + $0xa8] sm:$0xff] (!%p378_p2) }
   0xc   : > { %v616_v30 = vld [vmem:[%s8175_s4 + $0xb8] sm:$0xff] (!%p378_p2)  ;;  %v4306_v31 = vpack.c.bf16 (!%p378_p2), %v611_v28, %v609_v27  ;;  %v613_v33 = vld [vmem:[%s8175_s4 + $0xa0] sm:$0xff] (!%p378_p2)  ;;  %v615_v34 = vld [vmem:[%s8175_s4 + $0xb0] sm:$0xff] (!%p378_p2) }
   0xd   : > { %4295 = vmatpush1.bf16.msra.mxu0 %v4294_v13  ;;  %s8184_s22 = smov (!%p442_p3, %s3981_s22), 63  ;;  %v4308_v32 = vpack.c.bf16 %v616_v30, %v614_v29  ;;  %v618_v35 = vld [vmem:[%s8175_s4 + $0xc8] sm:$0xff]  ;;  %v620_v36 = vld [vmem:[%s8175_s4 + $0xd8] sm:$0xff]  ;;  %v4310_v37 = vpack.c.bf16 %v615_v34, %v613_v33  ;;  %v617_v39 = vld [vmem:[%s8175_s4 + $0xc0] sm:$0xff] }
   0xe   : > { %4297 = vmatprep.subr.bf16.mxu0 %v4296_v14  ;;  %s4928_s30 = smul.u32 56, %s8184_s22  ;;  %v4312_v38 = vpack.c.bf16 %v620_v36, %v618_v35  ;;  %v619_v40 = vld [vmem:[%s8175_s4 + $0xd0] sm:$0xff]  ;;  %v622_v42 = vld [vmem:[%s8175_s4 + $0xe8] sm:$0xff]  ;;  %v624_v43 = vld [vmem:[%s8175_s4 + $0xf8] sm:$0xff]  ;;  %s4126_s15 = sshll.u32 %s8184_s22, 4 }
   0xf   : > { %v4314_v44 = vpack.c.bf16 %v619_v40, %v617_v39  ;;  %v4316_v45 = vpack.c.bf16 %v624_v43, %v622_v42  ;;  %v621_v46 = vld [vmem:[%s8175_s4 + $0xe0] sm:$0xff]  ;;  %v623_v47 = vld [vmem:[%s8175_s4 + $0xf0] sm:$0xff]  ;;  %v626_v48 = vld [vmem:[%s8175_s4 + $0x108] sm:$0xff]  ;;  %s6410_s20 = scalar_lea.vmem %s8173_s2, %s4126_s15  ;;  %s3984_s25 = sshll.u32 %s8184_s22, 3 }
  0x10   : > { %s5584_s24 = scalar_lea.vmem %s8171_s0, %s4928_s30  ;;  %v628_v49 = vld [vmem:[%s8175_s4 + $0x118] sm:$0xff]  ;;  %v4318_v50 = vpack.c.bf16 %v623_v47, %v621_v46  ;;  %v625_v52 = vld [vmem:[%s8175_s4 + $0x100] sm:$0xff]  ;;  %v627_v53 = vld [vmem:[%s8175_s4 + $0x110] sm:$0xff]  ;;  %s6504_s18 = scalar_lea.vmem %s8182_s11, %s3984_s25 }
  0x11   : > { %4299 = vmatpush1.bf16.msra.mxu0 %v4298_v19  ;;  %v482_v41 = vld [vmem:[%s5584_s24 + $0x8] sm:$0xff]  ;;  %v4320_v51 = vpack.c.bf16 %v628_v49, %v626_v48  ;;  %v632_v55 = vld [vmem:[%s8175_s4 + $0x138] sm:$0xff]  ;;  %v4322_v56 = vpack.c.bf16 %v627_v53, %v625_v52  ;;  %v629_v58 = vld [vmem:[%s8175_s4 + $0x120] sm:$0xff]  ;;  %s6746_s14 = scalar_lea.vmem %s8172_s1, %s3984_s25  ;;  %s7035_s16 = scalar_lea.vmem %s8174_s3, %s4126_s15 }
  0x12   : > { %4301 = vmatprep.subr.bf16.mxu0 %v4300_v20  ;;  %913 = vmatprep.mubr.f32.mxu0 %v482_v41  ;;  %v630_v54 = vld [vmem:[%s8175_s4 + $0x128] sm:$0xff]  ;;  %v631_v59 = vld [vmem:[%s8175_s4 + $0x130] sm:$0xff]  ;;  %v636_v61 = vld [vmem:[%s8175_s4 + $0x158] sm:$0xff]  ;;  %s7694_s27 = scalar_lea.vmem %s8181_s10, %s4928_s30 }
  0x13   : > { %v4324_v57 = vpack.c.bf16 %v632_v55, %v630_v54  ;;  %v634_v60 = vld [vmem:[%s8175_s4 + $0x148] sm:$0xff]  ;;  %v4326_v62 = vpack.c.bf16 %v631_v59, %v629_v58  ;;  %v633_v0 = vld [vmem:[%s8175_s4 + $0x140] sm:$0xff]  ;;  %v635_v1 = vld [vmem:[%s8175_s4 + $0x150] sm:$0xff] }
  0x14   : > { %v4328_v63 = vpack.c.bf16 %v636_v61, %v634_v60  ;;  %v638_v2 = vld [vmem:[%s8175_s4 + $0x168] sm:$0xff]  ;;  %v640_v3 = vld [vmem:[%s8175_s4 + $0x178] sm:$0xff]  ;;  %v4330_v4 = vpack.c.bf16 %v635_v1, %v633_v0  ;;  %v637_v6 = vld [vmem:[%s8175_s4 + $0x160] sm:$0xff] }
  0x15   : > { %4303 = vmatpush1.bf16.msra.mxu0 %v4302_v25  ;;  %v4332_v5 = vpack.c.bf16 %v640_v3, %v638_v2  ;;  %v639_v7 = vld [vmem:[%s8175_s4 + $0x170] sm:$0xff]  ;;  %v642_v8 = vld [vmem:[%s8175_s4 + $0x188] sm:$0xff]  ;;  %v644_v9 = vld [vmem:[%s8175_s4 + $0x198] sm:$0xff] }
  0x16   : > { %4305 = vmatprep.subr.bf16.mxu0 %v4304_v26  ;;  %v4334_v10 = vpack.c.bf16 %v639_v7, %v637_v6  ;;  %v4336_v11 = vpack.c.bf16 %v644_v9, %v642_v8  ;;  %v641_v12 = vld [vmem:[%s8175_s4 + $0x180] sm:$0xff]  ;;  %v643_v13 = vld [vmem:[%s8175_s4 + $0x190] sm:$0xff]  ;;  %v646_v14 = vld [vmem:[%s8175_s4 + $0x1a8] sm:$0xff] }
  0x17   : > { %v648_v15 = vld [vmem:[%s8175_s4 + $0x1b8] sm:$0xff]  ;;  %v4338_v16 = vpack.c.bf16 %v643_v13, %v641_v12  ;;  %v645_v18 = vld [vmem:[%s8175_s4 + $0x1a0] sm:$0xff]  ;;  %v647_v19 = vld [vmem:[%s8175_s4 + $0x1b0] sm:$0xff] }
  0x18   : > { %v4340_v17 = vpack.c.bf16 %v648_v15, %v646_v14  ;;  %v650_v20 = vld [vmem:[%s8175_s4 + $0x1c8] sm:$0xff]  ;;  %v652_v21 = vld [vmem:[%s8175_s4 + $0x1d8] sm:$0xff]  ;;  %v4342_v22 = vpack.c.bf16 %v647_v19, %v645_v18  ;;  %v649_v24 = vld [vmem:[%s8175_s4 + $0x1c0] sm:$0xff] }
  0x19   : > { %4307 = vmatpush1.bf16.msra.mxu0 %v4306_v31  ;;  %v4344_v23 = vpack.c.bf16 %v652_v21, %v650_v20  ;;  %v651_v25 = vld [vmem:[%s8175_s4 + $0x1d0] sm:$0xff]  ;;  %v654_v26 = vld [vmem:[%s8175_s4 + $0x1e8] sm:$0xff]  ;;  %v656_v27 = vld [vmem:[%s8175_s4 + $0x1f8] sm:$0xff] }
  0x1a   : > { %4309 = vmatprep.subr.bf16.mxu0 %v4308_v32  ;;  %v4346_v28 = vpack.c.bf16 %v651_v25, %v649_v24  ;;  %v4348_v29 = vpack.c.bf16 %v656_v27, %v654_v26  ;;  %v653_v30 = vld [vmem:[%s8175_s4 + $0x1e0] sm:$0xff]  ;;  %v655_v31 = vld [vmem:[%s8175_s4 + $0x1f0] sm:$0xff]  ;;  %v658_v32 = vld [vmem:[%s8175_s4 + $0x208] sm:$0xff] }
  0x1b   : > { %v660_v33 = vld [vmem:[%s8175_s4 + $0x218] sm:$0xff]  ;;  %v4350_v34 = vpack.c.bf16 %v655_v31, %v653_v30  ;;  %v657_v36 = vld [vmem:[%s8175_s4 + $0x200] sm:$0xff]  ;;  %v666_v46 = vld [vmem:[%s8175_s4 + $0x248] sm:$0xff] }
  0x1c   : > { %v4352_v35 = vpack.c.bf16 %v660_v33, %v658_v32  ;;  %v664_v39 = vld [vmem:[%s8175_s4 + $0x238] sm:$0xff]  ;;  %v481_v40 = vld [vmem:[%s5584_s24] sm:$0xff]  ;;  %v667_v53 = vld [vmem:[%s8175_s4 + $0x250] sm:$0xff] }
  0x1d   : > { %4311 = vmatpush1.bf16.msra.mxu0 %v4310_v37  ;;  %v659_v37 = vld [vmem:[%s8175_s4 + $0x210] sm:$0xff]  ;;  %v489_v42 = vld [vmem:[%s5584_s24 + $0x40] sm:$0xff]  ;;  %v668_v47 = vld [vmem:[%s8175_s4 + $0x258] sm:$0xff] }
  0x1e   : > { %4313 = vmatprep.subr.bf16.mxu0 %v4312_v38  ;;  %v662_v38 = vld [vmem:[%s8175_s4 + $0x228] sm:$0xff]  ;;  %v4354_v41 = vpack.c.bf16 %v659_v37, %v657_v36  ;;  %v488_v48 = vld [vmem:[%s5584_s24 + $0x38] sm:$0xff]  ;;  %v665_v52 = vld [vmem:[%s8175_s4 + $0x240] sm:$0xff] }
  0x1f   : > { %v4356_v43 = vpack.c.bf16 %v664_v39, %v662_v38  ;;  %v670_v54 = vld [vmem:[%s8175_s4 + $0x268] sm:$0xff]  ;;  %v672_v55 = vld [vmem:[%s8175_s4 + $0x278] sm:$0xff]  ;;  %v503_v58 = vld [vmem:[%s5584_s24 + $0xb0] sm:$0xff] }
  0x20   : > { %v4364_v59 = vpack.c.bf16 %v672_v55, %v670_v54  ;;  %v669_v60 = vld [vmem:[%s8175_s4 + $0x260] sm:$0xff]  ;;  %v671_v61 = vld [vmem:[%s8175_s4 + $0x270] sm:$0xff]  ;;  %v502_v0 = vld [vmem:[%s5584_s24 + $0xa8] sm:$0xff] }
  0x21   : > { %4315 = vmatpush1.bf16.msra.mxu0 %v4314_v44  ;;  %v661_v44 = vld [vmem:[%s8175_s4 + $0x220] sm:$0xff]  ;;  %v4366_v1 = vpack.c.bf16 %v671_v61, %v669_v60  ;;  %v510_v2 = vld [vmem:[%s5584_s24 + $0xe8] sm:$0xff]  ;;  %v680_v7 = vld [vmem:[%s8175_s4 + $0x2b8] sm:$0xff] }
  0x22   : > { %4317 = vmatprep.subr.bf16.mxu0 %v4316_v45  ;;  %v663_v45 = vld [vmem:[%s8175_s4 + $0x230] sm:$0xff]  ;;  %v678_v6 = vld [vmem:[%s8175_s4 + $0x2a8] sm:$0xff]  ;;  %v509_v8 = vld [vmem:[%s5584_s24 + $0xe0] sm:$0xff] }
  0x23   : > { %v4358_v49 = vpack.c.bf16 %v663_v45, %v661_v44  ;;  %v677_v12 = vld [vmem:[%s8175_s4 + $0x2a0] sm:$0xff]  ;;  %v679_v13 = vld [vmem:[%s8175_s4 + $0x2b0] sm:$0xff]  ;;  %v682_v14 = vld [vmem:[%s8175_s4 + $0x2c8] sm:$0xff] }
  0x24   : > { %v684_v15 = vld [vmem:[%s8175_s4 + $0x2d8] sm:$0xff]  ;;  %v681_v20 = vld [vmem:[%s8175_s4 + $0x2c0] sm:$0xff]  ;;  %v683_v21 = vld [vmem:[%s8175_s4 + $0x2d0] sm:$0xff] }
  0x25   : > { %4319 = vmatpush1.bf16.msra.mxu0 %v4318_v50  ;;  %v496_v50 = vld [vmem:[%s5584_s24 + $0x78] sm:$0xff]  ;;  %v4376_v19 = vpack.c.bf16 %v684_v15, %v682_v14  ;;  %v523_v24 = vld [vmem:[%s5584_s24 + $0x150] sm:$0xff]  ;;  %v4378_v25 = vpack.c.bf16 %v683_v21, %v681_v20  ;;  %v690_v30 = vld [vmem:[%s8175_s4 + $0x308] sm:$0xff] }
  0x26   : > { %4321 = vmatprep.subr.bf16.mxu0 %v4320_v51  ;;  %v4360_v51 = vpack.c.bf16 %v668_v47, %v666_v46  ;;  %v524_v18 = vld [vmem:[%s5584_s24 + $0x158] sm:$0xff]  ;;  %v531_v26 = vld [vmem:[%s5584_s24 + $0x190] sm:$0xff]  ;;  %v530_v32 = vld [vmem:[%s5584_s24 + $0x188] sm:$0xff] }
  0x27   : > { %v692_v31 = vld [vmem:[%s8175_s4 + $0x318] sm:$0xff]  ;;  %v689_v36 = vld [vmem:[%s8175_s4 + $0x300] sm:$0xff]  ;;  %v691_v37 = vld [vmem:[%s8175_s4 + $0x310] sm:$0xff] }
  0x28   : > { %v694_v38 = vld [vmem:[%s8175_s4 + $0x328] sm:$0xff]  ;;  %v696_v39 = vld [vmem:[%s8175_s4 + $0x338] sm:$0xff]  ;;  %v693_v44 = vld [vmem:[%s8175_s4 + $0x320] sm:$0xff] }
  0x29   : > { %4323 = vmatpush1.bf16.msra.mxu0 %v4322_v56  ;;  %v495_v56 = vld [vmem:[%s5584_s24 + $0x70] sm:$0xff]  ;;  %v698_v46 = vld [vmem:[%s8175_s4 + $0x348] sm:$0xff]  ;;  %v700_v47 = vld [vmem:[%s8175_s4 + $0x358] sm:$0xff] }
  0x2a   : > { %4325 = vmatprep.subr.bf16.mxu0 %v4324_v57  ;;  %v4362_v57 = vpack.c.bf16 %v667_v53, %v665_v52  ;;  %v695_v45 = vld [vmem:[%s8175_s4 + $0x330] sm:$0xff]  ;;  %v697_v52 = vld [vmem:[%s8175_s4 + $0x340] sm:$0xff]  ;;  %v702_v54 = vld [vmem:[%s8175_s4 + $0x368] sm:$0xff] }
  0x2b   : > { %v699_v53 = vld [vmem:[%s8175_s4 + $0x350] sm:$0xff]  ;;  %v704_v55 = vld [vmem:[%s8175_s4 + $0x378] sm:$0xff]  ;;  %v701_v60 = vld [vmem:[%s8175_s4 + $0x360] sm:$0xff] }
  0x2c   : > { %v703_v61 = vld [vmem:[%s8175_s4 + $0x370] sm:$0xff]  ;;  %v714_v14 = vld [vmem:[%s8175_s4 + $0x3c8] sm:$0xff]  ;;  %v716_v15 = vld [vmem:[%s8175_s4 + $0x3d8] sm:$0xff] }
  0x2d   : > { %4327 = vmatpush1.bf16.msra.mxu0 %v4326_v62  ;;  %v674_v62 = vld [vmem:[%s8175_s4 + $0x288] sm:$0xff]  ;;  %v713_v20 = vld [vmem:[%s8175_s4 + $0x3c0] sm:$0xff]  ;;  %v715_v21 = vld [vmem:[%s8175_s4 + $0x3d0] sm:$0xff] }
  0x2e   : > { %4329 = vmatprep.subr.bf16.mxu0 %v4328_v63  ;;  %v676_v63 = vld [vmem:[%s8175_s4 + $0x298] sm:$0xff] }
  0x2f   : > { %v4368_v3 = vpack.c.bf16 %v676_v63, %v674_v62  ;;  %v706_v62 = vld [vmem:[%s8175_s4 + $0x388] sm:$0xff]  ;;  %v708_v63 = vld [vmem:[%s8175_s4 + $0x398] sm:$0xff] }
  0x31   : > { %4331 = vmatpush1.bf16.msra.mxu0 %v4330_v4  ;;  %v673_v4 = vld [vmem:[%s8175_s4 + $0x280] sm:$0xff] }
  0x32   : > { %4333 = vmatprep.subr.bf16.mxu0 %v4332_v5  ;;  %v675_v5 = vld [vmem:[%s8175_s4 + $0x290] sm:$0xff] }
  0x33   : > { %v4370_v9 = vpack.c.bf16 %v675_v5, %v673_v4  ;;  %v705_v4 = vld [vmem:[%s8175_s4 + $0x380] sm:$0xff]  ;;  %v707_v5 = vld [vmem:[%s8175_s4 + $0x390] sm:$0xff] }
  0x35   : > { %4335 = vmatpush1.bf16.msra.mxu0 %v4334_v10  ;;  %v517_v10 = vld [vmem:[%s5584_s24 + $0x120] sm:$0xff] }
  0x36   : > { %4337 = vmatprep.subr.bf16.mxu0 %v4336_v11  ;;  %v4372_v11 = vpack.c.bf16 %v680_v7, %v678_v6  ;;  %v710_v6 = vld [vmem:[%s8175_s4 + $0x3a8] sm:$0xff]  ;;  %v712_v7 = vld [vmem:[%s8175_s4 + $0x3b8] sm:$0xff] }
  0x39   : > { %4339 = vmatpush1.bf16.msra.mxu0 %v4338_v16  ;;  %v516_v16 = vld [vmem:[%s5584_s24 + $0x118] sm:$0xff] }
  0x3a   : > { %4341 = vmatprep.subr.bf16.mxu0 %v4340_v17  ;;  %v4374_v17 = vpack.c.bf16 %v679_v13, %v677_v12  ;;  %v709_v12 = vld [vmem:[%s8175_s4 + $0x3a0] sm:$0xff]  ;;  %v711_v13 = vld [vmem:[%s8175_s4 + $0x3b0] sm:$0xff] }
  0x3d   : > { %4343 = vmatpush1.bf16.msra.mxu0 %v4342_v22  ;;  %v686_v22 = vld [vmem:[%s8175_s4 + $0x2e8] sm:$0xff] }
  0x3e   : > { %4345 = vmatprep.subr.bf16.mxu0 %v4344_v23  ;;  %v688_v23 = vld [vmem:[%s8175_s4 + $0x2f8] sm:$0xff] }
  0x3f   : > { %v4380_v27 = vpack.c.bf16 %v688_v23, %v686_v22  ;;  %v718_v22 = vld [vmem:[%s8175_s4 + $0x3e8] sm:$0xff]  ;;  %v720_v23 = vld [vmem:[%s8175_s4 + $0x3f8] sm:$0xff] }
  0x41   : > { %4347 = vmatpush1.bf16.msra.mxu0 %v4346_v28  ;;  %v685_v28 = vld [vmem:[%s8175_s4 + $0x2e0] sm:$0xff] }
  0x42   : > { %4349 = vmatprep.subr.bf16.mxu0 %v4348_v29  ;;  %v687_v29 = vld [vmem:[%s8175_s4 + $0x2f0] sm:$0xff] }
  0x43   : > { %v4382_v33 = vpack.c.bf16 %v687_v29, %v685_v28  ;;  %v717_v28 = vld [vmem:[%s8175_s4 + $0x3e0] sm:$0xff]  ;;  %v719_v29 = vld [vmem:[%s8175_s4 + $0x3f0] sm:$0xff] }
  0x45   : > { %4351 = vmatpush1.bf16.msra.mxu0 %v4350_v34  ;;  %v538_v34 = vld [vmem:[%s5584_s24 + $0x1c8] sm:$0xff] }
  0x46   : > { %4353 = vmatprep.subr.bf16.mxu0 %v4352_v35  ;;  %v4384_v35 = vpack.c.bf16 %v692_v31, %v690_v30  ;;  %v722_v30 = vld [vmem:[%s8175_s4 + $0x408] sm:$0xff]  ;;  %v724_v31 = vld [vmem:[%s8175_s4 + $0x418] sm:$0xff] }
  0x48   : > { %914 = vmatmul.mubr.f32.vlgmr.msra.gmra.mrb[0].mxu0 %v481_v40  ;;  %v537_v40 = vld [vmem:[%s5584_s24 + $0x1c0] sm:$0xff] }
  0x49   : > { %4355 = vmatpush1.bf16.msra.mxu0 %v4354_v41  ;;  %919 = vmatprep.mubr.f32.mxu0 %v489_v42  ;;  %v4386_v41 = vpack.c.bf16 %v691_v37, %v689_v36  ;;  %v545_v42 = vld [vmem:[%s5584_s24 + $0x200] sm:$0xff]  ;;  %v723_v37 = vld [vmem:[%s8175_s4 + $0x410] sm:$0xff] }
  0x4a   : > { %4357 = vmatprep.subr.bf16.mxu0 %v4356_v43  ;;  %v4388_v43 = vpack.c.bf16 %v696_v39, %v694_v38  ;;  %v721_v36 = vld [vmem:[%s8175_s4 + $0x400] sm:$0xff]  ;;  %v726_v38 = vld [vmem:[%s8175_s4 + $0x428] sm:$0xff]  ;;  %v728_v39 = vld [vmem:[%s8175_s4 + $0x438] sm:$0xff] }
  0x4c   : > { %920 = vmatmul.mubr.f32.gmra.mrb[2].mxu0 %v488_v48  ;;  %v544_v48 = vld [vmem:[%s5584_s24 + $0x1f8] sm:$0xff] }
  0x4d   : > { %4359 = vmatpush1.bf16.msra.mxu0 %v4358_v49  ;;  %925 = vmatprep.mubr.f32.mxu0 %v496_v50  ;;  %v4390_v49 = vpack.c.bf16 %v695_v45, %v693_v44  ;;  %v552_v50 = vld [vmem:[%s5584_s24 + $0x238] sm:$0xff]  ;;  %v725_v44 = vld [vmem:[%s8175_s4 + $0x420] sm:$0xff]  ;;  %v727_v45 = vld [vmem:[%s8175_s4 + $0x430] sm:$0xff] }
  0x4e   : > { %4361 = vmatprep.subr.bf16.mxu0 %v4360_v51  ;;  %v4392_v51 = vpack.c.bf16 %v700_v47, %v698_v46  ;;  %v730_v46 = vld [vmem:[%s8175_s4 + $0x448] sm:$0xff]  ;;  %v732_v47 = vld [vmem:[%s8175_s4 + $0x458] sm:$0xff] }
  0x50   : > { %926 = vmatmul.mubr.f32.gmra.mrb[4].mxu0 %v495_v56  ;;  %v551_v56 = vld [vmem:[%s5584_s24 + $0x230] sm:$0xff] }
  0x51   : > { %4363 = vmatpush1.bf16.msra.mxu0 %v4362_v57  ;;  %931 = vmatprep.mubr.f32.mxu0 %v503_v58  ;;  %v4394_v57 = vpack.c.bf16 %v699_v53, %v697_v52  ;;  %v559_v58 = vld [vmem:[%s5584_s24 + $0x270] sm:$0xff]  ;;  %v729_v52 = vld [vmem:[%s8175_s4 + $0x440] sm:$0xff] }
  0x52   : > { %4365 = vmatprep.subr.bf16.mxu0 %v4364_v59  ;;  %v4396_v59 = vpack.c.bf16 %v704_v55, %v702_v54  ;;  %v731_v53 = vld [vmem:[%s8175_s4 + $0x450] sm:$0xff]  ;;  %v734_v54 = vld [vmem:[%s8175_s4 + $0x468] sm:$0xff]  ;;  %v736_v55 = vld [vmem:[%s8175_s4 + $0x478] sm:$0xff] }
  0x54   : > { %932 = vmatmul.mubr.f32.gmra.mrb[6].mxu0 %v502_v0  ;;  %v558_v0 = vld [vmem:[%s5584_s24 + $0x268] sm:$0xff] }
  0x55   : > { %4367 = vmatpush1.bf16.msra.mxu0 %v4366_v1  ;;  %937 = vmatprep.mubr.f32.mxu0 %v510_v2  ;;  %v4398_v1 = vpack.c.bf16 %v703_v61, %v701_v60  ;;  %v566_v2 = vld [vmem:[%s5584_s24 + $0x2a8] sm:$0xff]  ;;  %v733_v60 = vld [vmem:[%s8175_s4 + $0x460] sm:$0xff]  ;;  %v735_v61 = vld [vmem:[%s8175_s4 + $0x470] sm:$0xff] }
  0x56   : > { %4369 = vmatprep.subr.bf16.mxu0 %v4368_v3  ;;  %v4400_v3 = vpack.c.bf16 %v708_v63, %v706_v62  ;;  %v738_v62 = vld [vmem:[%s8175_s4 + $0x488] sm:$0xff]  ;;  %v740_v63 = vld [vmem:[%s8175_s4 + $0x498] sm:$0xff] }
  0x58   : > { %938 = vmatmul.mubr.f32.gmra.mrb[8].mxu0 %v509_v8  ;;  %v565_v8 = vld [vmem:[%s5584_s24 + $0x2a0] sm:$0xff] }
  0x59   : > { %4371 = vmatpush1.bf16.msra.mxu0 %v4370_v9  ;;  %943 = vmatprep.mubr.f32.mxu0 %v517_v10  ;;  %v4402_v9 = vpack.c.bf16 %v707_v5, %v705_v4  ;;  %v573_v10 = vld [vmem:[%s5584_s24 + $0x2e0] sm:$0xff]  ;;  %v739_v5 = vld [vmem:[%s8175_s4 + $0x490] sm:$0xff] }
  0x5a   : > { %4373 = vmatprep.subr.bf16.mxu0 %v4372_v11  ;;  %v4404_v11 = vpack.c.bf16 %v712_v7, %v710_v6  ;;  %v737_v4 = vld [vmem:[%s8175_s4 + $0x480] sm:$0xff]  ;;  %v742_v6 = vld [vmem:[%s8175_s4 + $0x4a8] sm:$0xff]  ;;  %v744_v7 = vld [vmem:[%s8175_s4 + $0x4b8] sm:$0xff] }
  0x5c   : > { %944 = vmatmul.mubr.f32.gmra.mrb[10].mxu0 %v516_v16  ;;  %v572_v16 = vld [vmem:[%s5584_s24 + $0x2d8] sm:$0xff] }
  0x5d   : > { %4375 = vmatpush1.bf16.msra.mxu0 %v4374_v17  ;;  %949 = vmatprep.mubr.f32.mxu0 %v524_v18  ;;  %v4406_v17 = vpack.c.bf16 %v711_v13, %v709_v12  ;;  %v580_v18 = vld [vmem:[%s5584_s24 + $0x318] sm:$0xff]  ;;  %v741_v12 = vld [vmem:[%s8175_s4 + $0x4a0] sm:$0xff]  ;;  %v743_v13 = vld [vmem:[%s8175_s4 + $0x4b0] sm:$0xff] }
  0x5e   : > { %4377 = vmatprep.subr.bf16.mxu0 %v4376_v19  ;;  %v4408_v19 = vpack.c.bf16 %v716_v15, %v714_v14  ;;  %v746_v14 = vld [vmem:[%s8175_s4 + $0x4c8] sm:$0xff]  ;;  %v748_v15 = vld [vmem:[%s8175_s4 + $0x4d8] sm:$0xff] }
  0x60   : > { %950 = vmatmul.mubr.f32.gmra.mrb[12].mxu0 %v523_v24  ;;  %v579_v24 = vld [vmem:[%s5584_s24 + $0x310] sm:$0xff] }
  0x61   : > { %4379 = vmatpush1.bf16.msra.mxu0 %v4378_v25  ;;  %955 = vmatprep.mubr.f32.mxu0 %v531_v26  ;;  %v4410_v25 = vpack.c.bf16 %v715_v21, %v713_v20  ;;  %v587_v26 = vld [vmem:[%s5584_s24 + $0x350] sm:$0xff]  ;;  %v745_v20 = vld [vmem:[%s8175_s4 + $0x4c0] sm:$0xff] }
  0x62   : > { %4381 = vmatprep.subr.bf16.mxu0 %v4380_v27  ;;  %v4412_v27 = vpack.c.bf16 %v720_v23, %v718_v22  ;;  %v747_v21 = vld [vmem:[%s8175_s4 + $0x4d0] sm:$0xff]  ;;  %v750_v22 = vld [vmem:[%s8175_s4 + $0x4e8] sm:$0xff]  ;;  %v752_v23 = vld [vmem:[%s8175_s4 + $0x4f8] sm:$0xff] }
  0x64   : > { %956 = vmatmul.mubr.f32.gmra.mrb[14].mxu0 %v530_v32  ;;  %v586_v32 = vld [vmem:[%s5584_s24 + $0x348] sm:$0xff] }
  0x65   : > { %4383 = vmatpush1.bf16.msra.mxu0 %v4382_v33  ;;  %961 = vmatprep.mubr.f32.mxu0 %v538_v34  ;;  %v4414_v33 = vpack.c.bf16 %v719_v29, %v717_v28  ;;  %v484_v34 = vld [vmem:[%s5584_s24 + $0x18] sm:$0xff]  ;;  %v749_v28 = vld [vmem:[%s8175_s4 + $0x4e0] sm:$0xff]  ;;  %v751_v29 = vld [vmem:[%s8175_s4 + $0x4f0] sm:$0xff] }
  0x66   : > { %4385 = vmatprep.subr.bf16.mxu0 %v4384_v35  ;;  %v4416_v35 = vpack.c.bf16 %v724_v31, %v722_v30  ;;  %v754_v30 = vld [vmem:[%s8175_s4 + $0x508] sm:$0xff]  ;;  %v756_v31 = vld [vmem:[%s8175_s4 + $0x518] sm:$0xff] }
  0x68   : > { %962 = vmatmul.mubr.f32.gmra.mrb[16].mxu0 %v537_v40  ;;  %v483_v40 = vld [vmem:[%s5584_s24 + $0x10] sm:$0xff] }
  0x69   : > { %4387 = vmatpush1.bf16.msra.mxu0 %v4386_v41  ;;  %967 = vmatprep.mubr.f32.mxu0 %v545_v42  ;;  %v4418_v41 = vpack.c.bf16 %v723_v37, %v721_v36  ;;  %v491_v42 = vld [vmem:[%s5584_s24 + $0x50] sm:$0xff]  ;;  %v753_v36 = vld [vmem:[%s8175_s4 + $0x500] sm:$0xff] }
  0x6a   : > { %4389 = vmatprep.subr.bf16.mxu0 %v4388_v43  ;;  %v4420_v43 = vpack.c.bf16 %v728_v39, %v726_v38  ;;  %v755_v37 = vld [vmem:[%s8175_s4 + $0x510] sm:$0xff]  ;;  %v758_v38 = vld [vmem:[%s8175_s4 + $0x528] sm:$0xff]  ;;  %v760_v39 = vld [vmem:[%s8175_s4 + $0x538] sm:$0xff] }
  0x6c   : > { %968 = vmatmul.mubr.f32.gmra.mrb[18].mxu0 %v544_v48  ;;  %v490_v48 = vld [vmem:[%s5584_s24 + $0x48] sm:$0xff] }
  0x6d   : > { %4391 = vmatpush1.bf16.msra.mxu0 %v4390_v49  ;;  %973 = vmatprep.mubr.f32.mxu0 %v552_v50  ;;  %v4422_v49 = vpack.c.bf16 %v727_v45, %v725_v44  ;;  %v498_v50 = vld [vmem:[%s5584_s24 + $0x88] sm:$0xff]  ;;  %v757_v44 = vld [vmem:[%s8175_s4 + $0x520] sm:$0xff]  ;;  %v759_v45 = vld [vmem:[%s8175_s4 + $0x530] sm:$0xff] }
  0x6e   : > { %4393 = vmatprep.subr.bf16.mxu0 %v4392_v51  ;;  %v4424_v51 = vpack.c.bf16 %v732_v47, %v730_v46  ;;  %v762_v46 = vld [vmem:[%s8175_s4 + $0x548] sm:$0xff]  ;;  %v764_v47 = vld [vmem:[%s8175_s4 + $0x558] sm:$0xff] }
  0x70   : > { %974 = vmatmul.mubr.f32.gmra.mrb[20].mxu0 %v551_v56  ;;  %v497_v56 = vld [vmem:[%s5584_s24 + $0x80] sm:$0xff] }
  0x71   : > { %4395 = vmatpush1.bf16.msra.mxu0 %v4394_v57  ;;  %979 = vmatprep.mubr.f32.mxu0 %v559_v58  ;;  %v4426_v57 = vpack.c.bf16 %v731_v53, %v729_v52  ;;  %v505_v58 = vld [vmem:[%s5584_s24 + $0xc0] sm:$0xff]  ;;  %v763_v53 = vld [vmem:[%s8175_s4 + $0x550] sm:$0xff] }
  0x72   : > { %4397 = vmatprep.subr.bf16.mxu0 %v4396_v59  ;;  %v4428_v59 = vpack.c.bf16 %v736_v55, %v734_v54  ;;  %v761_v52 = vld [vmem:[%s8175_s4 + $0x540] sm:$0xff]  ;;  %v766_v54 = vld [vmem:[%s8175_s4 + $0x568] sm:$0xff]  ;;  %v768_v55 = vld [vmem:[%s8175_s4 + $0x578] sm:$0xff] }
  0x74   : > { %980 = vmatmul.mubr.f32.gmra.mrb[22].mxu0 %v558_v0  ;;  %v504_v0 = vld [vmem:[%s5584_s24 + $0xb8] sm:$0xff] }
  0x75   : > { %4399 = vmatpush1.bf16.msra.mxu0 %v4398_v1  ;;  %985 = vmatprep.mubr.f32.mxu0 %v566_v2  ;;  %v4430_v1 = vpack.c.bf16 %v735_v61, %v733_v60  ;;  %v512_v2 = vld [vmem:[%s5584_s24 + $0xf8] sm:$0xff]  ;;  %v765_v60 = vld [vmem:[%s8175_s4 + $0x560] sm:$0xff]  ;;  %v767_v61 = vld [vmem:[%s8175_s4 + $0x570] sm:$0xff] }
  0x76   : > { %4401 = vmatprep.subr.bf16.mxu0 %v4400_v3  ;;  %v4432_v3 = vpack.c.bf16 %v740_v63, %v738_v62  ;;  %v770_v62 = vld [vmem:[%s8175_s4 + $0x588] sm:$0xff]  ;;  %v772_v63 = vld [vmem:[%s8175_s4 + $0x598] sm:$0xff] }
  0x78   : > { %986 = vmatmul.mubr.f32.gmra.mrb[24].mxu0 %v565_v8  ;;  %v511_v8 = vld [vmem:[%s5584_s24 + $0xf0] sm:$0xff] }
  0x79   : > { %4403 = vmatpush1.bf16.msra.mxu0 %v4402_v9  ;;  %991 = vmatprep.mubr.f32.mxu0 %v573_v10  ;;  %v4434_v9 = vpack.c.bf16 %v739_v5, %v737_v4  ;;  %v519_v10 = vld [vmem:[%s5584_s24 + $0x130] sm:$0xff]  ;;  %v769_v4 = vld [vmem:[%s8175_s4 + $0x580] sm:$0xff] }
  0x7a   : > { %4405 = vmatprep.subr.bf16.mxu0 %v4404_v11  ;;  %v4436_v11 = vpack.c.bf16 %v744_v7, %v742_v6  ;;  %v771_v5 = vld [vmem:[%s8175_s4 + $0x590] sm:$0xff]  ;;  %v774_v6 = vld [vmem:[%s8175_s4 + $0x5a8] sm:$0xff]  ;;  %v776_v7 = vld [vmem:[%s8175_s4 + $0x5b8] sm:$0xff] }
  0x7c   : > { %992 = vmatmul.mubr.f32.gmra.mrb[26].mxu0 %v572_v16  ;;  %v518_v16 = vld [vmem:[%s5584_s24 + $0x128] sm:$0xff] }
  0x7d   : > { %4407 = vmatpush1.bf16.msra.mxu0 %v4406_v17  ;;  %997 = vmatprep.mubr.f32.mxu0 %v580_v18  ;;  %v4438_v17 = vpack.c.bf16 %v743_v13, %v741_v12  ;;  %v526_v18 = vld [vmem:[%s5584_s24 + $0x168] sm:$0xff]  ;;  %v773_v12 = vld [vmem:[%s8175_s4 + $0x5a0] sm:$0xff]  ;;  %v775_v13 = vld [vmem:[%s8175_s4 + $0x5b0] sm:$0xff] }
  0x7e   : > { %4409 = vmatprep.subr.bf16.mxu0 %v4408_v19  ;;  %v4440_v19 = vpack.c.bf16 %v748_v15, %v746_v14  ;;  %v778_v14 = vld [vmem:[%s8175_s4 + $0x5c8] sm:$0xff]  ;;  %v780_v15 = vld [vmem:[%s8175_s4 + $0x5d8] sm:$0xff] }
  0x80   : > { %998 = vmatmul.mubr.f32.gmra.mrb[28].mxu0 %v579_v24  ;;  %v525_v24 = vld [vmem:[%s5584_s24 + $0x160] sm:$0xff] }
  0x81   : > { %4411 = vmatpush1.bf16.msra.mxu0 %v4410_v25  ;;  %1003 = vmatprep.mubr.f32.mxu0 %v587_v26  ;;  %v4442_v25 = vpack.c.bf16 %v747_v21, %v745_v20  ;;  %v533_v26 = vld [vmem:[%s5584_s24 + $0x1a0] sm:$0xff]  ;;  %v779_v21 = vld [vmem:[%s8175_s4 + $0x5d0] sm:$0xff] }
  0x82   : > { %4413 = vmatprep.subr.bf16.mxu0 %v4412_v27  ;;  %v4444_v27 = vpack.c.bf16 %v752_v23, %v750_v22  ;;  %v777_v20 = vld [vmem:[%s8175_s4 + $0x5c0] sm:$0xff]  ;;  %v782_v22 = vld [vmem:[%s8175_s4 + $0x5e8] sm:$0xff]  ;;  %v784_v23 = vld [vmem:[%s8175_s4 + $0x5f8] sm:$0xff] }
  0x84   : > { %1004 = vmatmul.mubr.f32.gmra.mrb[30].mxu0 %v586_v32  ;;  %v532_v32 = vld [vmem:[%s5584_s24 + $0x198] sm:$0xff] }
  0x85   : > { %4415 = vmatpush1.bf16.msra.mxu0 %v4414_v33  ;;  %1074 = vmatprep.mubr.f32.mxu0 %v484_v34  ;;  %v4446_v33 = vpack.c.bf16 %v751_v29, %v749_v28  ;;  %v540_v34 = vld [vmem:[%s5584_s24 + $0x1d8] sm:$0xff]  ;;  %v781_v28 = vld [vmem:[%s8175_s4 + $0x5e0] sm:$0xff]  ;;  %v783_v29 = vld [vmem:[%s8175_s4 + $0x5f0] sm:$0xff] }
  0x86   : > { %4417 = vmatprep.subr.bf16.mxu0 %v4416_v35  ;;  %v4448_v35 = vpack.c.bf16 %v756_v31, %v754_v30  ;;  %v786_v30 = vld [vmem:[%s8175_s4 + $0x608] sm:$0xff]  ;;  %v788_v31 = vld [vmem:[%s8175_s4 + $0x618] sm:$0xff] }
  0x88   : > { %1075 = vmatmul.mubr.f32.vlgmr.msra.gmra.mrb[0].mxu0 %v483_v40  ;;  %v539_v40 = vld [vmem:[%s5584_s24 + $0x1d0] sm:$0xff] }
  0x89   : > { %4419 = vmatpush1.bf16.msra.mxu0 %v4418_v41  ;;  %1080 = vmatprep.mubr.f32.mxu0 %v491_v42  ;;  %v4450_v41 = vpack.c.bf16 %v755_v37, %v753_v36  ;;  %v547_v42 = vld [vmem:[%s5584_s24 + $0x210] sm:$0xff]  ;;  %v785_v36 = vld [vmem:[%s8175_s4 + $0x600] sm:$0xff] }
  0x8a   : > { %4421 = vmatprep.subr.bf16.mxu0 %v4420_v43  ;;  %v4452_v43 = vpack.c.bf16 %v760_v39, %v758_v38  ;;  %v787_v37 = vld [vmem:[%s8175_s4 + $0x610] sm:$0xff]  ;;  %v485_v38 = vld [vmem:[%s5584_s24 + $0x20] sm:$0xff]  ;;  %v790_v39 = vld [vmem:[%s8175_s4 + $0x628] sm:$0xff] }
  0x8c   : > { %1081 = vmatmul.mubr.f32.gmra.mrb[2].mxu0 %v490_v48  ;;  %v546_v48 = vld [vmem:[%s5584_s24 + $0x208] sm:$0xff] }
  0x8d   : > { %4423 = vmatpush1.bf16.msra.mxu0 %v4422_v49  ;;  %1086 = vmatprep.mubr.f32.mxu0 %v498_v50  ;;  %v4454_v49 = vpack.c.bf16 %v759_v45, %v757_v44  ;;  %v554_v50 = vld [vmem:[%s5584_s24 + $0x248] sm:$0xff]  ;;  %v1541_v44 = vld [vmem:[%s8176_s5 + $0x80] sm:$0xff] }
  0x8e   : > { %4425 = vmatprep.subr.bf16.mxu0 %v4424_v51  ;;  %v4456_v51 = vpack.c.bf16 %v764_v47, %v762_v46  ;;  %v1542_v45 = vld [vmem:[%s8176_s5 + $0x88] sm:$0xff]  ;;  %v1525_v46 = vld [vmem:[%s8176_s5] sm:$0xff]  ;;  %v4482_v47 = vpack.c.bf16 %v787_v37, %v785_v36  ;;  %v808_v36 = vld [vmem:[%s8175_s4 + $0x6b8] sm:$0xff] }
  0x8f   : > { %v1551_v37 = vld [vmem:[%s8176_s5 + $0xd0] sm:$0xff] }
  0x90   : > { %1087 = vmatmul.mubr.f32.gmra.mrb[4].mxu0 %v497_v56  ;;  %v553_v56 = vld [vmem:[%s5584_s24 + $0x240] sm:$0xff] }
  0x91   : > { %4427 = vmatpush1.bf16.msra.mxu0 %v4426_v57  ;;  %1092 = vmatprep.mubr.f32.mxu0 %v505_v58  ;;  %v4458_v57 = vpack.c.bf16 %v763_v53, %v761_v52  ;;  %v561_v58 = vld [vmem:[%s5584_s24 + $0x280] sm:$0xff]  ;;  %v794_v53 = vld [vmem:[%s8175_s4 + $0x648] sm:$0xff] }
  0x92   : > { %4429 = vmatprep.subr.bf16.mxu0 %v4428_v59  ;;  %v4460_v59 = vpack.c.bf16 %v768_v55, %v766_v54 }
  0x94   : > { %1093 = vmatmul.mubr.f32.gmra.mrb[6].mxu0 %v504_v0  ;;  %v560_v0 = vld [vmem:[%s5584_s24 + $0x278] sm:$0xff] }
  0x95   : > { %4431 = vmatpush1.bf16.msra.mxu0 %v4430_v1  ;;  %1098 = vmatprep.mubr.f32.mxu0 %v512_v2  ;;  %v4462_v1 = vpack.c.bf16 %v767_v61, %v765_v60  ;;  %v568_v2 = vld [vmem:[%s5584_s24 + $0x2b8] sm:$0xff]  ;;  %v1546_v60 = vld [vmem:[%s8176_s5 + $0xa8] sm:$0xff] }
  0x96   : > { %4433 = vmatprep.subr.bf16.mxu0 %v4432_v3  ;;  %v4464_v3 = vpack.c.bf16 %v772_v63, %v770_v62  ;;  %v492_v61 = vld [vmem:[%s5584_s24 + $0x58] sm:$0xff] }
  0x97   : > { %v500_v63 = vld [vmem:[%s5584_s24 + $0x98] sm:$0xff] }
  0x98   : > { %1099 = vmatmul.mubr.f32.gmra.mrb[8].mxu0 %v511_v8  ;;  %v567_v8 = vld [vmem:[%s5584_s24 + $0x2b0] sm:$0xff] }
  0x99   : > { %4435 = vmatpush1.bf16.msra.mxu0 %v4434_v9  ;;  %1104 = vmatprep.mubr.f32.mxu0 %v519_v10  ;;  %v4466_v9 = vpack.c.bf16 %v771_v5, %v769_v4  ;;  %v575_v10 = vld [vmem:[%s5584_s24 + $0x2f0] sm:$0xff]  ;;  %v793_v4 = vld [vmem:[%s8175_s4 + $0x640] sm:$0xff] }
  0x9a   : > { %4437 = vmatprep.subr.bf16.mxu0 %v4436_v11  ;;  %v4468_v11 = vpack.c.bf16 %v776_v7, %v774_v6  ;;  %v795_v5 = vld [vmem:[%s8175_s4 + $0x650] sm:$0xff]  ;;  %v798_v6 = vld [vmem:[%s8175_s4 + $0x668] sm:$0xff] }
  0x9c   : > { %1105 = vmatmul.mubr.f32.gmra.mrb[10].mxu0 %v518_v16  ;;  %v574_v16 = vld [vmem:[%s5584_s24 + $0x2e8] sm:$0xff] }
  0x9d   : > { %4439 = vmatpush1.bf16.msra.mxu0 %v4438_v17  ;;  %1110 = vmatprep.mubr.f32.mxu0 %v526_v18  ;;  %v4470_v17 = vpack.c.bf16 %v775_v13, %v773_v12  ;;  %v582_v18 = vld [vmem:[%s5584_s24 + $0x328] sm:$0xff]  ;;  %v507_v13 = vld [vmem:[%s5584_s24 + $0xd0] sm:$0xff] }
  0x9e   : > { %4441 = vmatprep.subr.bf16.mxu0 %v4440_v19  ;;  %v4472_v19 = vpack.c.bf16 %v780_v15, %v778_v14  ;;  %v4490_v14 = vpack.c.bf16 %v795_v5, %v793_v4  ;;  %v1531_v15 = vld [vmem:[%s8176_s5 + $0x30] sm:$0xff]  ;;  %v534_v5 = vld [vmem:[%s5584_s24 + $0x1a8] sm:$0xff] }
  0x9f   : > { %v815_v4 = vld [vmem:[%s8175_s4 + $0x6f0] sm:$0xff] }
  0xa0   : > { %1111 = vmatmul.mubr.f32.gmra.mrb[12].mxu0 %v525_v24  ;;  %v581_v24 = vld [vmem:[%s5584_s24 + $0x320] sm:$0xff] }
  0xa1   : > { %4443 = vmatpush1.bf16.msra.mxu0 %v4442_v25  ;;  %1116 = vmatprep.mubr.f32.mxu0 %v533_v26  ;;  %v4474_v25 = vpack.c.bf16 %v779_v21, %v777_v20  ;;  %v589_v26 = vld [vmem:[%s5584_s24 + $0x360] sm:$0xff]  ;;  %v802_v20 = vld [vmem:[%s8175_s4 + $0x688] sm:$0xff] }
  0xa2   : > { %4445 = vmatprep.subr.bf16.mxu0 %v4444_v27  ;;  %v4476_v27 = vpack.c.bf16 %v784_v23, %v782_v22  ;;  %v804_v22 = vld [vmem:[%s8175_s4 + $0x698] sm:$0xff]  ;;  %v1549_v23 = vld [vmem:[%s8176_s5 + $0xc0] sm:$0xff] }
  0xa4   : > { %1117 = vmatmul.mubr.f32.gmra.mrb[14].mxu0 %v532_v32  ;;  %v588_v32 = vld [vmem:[%s5584_s24 + $0x358] sm:$0xff] }
  0xa5   : > { %4447 = vmatpush1.bf16.msra.mxu0 %v4446_v33  ;;  %1122 = vmatprep.mubr.f32.mxu0 %v540_v34  ;;  %v4478_v33 = vpack.c.bf16 %v783_v29, %v781_v28  ;;  %v486_v34 = vld [vmem:[%s5584_s24 + $0x28] sm:$0xff]  ;;  %v1533_v29 = vld [vmem:[%s8176_s5 + $0x40] sm:$0xff] }
  0xa6   : > { %4449 = vmatprep.subr.bf16.mxu0 %v4448_v35  ;;  %v4480_v35 = vpack.c.bf16 %v788_v31, %v786_v30  ;;  %v1534_v30 = vld [vmem:[%s8176_s5 + $0x48] sm:$0xff]  ;;  %v4496_v31 = vpack.c.bf16 %v804_v22, %v802_v20  ;;  %v583_v20 = vld [vmem:[%s5584_s24 + $0x330] sm:$0xff] }
  0xa7   : > { %v590_v22 = vld [vmem:[%s5584_s24 + $0x368] sm:$0xff] }
  0xa8   : > { %1123 = vmatmul.mubr.f32.gmra.mrb[16].mxu0 %v539_v40  ;;  %v792_v40 = vld [vmem:[%s8175_s4 + $0x638] sm:$0xff] }
  0xa9   : > { %4451 = vmatpush1.bf16.msra.mxu0 %v4450_v41  ;;  %1128 = vmatprep.mubr.f32.mxu0 %v547_v42  ;;  %v493_v41 = vld [vmem:[%s5584_s24 + $0x60] sm:$0xff]  ;;  %v4484_v52 = vpack.c.bf16 %v792_v40, %v790_v39  ;;  %v4530_v40 = vpack.c.bf16 %v1534_v30, %v1533_v29  ;;  %v522_v29 = vld [vmem:[%s5584_s24 + $0x148] sm:$0xff] }
  0xaa   : > { %4453 = vmatprep.subr.bf16.mxu0 %v4452_v43  ;;  %v789_v42 = vld [vmem:[%s8175_s4 + $0x620] sm:$0xff]  ;;  %v791_v43 = vld [vmem:[%s8175_s4 + $0x630] sm:$0xff] }
  0xab   : > { %v513_v39 = vld [vmem:[%s5584_s24 + $0x100] sm:$0xff] }
  0xac   : > { %1129 = vmatmul.mubr.f32.gmra.mrb[18].mxu0 %v546_v48  ;;  %v4512_v48 = vpack.c.bf16 %v1542_v45, %v1541_v44  ;;  %v1536_v44 = vld [vmem:[%s8176_s5 + $0x58] sm:$0xff]  ;;  %v529_v30 = vld [vmem:[%s5584_s24 + $0x180] sm:$0xff] }
  0xad   : > { %4455 = vmatpush1.bf16.msra.mxu0 %v4454_v49  ;;  %1134 = vmatprep.mubr.f32.mxu0 %v554_v50  ;;  %v1526_v49 = vld [vmem:[%s8176_s5 + $0x8] sm:$0xff]  ;;  %v1543_v50 = vld [vmem:[%s8176_s5 + $0x90] sm:$0xff] }
  0xae   : > { %4457 = vmatprep.subr.bf16.mxu0 %v4456_v51  ;;  %v1544_v51 = vld [vmem:[%s8176_s5 + $0x98] sm:$0xff]  ;;  %v4514_v54 = vpack.c.bf16 %v1526_v49, %v1525_v46  ;;  %4513 = vmatprep.subr.bf16.mxu1 %v4512_v48  ;;  %v805_v46 = vld [vmem:[%s8175_s4 + $0x6a0] sm:$0xff]  ;;  %v810_v48 = vld [vmem:[%s8175_s4 + $0x6c8] sm:$0xff] }
  0xaf   : > { %v4516_v55 = vpack.c.bf16 %v1544_v51, %v1543_v50  ;;  %v812_v50 = vld [vmem:[%s8175_s4 + $0x6d8] sm:$0xff]  ;;  %v1553_v51 = vld [vmem:[%s8176_s5 + $0xe0] sm:$0xff] }
  0xb0   : > { %1135 = vmatmul.mubr.f32.gmra.mrb[20].mxu0 %v553_v56  ;;  %v1527_v56 = vld [vmem:[%s8176_s5 + $0x10] sm:$0xff]  ;;  %4515 = vmatpush3.bf16.msra.mxu1 %v4514_v54  ;;  %v520_v54 = vld [vmem:[%s5584_s24 + $0x138] sm:$0xff] }
  0xb1   : > { %4459 = vmatpush1.bf16.msra.mxu0 %v4458_v57  ;;  %1140 = vmatprep.mubr.f32.mxu0 %v561_v58  ;;  %v1528_v57 = vld [vmem:[%s8176_s5 + $0x18] sm:$0xff] }
  0xb2   : > { %4461 = vmatprep.subr.bf16.mxu0 %v4460_v59  ;;  %v796_v58 = vld [vmem:[%s8175_s4 + $0x658] sm:$0xff]  ;;  %v1545_v59 = vld [vmem:[%s8176_s5 + $0xa0] sm:$0xff]  ;;  %v4518_v62 = vpack.c.bf16 %v1528_v57, %v1527_v56  ;;  %4517 = vmatprep.subr.bf16.mxu1 %v4516_v55  ;;  %v4504_v57 = vpack.c.bf16 %v812_v50, %v810_v48  ;;  %v818_v50 = vld [vmem:[%s6410_s20 + $0x8] sm:$0xff] }
  0xb3   : > { %v4520_v7 = vpack.c.bf16 %v1546_v60, %v1545_v59  ;;  %v528_v56 = vld [vmem:[%s5584_s24 + $0x178] sm:$0xff]  ;;  %v811_v59 = vld [vmem:[%s8175_s4 + $0x6d0] sm:$0xff] }
  0xb4   : > { %1141 = vmatmul.mubr.f32.gmra.mrb[22].mxu0 %v560_v0  ;;  %v4486_v0 = vpack.c.bf16 %v791_v43, %v789_v42  ;;  %4519 = vmatpush3.bf16.msra.mxu1 %v4518_v62  ;;  %v1535_v43 = vld [vmem:[%s8176_s5 + $0x50] sm:$0xff]  ;;  %v816_v62 = vld [vmem:[%s8175_s4 + $0x6f8] sm:$0xff] }
  0xb5   : > { %4463 = vmatpush1.bf16.msra.mxu0 %v4462_v1  ;;  %1146 = vmatprep.mubr.f32.mxu0 %v568_v2  ;;  %v1529_v1 = vld [vmem:[%s8176_s5 + $0x20] sm:$0xff]  ;;  %v1530_v2 = vld [vmem:[%s8176_s5 + $0x28] sm:$0xff] }
  0xb6   : > { %4465 = vmatprep.subr.bf16.mxu0 %v4464_v3  ;;  %v4488_v3 = vpack.c.bf16 %v796_v58, %v794_v53  ;;  %v4522_v12 = vpack.c.bf16 %v1530_v2, %v1529_v1  ;;  %4521 = vmatprep.subr.bf16.mxu1 %v4520_v7  ;;  %v4534_v53 = vpack.c.bf16 %v1536_v44, %v1535_v43  ;;  %v809_v58 = vld [vmem:[%s8175_s4 + $0x6c0] sm:$0xff]  ;;  %v535_v1 = vld [vmem:[%s5584_s24 + $0x1b0] sm:$0xff]  ;;  %v542_v7 = vld [vmem:[%s5584_s24 + $0x1e8] sm:$0xff] }
  0xb7   : > { %v1555_v43 = vld [vmem:[%s8176_s5 + $0xf0] sm:$0xff]  ;;  %v1556_v44 = vld [vmem:[%s8176_s5 + $0xf8] sm:$0xff] }
  0xb8   : > { %1147 = vmatmul.mubr.f32.gmra.mrb[24].mxu0 %v567_v8  ;;  %v800_v8 = vld [vmem:[%s8175_s4 + $0x678] sm:$0xff]  ;;  %4523 = vmatpush3.bf16.msra.mxu1 %v4522_v12  ;;  %v555_v12 = vld [vmem:[%s5584_s24 + $0x250] sm:$0xff] }
  0xb9   : > { %4467 = vmatpush1.bf16.msra.mxu0 %v4466_v9  ;;  %1152 = vmatprep.mubr.f32.mxu0 %v575_v10  ;;  %v1547_v9 = vld [vmem:[%s8176_s5 + $0xb0] sm:$0xff]  ;;  %v1548_v10 = vld [vmem:[%s8176_s5 + $0xb8] sm:$0xff] }
  0xba   : > { %4469 = vmatprep.subr.bf16.mxu0 %v4468_v11  ;;  %v499_v11 = vld [vmem:[%s5584_s24 + $0x90] sm:$0xff]  ;;  %v4524_v21 = vpack.c.bf16 %v1548_v10, %v1547_v9  ;;  %v549_v9 = vld [vmem:[%s5584_s24 + $0x220] sm:$0xff]  ;;  %v548_v10 = vld [vmem:[%s5584_s24 + $0x218] sm:$0xff] }
  0xbc   : > { %1153 = vmatmul.mubr.f32.gmra.mrb[26].mxu0 %v574_v16  ;;  %v1532_v16 = vld [vmem:[%s8176_s5 + $0x38] sm:$0xff]  ;;  %4525 = vmatprep.subr.bf16.mxu1 %v4524_v21  ;;  %v591_v21 = vld [vmem:[%s5584_s24 + $0x370] sm:$0xff] }
  0xbd   : > { %4471 = vmatpush1.bf16.msra.mxu0 %v4470_v17  ;;  %1158 = vmatprep.mubr.f32.mxu0 %v582_v18  ;;  %v4492_v17 = vpack.c.bf16 %v800_v8, %v798_v6  ;;  %v797_v18 = vld [vmem:[%s8175_s4 + $0x660] sm:$0xff] }
  0xbe   : > { %4473 = vmatprep.subr.bf16.mxu0 %v4472_v19  ;;  %v799_v19 = vld [vmem:[%s8175_s4 + $0x670] sm:$0xff]  ;;  %v541_v8 = vld [vmem:[%s5584_s24 + $0x1e0] sm:$0xff] }
  0xbf   : > { %v4494_v28 = vpack.c.bf16 %v799_v19, %v797_v18  ;;  %v576_v18 = vld [vmem:[%s5584_s24 + $0x2f8] sm:$0xff] }
  0xc0   : > { %1159 = vmatmul.mubr.f32.gmra.mrb[28].mxu0 %v581_v24  ;;  %v1550_v24 = vld [vmem:[%s8176_s5 + $0xc8] sm:$0xff]  ;;  %v584_v19 = vld [vmem:[%s5584_s24 + $0x338] sm:$0xff] }
  0xc1   : > { %4475 = vmatpush1.bf16.msra.mxu0 %v4474_v25  ;;  %1164 = vmatprep.mubr.f32.mxu0 %v589_v26  ;;  %v506_v25 = vld [vmem:[%s5584_s24 + $0xc8] sm:$0xff]  ;;  %v4526_v26 = vpack.c.bf16 %v1532_v16, %v1531_v15  ;;  %v569_v16 = vld [vmem:[%s5584_s24 + $0x2c0] sm:$0xff] }
  0xc2   : > { %4477 = vmatprep.subr.bf16.mxu0 %v4476_v27  ;;  %v514_v27 = vld [vmem:[%s5584_s24 + $0x108] sm:$0xff] }
  0xc3   : > { %4527 = vmatpush3.bf16.msra.mxu1 %v4526_v26  ;;  %v570_v15 = vld [vmem:[%s5584_s24 + $0x2c8] sm:$0xff]  ;;  %v501_v26 = vld [vmem:[%s5584_s24 + $0xa0] sm:$0xff] }
  0xc4   : > { %1165 = vmatmul.mubr.f32.gmra.mrb[30].mxu0 %v588_v32  ;;  %v801_v32 = vld [vmem:[%s8175_s4 + $0x680] sm:$0xff] }
  0xc5   : > { %4479 = vmatpush1.bf16.msra.mxu0 %v4478_v33  ;;  %1235 = vmatprep.mubr.f32.mxu0 %v486_v34  ;;  %v803_v33 = vld [vmem:[%s8175_s4 + $0x690] sm:$0xff]  ;;  %v806_v34 = vld [vmem:[%s8175_s4 + $0x6a8] sm:$0xff] }
  0xc6   : > { %4481 = vmatprep.subr.bf16.mxu0 %v4480_v35  ;;  %v4528_v35 = vpack.c.bf16 %v1550_v24, %v1549_v23  ;;  %v4498_v42 = vpack.c.bf16 %v803_v33, %v801_v32  ;;  %v4500_v45 = vpack.c.bf16 %v808_v36, %v806_v34  ;;  %v5428_v23 = vmov 0.0   ;;  %v487_v24 = vld [vmem:[%s5584_s24 + $0x30] sm:$0xff]  ;;  %v550_v33 = vld [vmem:[%s5584_s24 + $0x228] sm:$0xff]  ;;  %v557_v34 = vld [vmem:[%s5584_s24 + $0x260] sm:$0xff] }
  0xc7   : > { %v543_v32 = vld [vmem:[%s5584_s24 + $0x1f0] sm:$0xff] }
  0xc8   : > { %1236 = vmatmul.mubr.f32.vlgmr.msra.gmra.mrb[0].mxu0 %v485_v38  ;;  %v1552_v38 = vld [vmem:[%s8176_s5 + $0xd8] sm:$0xff]  ;;  %4529 = vmatprep.subr.bf16.mxu1 %v4528_v35  ;;  %v571_v36 = vld [vmem:[%s5584_s24 + $0x2d0] sm:$0xff] }
  0xc9   : > { %4483 = vmatpush1.bf16.msra.mxu0 %v4482_v47  ;;  %1241 = vmatprep.mubr.f32.mxu0 %v493_v41  ;;  %v521_v41 = vld [vmem:[%s5584_s24 + $0x140] sm:$0xff]  ;;  %v807_v47 = vld [vmem:[%s8175_s4 + $0x6b0] sm:$0xff]  ;;  %v4532_v49 = vpack.c.bf16 %v1552_v38, %v1551_v37  ;;  %v564_v35 = vld [vmem:[%s5584_s24 + $0x298] sm:$0xff] }
  0xca   : > { %4485 = vmatprep.subr.bf16.mxu0 %v4484_v52  ;;  %v1554_v52 = vld [vmem:[%s8176_s5 + $0xe8] sm:$0xff]  ;;  %4531 = vmatpush3.bf16.msra.mxu1 %v4530_v40  ;;  %v4502_v55 = vpack.c.bf16 %v807_v47, %v805_v46  ;;  %v585_v38 = vld [vmem:[%s5584_s24 + $0x340] sm:$0xff]  ;;  %v1539_v46 = vld [vmem:[%s8176_s5 + $0x70] sm:$0xff] }
  0xcb   : > { %4533 = vmatprep.subr.bf16.mxu1 %v4532_v49  ;;  %v4536_v60 = vpack.c.bf16 %v1554_v52, %v1553_v51  ;;  %v578_v37 = vld [vmem:[%s5584_s24 + $0x308] sm:$0xff]  ;;  %v1537_v40 = vld [vmem:[%s8176_s5 + $0x60] sm:$0xff]  ;;  %v1540_v47 = vld [vmem:[%s8176_s5 + $0x78] sm:$0xff] }
  0xcc   : > { %1242 = vmatmul.mubr.f32.gmra.mrb[2].mxu0 %v492_v61  ;;  %v814_v61 = vld [vmem:[%s8175_s4 + $0x6e8] sm:$0xff]  ;;  %v4542_v48 = vpack.c.bf16 %v1540_v47, %v1539_v46  ;;  %v817_v49 = vld [vmem:[%s6410_s20] sm:$0xff] }
  0xcd   : > { %1247 = vmatprep.mubr.f32.mxu0 %v500_v63  ;;  %4487 = vmatpush1.bf16.msra.mxu0 %v4486_v0  ;;  %v527_v63 = vld [vmem:[%s5584_s24 + $0x170] sm:$0xff]  ;;  %v4506_v0 = vpack.c.bf16 %v811_v59, %v809_v58  ;;  %v4508_v2 = vpack.c.bf16 %v816_v62, %v814_v61 }
  0xce   : > { %4489 = vmatprep.subr.bf16.mxu0 %v4488_v3  ;;  %4535 = vmatpush3.bf16.msra.mxu1 %v4534_v53  ;;  %v813_v3 = vld [vmem:[%s8175_s4 + $0x6e0] sm:$0xff] }
  0xcf   : > { %4537 = vmatprep.subr.bf16.mxu1 %v4536_v60  ;;  %v4510_v6 = vpack.c.bf16 %v815_v4, %v813_v3 }
  0xd0   : > { %1248 = vmatmul.mubr.f32.gmra.mrb[4].mxu0 %v499_v11  ;;  %v556_v11 = vld [vmem:[%s5584_s24 + $0x258] sm:$0xff] }
  0xd1   : > { %1253 = vmatprep.mubr.f32.mxu0 %v507_v13  ;;  %4491 = vmatpush1.bf16.msra.mxu0 %v4490_v14  ;;  %v563_v13 = vld [vmem:[%s5584_s24 + $0x290] sm:$0xff]  ;;  %v562_v14 = vld [vmem:[%s5584_s24 + $0x288] sm:$0xff] }
  0xd2   : > { %4493 = vmatprep.subr.bf16.mxu0 %v4492_v17  ;;  %v577_v17 = vld [vmem:[%s5584_s24 + $0x300] sm:$0xff] }
  0xd4   : > { %1254 = vmatmul.mubr.f32.gmra.mrb[6].mxu0 %v506_v25  ;;  %v494_v25 = vld [vmem:[%s5584_s24 + $0x68] sm:$0xff] }
  0xd5   : > { %1259 = vmatprep.mubr.f32.mxu0 %v514_v27  ;;  %4495 = vmatpush1.bf16.msra.mxu0 %v4494_v28  ;;  %v508_v27 = vld [vmem:[%s5584_s24 + $0xd8] sm:$0xff]  ;;  %v515_v28 = vld [vmem:[%s5584_s24 + $0x110] sm:$0xff] }
  0xd6   : > { %4497 = vmatprep.subr.bf16.mxu0 %v4496_v31  ;;  %v536_v31 = vld [vmem:[%s5584_s24 + $0x1b8] sm:$0xff] }
  0xd8   : > { %1260 = vmatmul.mubr.f32.gmra.mrb[8].mxu0 %v513_v39  ;;  %v592_v39 = vld [vmem:[%s5584_s24 + $0x378] sm:$0xff]  ;;  %s5429_s24 = smov 64  }
  0xd9   : > { %1265 = vmatprep.mubr.f32.mxu0 %v521_v41  ;;  %4499 = vmatpush1.bf16.msra.mxu0 %v4498_v42  ;;  %v1538_v41 = vld [vmem:[%s8176_s5 + $0x68] sm:$0xff] }
  0xda   : > { %4501 = vmatprep.subr.bf16.mxu0 %v4500_v45  ;;  %v4538_v42 = vpack.c.bf16 %v1538_v41, %v1537_v40  ;;  %v4540_v45 = vpack.c.bf16 %v1556_v44, %v1555_v43  ;;  %v831_v40 = vld [vmem:[%s6410_s20 + $0x70] sm:$0xff]  ;;  %v832_v41 = vld [vmem:[%s6410_s20 + $0x78] sm:$0xff] }
  0xdc   : > { %1266 = vmatmul.mubr.f32.gmra.mrb[10].mxu0 %v520_v54  ;;  %4539 = vmatpush3.bf16.msra.mxu1 %v4538_v42  ;;  %v819_v54 = vld [vmem:[%s6410_s20 + $0x10] sm:$0xff] }
  0xdd   : > { %1271 = vmatprep.mubr.f32.mxu0 %v528_v56  ;;  %4503 = vmatpush1.bf16.msra.mxu0 %v4502_v55  ;;  %v820_v56 = vld [vmem:[%s6410_s20 + $0x18] sm:$0xff] }
  0xde   : > { %4505 = vmatprep.subr.bf16.mxu0 %v4504_v57  ;;  %4541 = vmatprep.subr.bf16.mxu1 %v4540_v45 }
  0xe0   : > { %1272 = vmatmul.mubr.f32.gmra.mrb[12].mxu0 %v527_v63  ;;  %4543 = vmatpush3.bf16.msra.mxu1 %v4542_v48  ;;  %v821_v63 = vld [vmem:[%s6410_s20 + $0x20] sm:$0xff] }
  0xe1   : > { %1277 = vmatprep.mubr.f32.mxu0 %v535_v1  ;;  %4507 = vmatpush1.bf16.msra.mxu0 %v4506_v0  ;;  %v822_v0 = vld [vmem:[%s6410_s20 + $0x28] sm:$0xff]  ;;  %v833_v48 = vld [vmem:[%s6410_s20 + $0x80] sm:$0xff] }
  0xe2   : > { %4509 = vmatprep.subr.bf16.mxu0 %v4508_v2 }
  0xe4   : > { %1278 = vmatmul.mubr.f32.gmra.mrb[14].mxu0 %v534_v5 }
  0xe5   : > { %1283 = vmatprep.mubr.f32.mxu0 %v542_v7  ;;  %4511 = vmatpush1.bf16.msra.mxu0 %v4510_v6  ;;  %v823_v7 = vld [vmem:[%s6410_s20 + $0x30] sm:$0xff] }
  0xe8   : > { %1284 = vmatmul.mubr.f32.gmra.mrb[16].mxu0 %v541_v8  ;;  %v824_v8 = vld [vmem:[%s6410_s20 + $0x38] sm:$0xff] }
  0xe9   : > { %1289 = vmatprep.mubr.f32.mxu0 %v549_v9 }
  0xec   : > { %1290 = vmatmul.mubr.f32.gmra.mrb[18].mxu0 %v548_v10 }
  0xed   : > { %1295 = vmatprep.mubr.f32.mxu0 %v556_v11 }
  0xf0   : > { %1296 = vmatmul.mubr.f32.gmra.mrb[20].mxu0 %v555_v12 }
  0xf1   : > { %1301 = vmatprep.mubr.f32.mxu0 %v563_v13 }
  0xf4   : > { %1302 = vmatmul.mubr.f32.gmra.mrb[22].mxu0 %v562_v14 }
  0xf5   : > { %1307 = vmatprep.mubr.f32.mxu0 %v570_v15  ;;  %v825_v15 = vld [vmem:[%s6410_s20 + $0x40] sm:$0xff] }
  0xf8   : > { %1308 = vmatmul.mubr.f32.gmra.mrb[24].mxu0 %v569_v16  ;;  %v826_v16 = vld [vmem:[%s6410_s20 + $0x48] sm:$0xff] }
  0xf9   : > { %1313 = vmatprep.mubr.f32.mxu0 %v577_v17 }
  0xfc   : > { %1314 = vmatmul.mubr.f32.gmra.mrb[26].mxu0 %v576_v18 }
  0xfd   : > { %1319 = vmatprep.mubr.f32.mxu0 %v584_v19 }
 0x100   : > { %1320 = vmatmul.mubr.f32.gmra.mrb[28].mxu0 %v583_v20 }
 0x101   : > { %1325 = vmatprep.mubr.f32.mxu0 %v591_v21 }
 0x104   : > { %1326 = vmatmul.mubr.f32.gmra.mrb[30].mxu0 %v590_v22 }
 0x105   : > { %1396 = vmatprep.mubr.f32.mxu0 %v5428_v23 }
 0x108   : > { %1397 = vmatmul.mubr.f32.vlgmr.msra.gmra.mrb[0].mxu0 %v487_v24  ;;  %v827_v24 = vld [vmem:[%s6410_s20 + $0x50] sm:$0xff] }
 0x109   : > { %1402 = vmatprep.mubr.f32.mxu0 %v5428_v23 }
 0x10c   : > { %1403 = vmatmul.mubr.f32.gmra.mrb[2].mxu0 %v494_v25  ;;  %v828_v25 = vld [vmem:[%s6410_s20 + $0x58] sm:$0xff] }
 0x10d   : > { %1408 = vmatprep.mubr.f32.mxu0 %v5428_v23 }
 0x110   : > { %1409 = vmatmul.mubr.f32.gmra.mrb[4].mxu0 %v501_v26 }
 0x111   : > { %1414 = vmatprep.mubr.f32.mxu0 %v5428_v23 }
 0x114   : > { %1415 = vmatmul.mubr.f32.gmra.mrb[6].mxu0 %v508_v27 }
 0x115   : > { %1420 = vmatprep.mubr.f32.mxu0 %v5428_v23 }
 0x118   : > { %1421 = vmatmul.mubr.f32.gmra.mrb[8].mxu0 %v515_v28 }
 0x119   : > { %1426 = vmatprep.mubr.f32.mxu0 %v5428_v23 }
 0x11c   : > { %1427 = vmatmul.mubr.f32.gmra.mrb[10].mxu0 %v522_v29 }
 0x11d   : > { %1432 = vmatprep.mubr.f32.mxu0 %v5428_v23 }
 0x120   : > { %1433 = vmatmul.mubr.f32.gmra.mrb[12].mxu0 %v529_v30 }
 0x121   : > { %1438 = vmatprep.mubr.f32.mxu0 %v5428_v23 }
 0x124   : > { %1439 = vmatmul.mubr.f32.gmra.mrb[14].mxu0 %v536_v31 }
 0x125   : > { %1444 = vmatprep.mubr.f32.mxu0 %v5428_v23 }
 0x128   : > { %1445 = vmatmul.mubr.f32.gmra.mrb[16].mxu0 %v543_v32  ;;  %v829_v32 = vld [vmem:[%s6410_s20 + $0x60] sm:$0xff] }
 0x129   : > { %1450 = vmatprep.mubr.f32.mxu0 %v5428_v23 }
 0x12c   : > { %1451 = vmatmul.mubr.f32.gmra.mrb[18].mxu0 %v550_v33  ;;  %v830_v33 = vld [vmem:[%s6410_s20 + $0x68] sm:$0xff] }
 0x12d   : > { %1456 = vmatprep.mubr.f32.mxu0 %v5428_v23 }
 0x130   : > { %1457 = vmatmul.mubr.f32.gmra.mrb[20].mxu0 %v557_v34 }
 0x131   : > { %1462 = vmatprep.mubr.f32.mxu0 %v5428_v23 }
 0x134   : > { %1463 = vmatmul.mubr.f32.gmra.mrb[22].mxu0 %v564_v35 }
 0x135   : > { %1468 = vmatprep.mubr.f32.mxu0 %v5428_v23 }
 0x138   : > { %1469 = vmatmul.mubr.f32.gmra.mrb[24].mxu0 %v571_v36 }
 0x139   : > { %1474 = vmatprep.mubr.f32.mxu0 %v5428_v23 }
 0x13c   : > { %1475 = vmatmul.mubr.f32.gmra.mrb[26].mxu0 %v578_v37 }
 0x13d   : > { %1480 = vmatprep.mubr.f32.mxu0 %v5428_v23 }
 0x140   : > { %1481 = vmatmul.mubr.f32.gmra.mrb[28].mxu0 %v585_v38 }
 0x141   : > { %1486 = vmatprep.mubr.f32.mxu0 %v5428_v23 }
 0x144   : > { %1487 = vmatmul.mubr.f32.gmra.mrb[30].mxu0 %v592_v39 }
 0x1db   : > { %v1398_v51 = vpop.f32.mrb[0].mxu0 }
 0x1dc   : > { %v4800_v52 = vadd.f32 %v1398_v51, %v817_v49  ;;  %v1400_v53 = vpop.f32.mrb[1].mxu0  ;;  %v834_v49 = vld [vmem:[%s6410_s20 + $0x88] sm:$0xff] }
 0x1dd   : > { %v4801_v55 = vadd.f32 %v1400_v53, %v818_v50 }
 0x1de   : > { %v1493_v59 = vmax.f32 %v4800_v52, 0.0 }
 0x1df   : > { %v1404_v57 = vpop.f32.mrb[2].mxu0  ;;  %v1494_v58 = vmax.f32 %v4801_v55, 0.0 }
 0x1e0   : > { %v4802_v60 = vadd.f32 %v1404_v57, %v819_v54  ;;  %v1406_v61 = vpop.f32.mrb[3].mxu0  ;;  %v836_v57 = vld [vmem:[%s6410_s20 + $0x98] sm:$0xff] }
 0x1e1   : > { %v4803_v62 = vadd.f32 %v1406_v61, %v820_v56  ;;  %1628 = vmatprep.mubr.f32.mxu1 %v1494_v58  ;;  %v835_v56 = vld [vmem:[%s6410_s20 + $0x90] sm:$0xff] }
 0x1e2   : > { %1629 = vmatmul.mubr.f32.vlgmr.msra.gmra.mrb[0].mxu1 %v1493_v59  ;;  %v1495_v3 = vmax.f32 %v4802_v60, 0.0 }
 0x1e3   : > { %v1496_v1 = vmax.f32 %v4803_v62, 0.0  ;;  %v1410_v2 = vpop.f32.mrb[4].mxu0 }
 0x1e4   : > { %v4804_v4 = vadd.f32 %v1410_v2, %v821_v63  ;;  %v1412_v5 = vpop.f32.mrb[5].mxu0 }
 0x1e5   : > { %v4805_v6 = vadd.f32 %v1412_v5, %v822_v0  ;;  %1633 = vmatprep.mubr.f32.mxu1 %v1496_v1  ;;  %v837_v0 = vld [vmem:[%s6410_s20 + $0xa0] sm:$0xff]  ;;  %v838_v1 = vld [vmem:[%s6410_s20 + $0xa8] sm:$0xff] }
 0x1e6   : > { %1634 = vmatmul.mubr.f32.gmra.mrb[2].mxu1 %v1495_v3  ;;  %v1497_v11 = vmax.f32 %v4804_v4, 0.0 }
 0x1e7   : > { %v1498_v9 = vmax.f32 %v4805_v6, 0.0  ;;  %v1416_v10 = vpop.f32.mrb[6].mxu0 }
 0x1e8   : > { %v4806_v12 = vadd.f32 %v1416_v10, %v823_v7  ;;  %v1418_v13 = vpop.f32.mrb[7].mxu0 }
 0x1e9   : > { %v4807_v14 = vadd.f32 %v1418_v13, %v824_v8  ;;  %1638 = vmatprep.mubr.f32.mxu1 %v1498_v9  ;;  %v839_v8 = vld [vmem:[%s6410_s20 + $0xb0] sm:$0xff]  ;;  %v840_v9 = vld [vmem:[%s6410_s20 + $0xb8] sm:$0xff] }
 0x1ea   : > { %1639 = vmatmul.mubr.f32.gmra.mrb[4].mxu1 %v1497_v11  ;;  %v1499_v19 = vmax.f32 %v4806_v12, 0.0 }
 0x1eb   : > { %v1500_v17 = vmax.f32 %v4807_v14, 0.0  ;;  %v1422_v18 = vpop.f32.mrb[8].mxu0 }
 0x1ec   : > { %v4808_v20 = vadd.f32 %v1422_v18, %v825_v15  ;;  %v1424_v21 = vpop.f32.mrb[9].mxu0 }
 0x1ed   : > { %v4809_v22 = vadd.f32 %v1424_v21, %v826_v16  ;;  %1643 = vmatprep.mubr.f32.mxu1 %v1500_v17  ;;  %v841_v16 = vld [vmem:[%s6410_s20 + $0xc0] sm:$0xff]  ;;  %v842_v17 = vld [vmem:[%s6410_s20 + $0xc8] sm:$0xff] }
 0x1ee   : > { %1644 = vmatmul.mubr.f32.gmra.mrb[6].mxu1 %v1499_v19  ;;  %v1501_v28 = vmax.f32 %v4808_v20, 0.0 }
 0x1ef   : > { %v1502_v26 = vmax.f32 %v4809_v22, 0.0  ;;  %v1428_v27 = vpop.f32.mrb[10].mxu0 }
 0x1f0   : > { %v4810_v29 = vadd.f32 %v1428_v27, %v827_v24  ;;  %v1430_v30 = vpop.f32.mrb[11].mxu0 }
 0x1f1   : > { %v4811_v31 = vadd.f32 %v1430_v30, %v828_v25  ;;  %1648 = vmatprep.mubr.f32.mxu1 %v1502_v26  ;;  %v843_v25 = vld [vmem:[%s6410_s20 + $0xd0] sm:$0xff]  ;;  %v844_v26 = vld [vmem:[%s6410_s20 + $0xd8] sm:$0xff] }
 0x1f2   : > { %1649 = vmatmul.mubr.f32.gmra.mrb[8].mxu1 %v1501_v28  ;;  %v1503_v36 = vmax.f32 %v4810_v29, 0.0 }
 0x1f3   : > { %v1504_v34 = vmax.f32 %v4811_v31, 0.0  ;;  %v1434_v35 = vpop.f32.mrb[12].mxu0 }
 0x1f4   : > { %v4812_v37 = vadd.f32 %v1434_v35, %v829_v32  ;;  %v1436_v38 = vpop.f32.mrb[13].mxu0 }
 0x1f5   : > { %v4813_v39 = vadd.f32 %v1436_v38, %v830_v33  ;;  %1653 = vmatprep.mubr.f32.mxu1 %v1504_v34  ;;  %v845_v33 = vld [vmem:[%s6410_s20 + $0xe0] sm:$0xff]  ;;  %v846_v34 = vld [vmem:[%s6410_s20 + $0xe8] sm:$0xff] }
 0x1f6   : > { %1654 = vmatmul.mubr.f32.gmra.mrb[10].mxu1 %v1503_v36  ;;  %v1505_v44 = vmax.f32 %v4812_v37, 0.0 }
 0x1f7   : > { %v1506_v42 = vmax.f32 %v4813_v39, 0.0  ;;  %v1440_v43 = vpop.f32.mrb[14].mxu0 }
 0x1f8   : > { %v4814_v45 = vadd.f32 %v1440_v43, %v831_v40  ;;  %v1442_v46 = vpop.f32.mrb[15].mxu0 }
 0x1f9   : > { %v4815_v47 = vadd.f32 %v1442_v46, %v832_v41  ;;  %1658 = vmatprep.mubr.f32.mxu1 %v1506_v42  ;;  %v847_v41 = vld [vmem:[%s6410_s20 + $0xf0] sm:$0xff]  ;;  %v848_v42 = vld [vmem:[%s6410_s20 + $0xf8] sm:$0xff] }
 0x1fa   : > { %1659 = vmatmul.mubr.f32.gmra.mrb[12].mxu1 %v1505_v44  ;;  %v1507_v52 = vmax.f32 %v4814_v45, 0.0 }
 0x1fb   : > { %v1508_v50 = vmax.f32 %v4815_v47, 0.0  ;;  %v1446_v51 = vpop.f32.mrb[16].mxu0 }
 0x1fc   : > { %v4816_v53 = vadd.f32 %v1446_v51, %v833_v48  ;;  %v1448_v54 = vpop.f32.mrb[17].mxu0  ;;  %v1886_v51 = vld [vmem:[%s8178_s7 + $0x8] sm:$0xff] }
 0x1fd   : > { %v4817_v55 = vadd.f32 %v1448_v54, %v834_v49  ;;  %1663 = vmatprep.mubr.f32.mxu1 %v1508_v50 }
 0x1fe   : > { %1664 = vmatmul.mubr.f32.gmra.mrb[14].mxu1 %v1507_v52  ;;  %v1509_v60 = vmax.f32 %v4816_v53, 0.0  ;;  %v1888_v52 = vld [vmem:[%s8178_s7 + $0x18] sm:$0xff]  ;;  %v1885_v53 = vld [vmem:[%s8178_s7] sm:$0xff] }
 0x1ff   : > { %v1510_v58 = vmax.f32 %v4817_v55, 0.0  ;;  %v1452_v59 = vpop.f32.mrb[18].mxu0  ;;  %v4544_v54 = vpack.c.bf16 %v1888_v52, %v1886_v51  ;;  %v1887_v55 = vld [vmem:[%s8178_s7 + $0x10] sm:$0xff] }
 0x200   : > { %v4818_v61 = vadd.f32 %v1452_v59, %v835_v56  ;;  %v1454_v62 = vpop.f32.mrb[19].mxu0  ;;  %v4546_v56 = vpack.c.bf16 %v1887_v55, %v1885_v53  ;;  %v1889_v59 = vld [vmem:[%s8178_s7 + $0x20] sm:$0xff] }
 0x201   : > { %v4819_v63 = vadd.f32 %v1454_v62, %v836_v57  ;;  %1668 = vmatprep.mubr.f32.mxu1 %v1510_v58  ;;  %4545 = vmatprep.subr.bf16.mxu1 %v4544_v54  ;;  %v1890_v57 = vld [vmem:[%s8178_s7 + $0x28] sm:$0xff]  ;;  %v1892_v58 = vld [vmem:[%s8178_s7 + $0x38] sm:$0xff] }
 0x202   : > { %1669 = vmatmul.mubr.f32.gmra.mrb[16].mxu1 %v1509_v60  ;;  %v1511_v4 = vmax.f32 %v4818_v61, 0.0  ;;  %v4548_v60 = vpack.c.bf16 %v1892_v58, %v1890_v57  ;;  %v1891_v61 = vld [vmem:[%s8178_s7 + $0x30] sm:$0xff]  ;;  %v1894_v62 = vld [vmem:[%s8178_s7 + $0x48] sm:$0xff] }
 0x203   : > { %v1512_v2 = vmax.f32 %v4819_v63, 0.0  ;;  %v1458_v3 = vpop.f32.mrb[20].mxu0  ;;  %4547 = vmatpush1.bf16.msra.mxu1 %v4546_v56  ;;  %v1896_v63 = vld [vmem:[%s8178_s7 + $0x58] sm:$0xff] }
 0x204   : > { %v4820_v5 = vadd.f32 %v1458_v3, %v837_v0  ;;  %v1460_v6 = vpop.f32.mrb[21].mxu0  ;;  %v4550_v0 = vpack.c.bf16 %v1891_v61, %v1889_v59  ;;  %v1895_v3 = vld [vmem:[%s8178_s7 + $0x50] sm:$0xff]  ;;  %4549 = vmatprep.subr.bf16.mxu1 %v4548_v60 }
 0x205   : > { %v4821_v7 = vadd.f32 %v1460_v6, %v838_v1  ;;  %1673 = vmatprep.mubr.f32.mxu1 %v1512_v2  ;;  %v4552_v1 = vpack.c.bf16 %v1896_v63, %v1894_v62  ;;  %v1893_v2 = vld [vmem:[%s8178_s7 + $0x40] sm:$0xff] }
 0x206   : > { %1674 = vmatmul.mubr.f32.gmra.mrb[18].mxu1 %v1511_v4  ;;  %v1513_v12 = vmax.f32 %v4820_v5, 0.0  ;;  %v1898_v4 = vld [vmem:[%s8178_s7 + $0x68] sm:$0xff]  ;;  %v1900_v5 = vld [vmem:[%s8178_s7 + $0x78] sm:$0xff]  ;;  %v4554_v6 = vpack.c.bf16 %v1895_v3, %v1893_v2 }
 0x207   : > { %v1514_v10 = vmax.f32 %v4821_v7, 0.0  ;;  %v1464_v11 = vpop.f32.mrb[22].mxu0  ;;  %4551 = vmatpush1.bf16.msra.mxu1 %v4550_v0  ;;  %v4556_v7 = vpack.c.bf16 %v1900_v5, %v1898_v4 }
 0x208   : > { %v4822_v13 = vadd.f32 %v1464_v11, %v839_v8  ;;  %v1466_v14 = vpop.f32.mrb[23].mxu0  ;;  %4553 = vmatprep.subr.bf16.mxu1 %v4552_v1  ;;  %v1897_v8 = vld [vmem:[%s8178_s7 + $0x60] sm:$0xff] }
 0x209   : > { %v4823_v15 = vadd.f32 %v1466_v14, %v840_v9  ;;  %1678 = vmatprep.mubr.f32.mxu1 %v1514_v10  ;;  %v1899_v9 = vld [vmem:[%s8178_s7 + $0x70] sm:$0xff] }
 0x20a   : > { %1679 = vmatmul.mubr.f32.gmra.mrb[20].mxu1 %v1513_v12  ;;  %v1515_v20 = vmax.f32 %v4822_v13, 0.0  ;;  %v4558_v10 = vpack.c.bf16 %v1899_v9, %v1897_v8  ;;  %v6497_v12 = vld [vmem:[%s8177_s6] ss:$0 sm:$0xff] }
 0x20b   : > { %v1516_v18 = vmax.f32 %v4823_v15, 0.0  ;;  %v1470_v19 = vpop.f32.mrb[24].mxu0  ;;  %4555 = vmatpush1.bf16.msra.mxu1 %v4554_v6 }
 0x20c   : > { %v4824_v21 = vadd.f32 %v1470_v19, %v841_v16  ;;  %v1472_v22 = vpop.f32.mrb[25].mxu0  ;;  %4557 = vmatprep.subr.bf16.mxu1 %v4556_v7 }
 0x20d   : > { %v4825_v24 = vadd.f32 %v1472_v22, %v842_v17  ;;  %1683 = vmatprep.mubr.f32.mxu1 %v1516_v18 }
 0x20e   : > { %1684 = vmatmul.mubr.f32.gmra.mrb[22].mxu1 %v1515_v20  ;;  %v1517_v29 = vmax.f32 %v4824_v21, 0.0 }
 0x20f   : > { %v1518_v27 = vmax.f32 %v4825_v24, 0.0  ;;  %v1476_v28 = vpop.f32.mrb[26].mxu0  ;;  %4559 = vmatpush1.bf16.msra.mxu1 %v4558_v10 }
 0x210   : > { %v4826_v30 = vadd.f32 %v1476_v28, %v843_v25  ;;  %v1478_v31 = vpop.f32.mrb[27].mxu0 }
 0x211   : > { %v4827_v32 = vadd.f32 %v1478_v31, %v844_v26  ;;  %1688 = vmatprep.mubr.f32.mxu1 %v1518_v27 }
 0x212   : > { %1689 = vmatmul.mubr.f32.gmra.mrb[24].mxu1 %v1517_v29  ;;  %v1519_v37 = vmax.f32 %v4826_v30, 0.0 }
 0x213   : > { %v1520_v35 = vmax.f32 %v4827_v32, 0.0  ;;  %v1482_v36 = vpop.f32.mrb[28].mxu0 }
 0x214   : > { %v4828_v38 = vadd.f32 %v1482_v36, %v845_v33  ;;  %v1484_v39 = vpop.f32.mrb[29].mxu0 }
 0x215   : > { %v4829_v40 = vadd.f32 %v1484_v39, %v846_v34  ;;  %1693 = vmatprep.mubr.f32.mxu1 %v1520_v35 }
 0x216   : > { %1694 = vmatmul.mubr.f32.gmra.mrb[26].mxu1 %v1519_v37  ;;  %v1521_v45 = vmax.f32 %v4828_v38, 0.0 }
 0x217   : > { %v1522_v43 = vmax.f32 %v4829_v40, 0.0  ;;  %v1488_v44 = vpop.f32.mrb[30].mxu0 }
 0x218   : > { %v4830_v46 = vadd.f32 %v1488_v44, %v847_v41  ;;  %v1490_v47 = vpop.f32.mrb[31].mxu0 }
 0x219   : > { %v4831_v48 = vadd.f32 %v1490_v47, %v848_v42  ;;  %1698 = vmatprep.mubr.f32.mxu1 %v1522_v43 }
 0x21a   : > { %1699 = vmatmul.mubr.f32.gmra.mrb[28].mxu1 %v1521_v45  ;;  %v1523_v50 = vmax.f32 %v4830_v46, 0.0 }
 0x21b   : > { %v1524_v49 = vmax.f32 %v4831_v48, 0.0 }
 0x21d   : > { %1703 = vmatprep.mubr.f32.mxu1 %v1524_v49 }
 0x21e   : > { %1704 = vmatmul.mubr.f32.gmra.mrb[30].mxu1 %v1523_v50 }
 0x21f   : > { %2046 = vmatprep.mubr.f32.mxu1 %v5428_v23 }
 0x2b5   : > { %v4160_v11 = vpop.f32.mrb[0].mxu1 }
 0x2b6   : > { %v4161_v13 = vpop.f32.mrb[1].mxu1 }
 0x2b7   : > { %v4162_v14 = vadd.f32 %v4161_v13, %v4160_v11 }
 0x2b9   : > { %v6507_v15 = vadd.f32 %v4162_v14, %v6497_v12  ;;  %v4163_v16 = vpop.f32.mrb[2].mxu1 }
 0x2ba   : > { %v4164_v17 = vpop.f32.mrb[3].mxu1 }
 0x2bb   : > { %1709 = vst [vmem:[%s6504_s18] sm:$0xff] %v6507_v15  ;;  %v1741_v18 = vmul.f32 0.5, %v6507_v15  ;;  %v4165_v19 = vadd.f32 %v4164_v17, %v4163_v16 }
 0x2bd   : > { %v1757_v20 = vmul.f32 1.442695, %v1741_v18  ;;  %v6513_v21 = vadd.f32 %v4165_v19, %v6497_v12  ;;  %v4166_v22 = vpop.f32.mrb[4].mxu1 }
 0x2be   : > { %v4167_v24 = vpop.f32.mrb[5].mxu1 }
 0x2bf   : > { %4939 = vpow2.f32 %v1757_v20  ;;  %1710 = vst [vmem:[%s6504_s18 + $0x8] sm:$0xff] %v6513_v21  ;;  %v1742_v25 = vmul.f32 0.5, %v6513_v21  ;;  %v4168_v26 = vadd.f32 %v4167_v24, %v4166_v22 }
 0x2c1   : > { %v1759_v27 = vmul.f32 1.442695, %v1742_v25  ;;  %v6519_v28 = vadd.f32 %v4168_v26, %v6497_v12  ;;  %v4169_v29 = vpop.f32.mrb[6].mxu1 }
 0x2c2   : > { %v4170_v30 = vpop.f32.mrb[7].mxu1 }
 0x2c3   : > { %4941 = vpow2.f32 %v1759_v27  ;;  %1711 = vst [vmem:[%s6504_s18 + $0x10] sm:$0xff] %v6519_v28  ;;  %v1743_v31 = vmul.f32 0.5, %v6519_v28  ;;  %v4171_v32 = vadd.f32 %v4170_v30, %v4169_v29 }
 0x2c5   : > { %v1761_v33 = vmul.f32 1.442695, %v1743_v31  ;;  %v6525_v34 = vadd.f32 %v4171_v32, %v6497_v12  ;;  %v4172_v35 = vpop.f32.mrb[8].mxu1 }
 0x2c6   : > { %v4173_v36 = vpop.f32.mrb[9].mxu1 }
 0x2c7   : > { %4943 = vpow2.f32 %v1761_v33  ;;  %1712 = vst [vmem:[%s6504_s18 + $0x18] sm:$0xff] %v6525_v34  ;;  %v1744_v37 = vmul.f32 0.5, %v6525_v34  ;;  %v4174_v38 = vadd.f32 %v4173_v36, %v4172_v35 }
 0x2c9   : > { %v4940_v39 = vpop.eup %4939  ;;  %v1763_v40 = vmul.f32 1.442695, %v1744_v37  ;;  %v6531_v41 = vadd.f32 %v4174_v38, %v6497_v12  ;;  %v4175_v42 = vpop.f32.mrb[10].mxu1 }
 0x2ca   : > { %v4176_v43 = vpop.f32.mrb[11].mxu1  ;;  %1805 = vrot.lane.b32.xlu0 %v4940_v39, %s5429_s24 }
 0x2cb   : > { %4945 = vpow2.f32 %v1763_v40  ;;  %1713 = vst [vmem:[%s6504_s18 + $0x20] sm:$0xff] %v6531_v41  ;;  %v1745_v44 = vmul.f32 0.5, %v6531_v41  ;;  %v4177_v45 = vadd.f32 %v4176_v43, %v4175_v42 }
 0x2cd   : > { %v4942_v46 = vpop.eup %4941  ;;  %v1765_v47 = vmul.f32 1.442695, %v1745_v44  ;;  %v6538_v48 = vadd.f32 %v4177_v45, %v6497_v12  ;;  %v4178_v49 = vpop.f32.mrb[12].mxu1 }
 0x2ce   : > { %v4179_v50 = vpop.f32.mrb[13].mxu1  ;;  %1807 = vrot.lane.b32.xlu0 %v4942_v46, %s5429_s24 }
 0x2cf   : > { %4947 = vpow2.f32 %v1765_v47  ;;  %1714 = vst [vmem:[%s6504_s18 + $0x28] sm:$0xff] %v6538_v48  ;;  %v1746_v51 = vmul.f32 0.5, %v6538_v48  ;;  %v4180_v52 = vadd.f32 %v4179_v50, %v4178_v49 }
 0x2d1   : > { %v4944_v53 = vpop.eup %4943  ;;  %v1767_v54 = vmul.f32 1.442695, %v1746_v51  ;;  %v6545_v55 = vadd.f32 %v4180_v52, %v6497_v12  ;;  %v4181_v56 = vpop.f32.mrb[14].mxu1 }
 0x2d2   : > { %v4182_v57 = vpop.f32.mrb[15].mxu1  ;;  %1809 = vrot.lane.b32.xlu1 %v4944_v53, %s5429_s24 }
 0x2d3   : > { %4949 = vpow2.f32 %v1767_v54  ;;  %1715 = vst [vmem:[%s6504_s18 + $0x30] sm:$0xff] %v6545_v55  ;;  %v1747_v58 = vmul.f32 0.5, %v6545_v55  ;;  %v4183_v59 = vadd.f32 %v4182_v57, %v4181_v56 }
 0x2d5   : > { %v4946_v60 = vpop.eup %4945  ;;  %v1769_v61 = vmul.f32 1.442695, %v1747_v58  ;;  %v6552_v62 = vadd.f32 %v4183_v59, %v6497_v12  ;;  %v4184_v63 = vpop.f32.mrb[16].mxu1 }
 0x2d6   : > { %v4185_v0 = vpop.f32.mrb[17].mxu1  ;;  %1811 = vrot.lane.b32.xlu1 %v4946_v60, %s5429_s24 }
 0x2d7   : > { %4951 = vpow2.f32 %v1769_v61  ;;  %1716 = vst [vmem:[%s6504_s18 + $0x38] sm:$0xff] %v6552_v62  ;;  %v1748_v1 = vmul.f32 0.5, %v6552_v62  ;;  %v4186_v2 = vadd.f32 %v4185_v0, %v4184_v63 }
 0x2d9   : > { %v4948_v3 = vpop.eup %4947  ;;  %v1771_v4 = vmul.f32 1.442695, %v1748_v1  ;;  %v6559_v5 = vadd.f32 %v4186_v2, %v6497_v12  ;;  %v4187_v6 = vpop.f32.mrb[18].mxu1 }
 0x2da   : > { %v4188_v7 = vpop.f32.mrb[19].mxu1  ;;  %1813 = vrot.lane.b32.xlu0 %v4948_v3, %s5429_s24 }
 0x2db   : > { %4953 = vpow2.f32 %v1771_v4  ;;  %1717 = vst [vmem:[%s6504_s18 + $0x40] sm:$0xff] %v6559_v5  ;;  %v1749_v8 = vmul.f32 0.5, %v6559_v5  ;;  %v4189_v9 = vadd.f32 %v4188_v7, %v4187_v6  ;;  %v2176_v6 = vld [vmem:[%s8179_s8 + $0x8] sm:$0xff] }
 0x2dd   : > { %v4950_v10 = vpop.eup %4949  ;;  %v1773_v11 = vmul.f32 1.442695, %v1749_v8  ;;  %v6566_v13 = vadd.f32 %v4189_v9, %v6497_v12  ;;  %v4190_v14 = vpop.f32.mrb[20].mxu1 }
 0x2de   : > { %v4191_v16 = vpop.f32.mrb[21].mxu1  ;;  %1815 = vrot.lane.b32.xlu1 %v4950_v10, %s5429_s24  ;;  %v2293_v10 = vld [vmem:[%s8179_s8 + $0x3b0] sm:$0xff] }
 0x2df   : > { %4955 = vpow2.f32 %v1773_v11  ;;  %1718 = vst [vmem:[%s6504_s18 + $0x48] sm:$0xff] %v6566_v13  ;;  %v1750_v17 = vmul.f32 0.5, %v6566_v13  ;;  %v4192_v18 = vadd.f32 %v4191_v16, %v4190_v14  ;;  %v2300_v11 = vld [vmem:[%s8179_s8 + $0x3e8] sm:$0xff]  ;;  %v2181_v16 = vld [vmem:[%s8179_s8 + $0x30] sm:$0xff] }
 0x2e0   : > { %v6630_v14 = vpack.c.bf16 %v2300_v11, %v2293_v10 }
 0x2e1   : > { %v4952_v19 = vpop.eup %4951  ;;  %v1775_v20 = vmul.f32 1.442695, %v1750_v17  ;;  %v6573_v22 = vadd.f32 %v4192_v18, %v6497_v12  ;;  %v4193_v24 = vpop.f32.mrb[22].mxu1  ;;  %v2188_v17 = vld [vmem:[%s8179_s8 + $0x68] sm:$0xff] }
 0x2e2   : > { %v4194_v25 = vpop.f32.mrb[23].mxu1  ;;  %1817 = vrot.lane.b32.xlu0 %v4952_v19, %s5429_s24  ;;  %4753 = vmatprep.subr.bf16.mxu0 %v6630_v14  ;;  %v6639_v18 = vpack.c.bf16 %v2188_v17, %v2181_v16  ;;  %v2307_v19 = vld [vmem:[%s8179_s8 + $0x420] sm:$0xff]  ;;  %v2189_v17 = vld [vmem:[%s8179_s8 + $0x70] sm:$0xff] }
 0x2e3   : > { %4957 = vpow2.f32 %v1775_v20  ;;  %1719 = vst [vmem:[%s6504_s18 + $0x50] sm:$0xff] %v6573_v22  ;;  %v1751_v26 = vmul.f32 0.5, %v6573_v22  ;;  %v4195_v27 = vadd.f32 %v4194_v25, %v4193_v24  ;;  %v2314_v20 = vld [vmem:[%s8179_s8 + $0x458] sm:$0xff]  ;;  %v2195_v25 = vld [vmem:[%s8179_s8 + $0xa0] sm:$0xff] }
 0x2e4   : > { %v6647_v24 = vpack.c.bf16 %v2314_v20, %v2307_v19  ;;  %4755 = vmatpush3.bf16.msra.mxu0 %v6639_v18  ;;  %v2196_v19 = vld [vmem:[%s8179_s8 + $0xa8] sm:$0xff] }
 0x2e5   : > { %v4954_v29 = vpop.eup %4953  ;;  %v1777_v30 = vmul.f32 1.442695, %v1751_v26  ;;  %v6580_v31 = vadd.f32 %v4195_v27, %v6497_v12  ;;  %v4196_v32 = vpop.f32.mrb[24].mxu1  ;;  %v2202_v26 = vld [vmem:[%s8179_s8 + $0xd8] sm:$0xff] }
 0x2e6   : > { %v4197_v33 = vpop.f32.mrb[25].mxu1  ;;  %1819 = vrot.lane.b32.xlu1 %v4954_v29, %s5429_s24  ;;  %v6656_v27 = vpack.c.bf16 %v2202_v26, %v2195_v25  ;;  %v2321_v29 = vld [vmem:[%s8179_s8 + $0x490] sm:$0xff]  ;;  %4757 = vmatprep.subr.bf16.mxu0 %v6647_v24  ;;  %v2204_v25 = vld [vmem:[%s8179_s8 + $0xe8] sm:$0xff]  ;;  %v2211_v26 = vld [vmem:[%s8179_s8 + $0x120] sm:$0xff] }
 0x2e7   : > { %4959 = vpow2.f32 %v1777_v30  ;;  %1720 = vst [vmem:[%s6504_s18 + $0x58] sm:$0xff] %v6580_v31  ;;  %v1752_v35 = vmul.f32 0.5, %v6580_v31  ;;  %v4198_v36 = vadd.f32 %v4197_v33, %v4196_v32  ;;  %v2328_v30 = vld [vmem:[%s8179_s8 + $0x4c8] sm:$0xff]  ;;  %v2209_v33 = vld [vmem:[%s8179_s8 + $0x110] sm:$0xff] }
 0x2e8   : > { %v6665_v32 = vpack.c.bf16 %v2328_v30, %v2321_v29  ;;  %4759 = vmatpush3.bf16.msra.mxu0 %v6656_v27  ;;  %v4566_v30 = vpack.c.bf16 %v2196_v19, %v2189_v17 }
 0x2e9   : > { %v4956_v37 = vpop.eup %4955  ;;  %v1779_v38 = vmul.f32 1.442695, %v1752_v35  ;;  %v6587_v39 = vadd.f32 %v4198_v36, %v6497_v12  ;;  %v4199_v40 = vpop.f32.mrb[26].mxu1  ;;  %v2216_v35 = vld [vmem:[%s8179_s8 + $0x148] sm:$0xff]  ;;  %v2335_v36 = vld [vmem:[%s8179_s8 + $0x500] sm:$0xff] }
 0x2ea   : > { %v4200_v42 = vpop.f32.mrb[27].mxu1  ;;  %1821 = vrot.lane.b32.xlu0 %v4956_v37, %s5429_s24  ;;  %v2342_v37 = vld [vmem:[%s8179_s8 + $0x538] sm:$0xff]  ;;  %4761 = vmatprep.subr.bf16.mxu0 %v6665_v32 }
 0x2eb   : > { %4961 = vpow2.f32 %v1779_v38  ;;  %1721 = vst [vmem:[%s6504_s18 + $0x60] sm:$0xff] %v6587_v39  ;;  %v1753_v43 = vmul.f32 0.5, %v6587_v39  ;;  %v4201_v44 = vadd.f32 %v4200_v42, %v4199_v40  ;;  %v6680_v38 = vpack.c.bf16 %v2216_v35, %v2209_v33  ;;  %v2223_v42 = vld [vmem:[%s8179_s8 + $0x180] sm:$0xff] }
 0x2ec   : > { %v6683_v40 = vpack.c.bf16 %v2342_v37, %v2335_v36  ;;  %v4568_v35 = vpack.c.bf16 %v2211_v26, %v2204_v25  ;;  %v2203_v36 = vld [vmem:[%s8179_s8 + $0xe0] sm:$0xff]  ;;  %v2210_v37 = vld [vmem:[%s8179_s8 + $0x118] sm:$0xff]  ;;  %v2252_v25 = vld [vmem:[%s8179_s8 + $0x268] sm:$0xff] }
 0x2ed   : > { %v4958_v45 = vpop.eup %4957  ;;  %v1781_v46 = vmul.f32 1.442695, %v1753_v43  ;;  %v6594_v47 = vadd.f32 %v4201_v44, %v6497_v12  ;;  %v4202_v49 = vpop.f32.mrb[28].mxu1  ;;  %v2230_v43 = vld [vmem:[%s8179_s8 + $0x1b8] sm:$0xff]  ;;  %v2349_v44 = vld [vmem:[%s8179_s8 + $0x570] sm:$0xff]  ;;  %4763 = vmatpush3.bf16.msra.mxu0 %v6680_v38 }
 0x2ee   : > { %v4203_v50 = vpop.f32.mrb[29].mxu1  ;;  %1823 = vrot.lane.b32.xlu1 %v4958_v45, %s5429_s24  ;;  %v2356_v45 = vld [vmem:[%s8179_s8 + $0x5a8] sm:$0xff]  ;;  %4765 = vmatprep.subr.bf16.mxu0 %v6683_v40 }
 0x2ef   : > { %4963 = vpow2.f32 %v1781_v46  ;;  %1722 = vst [vmem:[%s6504_s18 + $0x68] sm:$0xff] %v6594_v47  ;;  %v1754_v51 = vmul.f32 0.5, %v6594_v47  ;;  %v4204_v52 = vadd.f32 %v4203_v50, %v4202_v49  ;;  %v6698_v46 = vpack.c.bf16 %v2230_v43, %v2223_v42  ;;  %v2237_v50 = vld [vmem:[%s8179_s8 + $0x1f0] sm:$0xff]  ;;  %v2218_v43 = vld [vmem:[%s8179_s8 + $0x158] sm:$0xff] }
 0x2f0   : > { %v6701_v49 = vpack.c.bf16 %v2356_v45, %v2349_v44  ;;  %v2225_v44 = vld [vmem:[%s8179_s8 + $0x190] sm:$0xff]  ;;  %v1728_v45 = vld [vmem:[%s6746_s14 + $0x18] sm:$0xff] }
 0x2f1   : > { %v4960_v53 = vpop.eup %4959  ;;  %v1783_v54 = vmul.f32 1.442695, %v1754_v51  ;;  %v6601_v56 = vadd.f32 %v4204_v52, %v6497_v12  ;;  %v4205_v57 = vpop.f32.mrb[30].mxu1  ;;  %v2244_v51 = vld [vmem:[%s8179_s8 + $0x228] sm:$0xff]  ;;  %v2363_v52 = vld [vmem:[%s8179_s8 + $0x5e0] sm:$0xff]  ;;  %4767 = vmatpush3.bf16.msra.mxu0 %v6698_v46 }
 0x2f2   : > { %v4206_v58 = vpop.f32.mrb[31].mxu1  ;;  %1825 = vrot.lane.b32.xlu0 %v4960_v53, %s5429_s24  ;;  %v2370_v53 = vld [vmem:[%s8179_s8 + $0x618] sm:$0xff]  ;;  %4769 = vmatprep.subr.bf16.mxu0 %v6701_v49 }
 0x2f3   : > { %4965 = vpow2.f32 %v1783_v54  ;;  %1723 = vst [vmem:[%s6504_s18 + $0x70] sm:$0xff] %v6601_v56  ;;  %v1755_v59 = vmul.f32 0.5, %v6601_v56  ;;  %v4207_v60 = vadd.f32 %v4206_v58, %v4205_v57  ;;  %v6716_v54 = vpack.c.bf16 %v2244_v51, %v2237_v50  ;;  %v2251_v58 = vld [vmem:[%s8179_s8 + $0x260] sm:$0xff] }
 0x2f4   : > { %v6719_v57 = vpack.c.bf16 %v2370_v53, %v2363_v52  ;;  %v4570_v50 = vpack.c.bf16 %v2210_v37, %v2203_v36  ;;  %v4572_v52 = vpack.c.bf16 %v2225_v44, %v2218_v43  ;;  %v2217_v53 = vld [vmem:[%s8179_s8 + $0x150] sm:$0xff]  ;;  %v2259_v37 = vld [vmem:[%s8179_s8 + $0x2a0] sm:$0xff]  ;;  %v2274_v44 = vld [vmem:[%s8179_s8 + $0x318] sm:$0xff] }
 0x2f5   : > { %v4962_v61 = vpop.eup %4961  ;;  %v1785_v63 = vmul.f32 1.442695, %v1755_v59  ;;  %v6608_v0 = vadd.f32 %v4207_v60, %v6497_v12  ;;  %v2183_v12 = vld [vmem:[%s8179_s8 + $0x40] sm:$0xff]  ;;  %v2258_v59 = vld [vmem:[%s8179_s8 + $0x298] sm:$0xff]  ;;  %v2377_v60 = vld [vmem:[%s8179_s8 + $0x650] sm:$0xff]  ;;  %4771 = vmatpush3.bf16.msra.mxu0 %v6716_v54 }
 0x2f6   : > { %1827 = vrot.lane.b32.xlu1 %v4962_v61, %s5429_s24  ;;  %v4560_v7 = vpack.c.bf16 %v2183_v12, %v2176_v6  ;;  %v2384_v61 = vld [vmem:[%s8179_s8 + $0x688] sm:$0xff]  ;;  %4773 = vmatprep.subr.bf16.mxu0 %v6719_v57  ;;  %v2190_v12 = vld [vmem:[%s8179_s8 + $0x78] sm:$0xff] }
 0x2f7   : > { %4967 = vpow2.f32 %v1785_v63  ;;  %1724 = vst [vmem:[%s6504_s18 + $0x78] sm:$0xff] %v6608_v0  ;;  %v1756_v1 = vmul.f32 0.5, %v6608_v0  ;;  %v6734_v63 = vpack.c.bf16 %v2258_v59, %v2251_v58  ;;  %v2224_v58 = vld [vmem:[%s8179_s8 + $0x188] sm:$0xff] }
 0x2f8   : > { %4561 = vmatprep.subr.bf16.mxu1 %v4560_v7  ;;  %v2197_v7 = vld [vmem:[%s8179_s8 + $0xb0] sm:$0xff] }
 0x2f9   : > { %v4964_v2 = vpop.eup %4963  ;;  %v1787_v3 = vmul.f32 1.442695, %v1756_v1  ;;  %v6737_v1 = vpack.c.bf16 %v2384_v61, %v2377_v60  ;;  %4775 = vmatpush3.bf16.msra.mxu0 %v6734_v63  ;;  %v4564_v16 = vpack.c.bf16 %v2197_v7, %v2190_v12  ;;  %v2232_v60 = vld [vmem:[%s8179_s8 + $0x1c8] sm:$0xff]  ;;  %v2239_v61 = vld [vmem:[%s8179_s8 + $0x200] sm:$0xff]  ;;  %v2238_v7 = vld [vmem:[%s8179_s8 + $0x1f8] sm:$0xff] }
 0x2fa   : > { %1829 = vrot.lane.b32.xlu0 %v4964_v2, %s5429_s24  ;;  %v1725_v2 = vld [vmem:[%s6746_s14] sm:$0xff] }
 0x2fb   : > { %4969 = vpow2.f32 %v1787_v3  ;;  %4777 = vmatprep.subr.bf16.mxu0 %v6737_v1  ;;  %v2175_v3 = vld [vmem:[%s8179_s8] sm:$0xff] }
 0x2fc   : > { %v2231_v12 = vld [vmem:[%s8179_s8 + $0x1c0] sm:$0xff] }
 0x2fd   : > { %v4966_v4 = vpop.eup %4965 }
 0x2fe   : > { %1831 = vrot.lane.b32.xlu1 %v4966_v4, %s5429_s24  ;;  %v2182_v4 = vld [vmem:[%s8179_s8 + $0x38] sm:$0xff] }
 0x2ff   : > { %v4562_v10 = vpack.c.bf16 %v2182_v4, %v2175_v3  ;;  %v4574_v3 = vpack.c.bf16 %v2224_v58, %v2217_v53  ;;  %v2273_v53 = vld [vmem:[%s8179_s8 + $0x310] sm:$0xff]  ;;  %v2280_v58 = vld [vmem:[%s8179_s8 + $0x348] sm:$0xff] }
 0x301   : > { %v4968_v8 = vpop.eup %4967 }
 0x302   : > { %1833 = vrot.lane.b32.xlu0 %v4968_v8, %s5429_s24 }
 0x305   : > { %v4970_v9 = vpop.eup %4969 }
 0x306   : > { %1835 = vrot.lane.b32.xlu1 %v4970_v9, %s5429_s24  ;;  %v1726_v9 = vld [vmem:[%s6746_s14 + $0x8] sm:$0xff] }
 0x33c   : > { %v1806_v6 = vpop.permute.xlu0 %1805 }
 0x33d   : > { %v1853_v8 = vmul.f32 %v1806_v6, %v1725_v2  ;;  %v1729_v2 = vld [vmem:[%s6746_s14 + $0x20] sm:$0xff]  ;;  %v4576_v6 = vpack.c.bf16 %v2239_v61, %v2232_v60  ;;  %v2288_v60 = vld [vmem:[%s8179_s8 + $0x388] sm:$0xff] }
 0x33e   : > { %v2295_v61 = vld [vmem:[%s8179_s8 + $0x3c0] sm:$0xff] }
 0x33f   : > { %v1869_v11 = vadd.f32 %v1853_v8, %v6507_v15  ;;  %v1727_v15 = vld [vmem:[%s6746_s14 + $0x10] sm:$0xff] }
 0x340   : > { %v1808_v20 = vpop.permute.xlu0 %1807 }
 0x341   : > { %v1854_v29 = vmul.f32 %v1808_v20, %v1726_v9  ;;  %3996 = vmatmul.mubr.msk.f32.vlgmr.msra.gmra.mrb[32].mxu1 %vm1933_vm0, %v1869_v11  ;;  %v2246_v9 = vld [vmem:[%s8179_s8 + $0x238] sm:$0xff]  ;;  %v1730_v11 = vld [vmem:[%s6746_s14 + $0x28] sm:$0xff]  ;;  %v2245_v20 = vld [vmem:[%s8179_s8 + $0x230] sm:$0xff] }
 0x342   : > { %2052 = vmatprep.mubr.f32.mxu1 %v5428_v23  ;;  %4563 = vmatpush1.bf16.msra.mxu1 %v4562_v10  ;;  %v2253_v10 = vld [vmem:[%s8179_s8 + $0x270] sm:$0xff] }
 0x343   : > { %v1870_v33 = vadd.f32 %v1854_v29, %v6513_v21  ;;  %4565 = vmatprep.subr.bf16.mxu1 %v4564_v16  ;;  %v4578_v16 = vpack.c.bf16 %v2238_v7, %v2231_v12  ;;  %v4580_v19 = vpack.c.bf16 %v2253_v10, %v2246_v9  ;;  %v2260_v29 = vld [vmem:[%s8179_s8 + $0x2a8] sm:$0xff]  ;;  %v2294_v12 = vld [vmem:[%s8179_s8 + $0x3b8] sm:$0xff]  ;;  %v2309_v9 = vld [vmem:[%s8179_s8 + $0x430] sm:$0xff] }
 0x344   : > { %v1810_v42 = vpop.permute.xlu1 %1809  ;;  %v1734_v10 = vld [vmem:[%s6746_s14 + $0x48] sm:$0xff] }
 0x345   : > { %v1855_v21 = vmul.f32 %v1810_v42, %v1727_v15  ;;  %3997 = vmatmul.mubr.msk.f32.gmra.mrb[34].mxu1 %vm1933_vm0, %v1870_v33  ;;  %v2267_v15 = vld [vmem:[%s8179_s8 + $0x2e0] sm:$0xff]  ;;  %v4582_v33 = vpack.c.bf16 %v2252_v25, %v2245_v20  ;;  %v2266_v42 = vld [vmem:[%s8179_s8 + $0x2d8] sm:$0xff]  ;;  %v2316_v25 = vld [vmem:[%s8179_s8 + $0x468] sm:$0xff] }
 0x346   : > { %2058 = vmatprep.mubr.f32.mxu1 %v5428_v23  ;;  %4567 = vmatpush1.bf16.msra.mxu1 %v4566_v30  ;;  %v1731_v30 = vld [vmem:[%s6746_s14 + $0x30] sm:$0xff]  ;;  %v4584_v36 = vpack.c.bf16 %v2267_v15, %v2260_v29 }
 0x347   : > { %v1871_v51 = vadd.f32 %v1855_v21, %v6519_v28  ;;  %4569 = vmatprep.subr.bf16.mxu1 %v4568_v35  ;;  %v2281_v21 = vld [vmem:[%s8179_s8 + $0x350] sm:$0xff] }
 0x348   : > { %v1812_v59 = vpop.permute.xlu1 %1811  ;;  %v1735_v29 = vld [vmem:[%s6746_s14 + $0x50] sm:$0xff] }
 0x349   : > { %v1856_v28 = vmul.f32 %v1812_v59, %v1728_v45  ;;  %3998 = vmatmul.mubr.msk.f32.gmra.mrb[36].mxu1 %vm1933_vm0, %v1871_v51  ;;  %v1732_v45 = vld [vmem:[%s6746_s14 + $0x38] sm:$0xff] }
 0x34a   : > { %2064 = vmatprep.mubr.f32.mxu1 %v5428_v23  ;;  %4571 = vmatpush1.bf16.msra.mxu1 %v4570_v50  ;;  %v4586_v50 = vpack.c.bf16 %v2266_v42, %v2259_v37  ;;  %v2330_v37 = vld [vmem:[%s8179_s8 + $0x4d8] sm:$0xff]  ;;  %v2337_v42 = vld [vmem:[%s8179_s8 + $0x510] sm:$0xff] }
 0x34b   : > { %v1872_v4 = vadd.f32 %v1856_v28, %v6525_v34  ;;  %4573 = vmatprep.subr.bf16.mxu1 %v4572_v52  ;;  %v4588_v52 = vpack.c.bf16 %v2281_v21, %v2274_v44  ;;  %v1733_v28 = vld [vmem:[%s6746_s14 + $0x40] sm:$0xff] }
 0x34c   : > { %v1814_v8 = vpop.permute.xlu0 %1813 }
 0x34d   : > { %v1857_v34 = vmul.f32 %v1814_v8, %v1729_v2  ;;  %3999 = vmatmul.mubr.msk.f32.gmra.mrb[38].mxu1 %vm1933_vm0, %v1872_v4  ;;  %v4590_v2 = vpack.c.bf16 %v2280_v58, %v2273_v53  ;;  %v4592_v4 = vpack.c.bf16 %v2295_v61, %v2288_v60  ;;  %v2302_v8 = vld [vmem:[%s8179_s8 + $0x3f8] sm:$0xff]  ;;  %v2351_v53 = vld [vmem:[%s8179_s8 + $0x580] sm:$0xff] }
 0x34e   : > { %2070 = vmatprep.mubr.f32.mxu1 %v5428_v23  ;;  %4575 = vmatpush1.bf16.msra.mxu1 %v4574_v3  ;;  %v1737_v58 = vld [vmem:[%s6746_s14 + $0x60] sm:$0xff] }
 0x34f   : > { %v1873_v17 = vadd.f32 %v1857_v34, %v6531_v41  ;;  %4577 = vmatprep.subr.bf16.mxu1 %v4576_v6  ;;  %v2287_v6 = vld [vmem:[%s8179_s8 + $0x380] sm:$0xff] }
 0x350   : > { %v1816_v26 = vpop.permute.xlu1 %1815  ;;  %v4594_v34 = vpack.c.bf16 %v2294_v12, %v2287_v6  ;;  %v1738_v6 = vld [vmem:[%s6746_s14 + $0x68] sm:$0xff] }
 0x351   : > { %v1858_v41 = vmul.f32 %v1816_v26, %v1730_v11  ;;  %4000 = vmatmul.mubr.msk.f32.gmra.mrb[40].mxu1 %vm1933_vm0, %v1873_v17  ;;  %v2301_v17 = vld [vmem:[%s8179_s8 + $0x3f0] sm:$0xff]  ;;  %v2323_v26 = vld [vmem:[%s8179_s8 + $0x4a0] sm:$0xff] }
 0x352   : > { %2076 = vmatprep.mubr.f32.mxu1 %v5428_v23  ;;  %4579 = vmatpush1.bf16.msra.mxu1 %v4578_v16  ;;  %v4596_v16 = vpack.c.bf16 %v2309_v9, %v2302_v8  ;;  %v2357_v9 = vld [vmem:[%s8179_s8 + $0x5b0] sm:$0xff] }
 0x353   : > { %v1874_v35 = vadd.f32 %v1858_v41, %v6538_v48  ;;  %4581 = vmatprep.subr.bf16.mxu1 %v4580_v19  ;;  %v2308_v19 = vld [vmem:[%s8179_s8 + $0x428] sm:$0xff] }
 0x354   : > { %v1818_v43 = vpop.permute.xlu0 %1817  ;;  %v4598_v15 = vpack.c.bf16 %v2308_v19, %v2301_v17 }
 0x355   : > { %v1859_v48 = vmul.f32 %v1818_v43, %v1731_v30  ;;  %4001 = vmatmul.mubr.msk.f32.gmra.mrb[42].mxu1 %vm1933_vm0, %v1874_v35  ;;  %v4600_v30 = vpack.c.bf16 %v2323_v26, %v2316_v25  ;;  %v2322_v35 = vld [vmem:[%s8179_s8 + $0x498] sm:$0xff] }
 0x356   : > { %2082 = vmatprep.mubr.f32.mxu1 %v5428_v23  ;;  %4583 = vmatpush1.bf16.msra.mxu1 %v4582_v33  ;;  %v2315_v33 = vld [vmem:[%s8179_s8 + $0x460] sm:$0xff]  ;;  %v1736_v43 = vld [vmem:[%s6746_s14 + $0x58] sm:$0xff] }
 0x357   : > { %v1875_v51 = vadd.f32 %v1859_v48, %v6545_v55  ;;  %4585 = vmatprep.subr.bf16.mxu1 %v4584_v36  ;;  %v4602_v44 = vpack.c.bf16 %v2322_v35, %v2315_v33  ;;  %v4604_v48 = vpack.c.bf16 %v2337_v42, %v2330_v37  ;;  %v2378_v33 = vld [vmem:[%s8179_s8 + $0x658] sm:$0xff]  ;;  %v2393_v37 = vld [vmem:[%s8179_s8 + $0x6d0] sm:$0xff]  ;;  %v2391_v42 = vld [vmem:[%s8179_s8 + $0x6c0] sm:$0xff] }
 0x358   : > { %v1820_v59 = vpop.permute.xlu1 %1819 }
 0x359   : > { %v1860_v55 = vmul.f32 %v1820_v59, %v1732_v45  ;;  %4002 = vmatmul.mubr.msk.f32.gmra.mrb[44].mxu1 %vm1933_vm0, %v1875_v51  ;;  %v2329_v45 = vld [vmem:[%s8179_s8 + $0x4d0] sm:$0xff] }
 0x35a   : > { %2088 = vmatprep.mubr.f32.mxu1 %v5428_v23  ;;  %4587 = vmatpush1.bf16.msra.mxu1 %v4586_v50  ;;  %v2336_v50 = vld [vmem:[%s8179_s8 + $0x508] sm:$0xff] }
 0x35b   : > { %v1876_v3 = vadd.f32 %v1860_v55, %v6552_v62  ;;  %4589 = vmatprep.subr.bf16.mxu1 %v4588_v52  ;;  %v2344_v52 = vld [vmem:[%s8179_s8 + $0x548] sm:$0xff]  ;;  %v4606_v59 = vpack.c.bf16 %v2336_v50, %v2329_v45  ;;  %v2343_v55 = vld [vmem:[%s8179_s8 + $0x540] sm:$0xff]  ;;  %v2286_v50 = vld [vmem:[%s8179_s8 + $0x378] sm:$0xff] }
 0x35c   : > { %v1822_v7 = vpop.permute.xlu0 %1821  ;;  %v4608_v61 = vpack.c.bf16 %v2351_v53, %v2344_v52  ;;  %v2279_v45 = vld [vmem:[%s8179_s8 + $0x340] sm:$0xff]  ;;  %v2178_v53 = vld [vmem:[%s8179_s8 + $0x18] sm:$0xff] }
 0x35d   : > { %v1861_v62 = vmul.f32 %v1822_v7, %v1733_v28  ;;  %4003 = vmatmul.mubr.msk.f32.gmra.mrb[46].mxu1 %vm1933_vm0, %v1876_v3  ;;  %v2350_v28 = vld [vmem:[%s8179_s8 + $0x578] sm:$0xff]  ;;  %v7020_v52 = vpack.c.bf16 %v2286_v50, %v2279_v45 }
 0x35e   : > { %2094 = vmatprep.mubr.f32.mxu1 %v5428_v23  ;;  %4591 = vmatpush1.bf16.msra.mxu1 %v4590_v2  ;;  %v2358_v3 = vld [vmem:[%s8179_s8 + $0x5b8] sm:$0xff]  ;;  %v4610_v12 = vpack.c.bf16 %v2350_v28, %v2343_v55 }
 0x35f   : > { %v1877_v11 = vadd.f32 %v1861_v62, %v6559_v5  ;;  %4593 = vmatprep.subr.bf16.mxu1 %v4592_v4  ;;  %v2365_v4 = vld [vmem:[%s8179_s8 + $0x5f0] sm:$0xff]  ;;  %v2364_v62 = vld [vmem:[%s8179_s8 + $0x5e8] sm:$0xff] }
 0x360   : > { %v1824_v20 = vpop.permute.xlu1 %1823  ;;  %v4612_v8 = vpack.c.bf16 %v2365_v4, %v2358_v3  ;;  %v4614_v17 = vpack.c.bf16 %v2364_v62, %v2357_v9  ;;  %v2184_v3 = vld [vmem:[%s8179_s8 + $0x48] sm:$0xff] }
 0x361   : > { %v1862_v5 = vmul.f32 %v1824_v20, %v1734_v10  ;;  %4004 = vmatmul.mubr.msk.f32.gmra.mrb[48].mxu1 %vm1933_vm0, %v1877_v11 }
 0x362   : > { %2100 = vmatprep.mubr.f32.mxu1 %v5428_v23  ;;  %4595 = vmatpush1.bf16.msra.mxu1 %v4594_v34  ;;  %v2372_v34 = vld [vmem:[%s8179_s8 + $0x628] sm:$0xff] }
 0x363   : > { %v1878_v41 = vadd.f32 %v1862_v5, %v6566_v13  ;;  %4597 = vmatprep.subr.bf16.mxu1 %v4596_v16  ;;  %v1739_v16 = vld [vmem:[%s6746_s14 + $0x70] sm:$0xff]  ;;  %v1740_v5 = vld [vmem:[%s6746_s14 + $0x78] sm:$0xff] }
 0x364   : > { %v1826_v36 = vpop.permute.xlu0 %1825 }
 0x365   : > { %v1863_v13 = vmul.f32 %v1826_v36, %v1735_v29  ;;  %4005 = vmatmul.mubr.msk.f32.gmra.mrb[50].mxu1 %vm1933_vm0, %v1878_v41  ;;  %v2386_v36 = vld [vmem:[%s8179_s8 + $0x698] sm:$0xff] }
 0x366   : > { %2106 = vmatprep.mubr.f32.mxu1 %v5428_v23  ;;  %4599 = vmatpush1.bf16.msra.mxu1 %v4598_v15 }
 0x367   : > { %v1879_v21 = vadd.f32 %v1863_v13, %v6573_v22  ;;  %4601 = vmatprep.subr.bf16.mxu1 %v4600_v30  ;;  %v2371_v30 = vld [vmem:[%s8179_s8 + $0x620] sm:$0xff]  ;;  %v4620_v13 = vpack.c.bf16 %v2393_v37, %v2386_v36  ;;  %v1907_v37 = vld [vmem:[%s7035_s16 + $0x30] sm:$0xff] }
 0x368   : > { %v1828_v51 = vpop.permute.xlu1 %1827  ;;  %v4618_v35 = vpack.c.bf16 %v2378_v33, %v2371_v30 }
 0x369   : > { %v1864_v22 = vmul.f32 %v1828_v51, %v1736_v43  ;;  %4006 = vmatmul.mubr.msk.f32.gmra.mrb[52].mxu1 %vm1933_vm0, %v1879_v21  ;;  %v2398_v43 = vld [vmem:[%s8179_s8 + $0x6f8] sm:$0xff] }
 0x36a   : > { %2112 = vmatprep.mubr.f32.mxu1 %v5428_v23  ;;  %4603 = vmatpush1.bf16.msra.mxu1 %v4602_v44  ;;  %v2385_v44 = vld [vmem:[%s8179_s8 + $0x690] sm:$0xff]  ;;  %v7009_v21 = vpack.c.bf16 %v2398_v43, %v2391_v42  ;;  %v2220_v42 = vld [vmem:[%s8179_s8 + $0x168] sm:$0xff]  ;;  %v1908_v43 = vld [vmem:[%s7035_s16 + $0x38] sm:$0xff] }
 0x36b   : > { %v1880_v60 = vadd.f32 %v1864_v22, %v6580_v31  ;;  %4605 = vmatprep.subr.bf16.mxu1 %v4604_v48  ;;  %v2392_v48 = vld [vmem:[%s8179_s8 + $0x6c8] sm:$0xff]  ;;  %v2185_v22 = vld [vmem:[%s8179_s8 + $0x50] sm:$0xff] }
 0x36c   : > { %v1830_v2 = vpop.permute.xlu0 %1829  ;;  %v4622_v51 = vpack.c.bf16 %v2392_v48, %v2385_v44 }
 0x36d   : > { %v1865_v31 = vmul.f32 %v1830_v2, %v1737_v58  ;;  %4007 = vmatmul.mubr.msk.f32.gmra.mrb[54].mxu1 %vm1933_vm0, %v1880_v60  ;;  %v4624_v58 = vpack.c.bf16 %v2185_v22, %v2178_v53  ;;  %v1902_v60 = vld [vmem:[%s7035_s16 + $0x8] sm:$0xff]  ;;  %v2177_v2 = vld [vmem:[%s8179_s8 + $0x10] sm:$0xff] }
 0x36e   : > { %2118 = vmatprep.mubr.f32.mxu1 %v5428_v23  ;;  %4607 = vmatpush1.bf16.msra.mxu1 %v4606_v59  ;;  %v1901_v59 = vld [vmem:[%s7035_s16] sm:$0xff]  ;;  %v4626_v62 = vpack.c.bf16 %v2184_v3, %v2177_v2  ;;  %v1910_v2 = vld [vmem:[%s7035_s16 + $0x48] sm:$0xff] }
 0x36f   : > { %v1881_v7 = vadd.f32 %v1865_v31, %v6587_v39  ;;  %4609 = vmatprep.subr.bf16.mxu1 %v4608_v61  ;;  %v2379_v39 = vld [vmem:[%s8179_s8 + $0x660] sm:$0xff]  ;;  %v1903_v31 = vld [vmem:[%s7035_s16 + $0x10] sm:$0xff] }
 0x370   : > { %v1832_v10 = vpop.permute.xlu1 %1831  ;;  %v4616_v20 = vpack.c.bf16 %v2379_v39, %v2372_v34 }
 0x371   : > { %v1866_v11 = vmul.f32 %v1832_v10, %v1738_v6  ;;  %4008 = vmatmul.mubr.msk.f32.gmra.mrb[56].mxu1 %vm1933_vm0, %v1881_v7  ;;  %v2192_v6 = vld [vmem:[%s8179_s8 + $0x88] sm:$0xff]  ;;  %v1904_v7 = vld [vmem:[%s7035_s16 + $0x18] sm:$0xff] }
 0x372   : > { %2124 = vmatprep.mubr.f32.mxu1 %v5428_v23  ;;  %4611 = vmatpush1.bf16.msra.mxu1 %v4610_v12  ;;  %v2199_v12 = vld [vmem:[%s8179_s8 + $0xc0] sm:$0xff] }
 0x373   : > { %v1882_v19 = vadd.f32 %v1866_v11, %v6594_v47  ;;  %4613 = vmatprep.subr.bf16.mxu1 %v4612_v8  ;;  %v4628_v11 = vpack.c.bf16 %v2199_v12, %v2192_v6 }
 0x374   : > { %v1834_v25 = vpop.permute.xlu0 %1833 }
 0x375   : > { %v1867_v26 = vmul.f32 %v1834_v25, %v1739_v16  ;;  %4009 = vmatmul.mubr.msk.f32.gmra.mrb[58].mxu1 %vm1933_vm0, %v1882_v19  ;;  %v2191_v16 = vld [vmem:[%s8179_s8 + $0x80] sm:$0xff]  ;;  %v2206_v25 = vld [vmem:[%s8179_s8 + $0xf8] sm:$0xff] }
 0x376   : > { %2130 = vmatprep.mubr.f32.mxu1 %v5428_v23  ;;  %4615 = vmatpush1.bf16.msra.mxu1 %v4614_v17  ;;  %v2198_v17 = vld [vmem:[%s8179_s8 + $0xb8] sm:$0xff] }
 0x377   : > { %v1883_v29 = vadd.f32 %v1867_v26, %v6601_v56  ;;  %4617 = vmatprep.subr.bf16.mxu1 %v4616_v20  ;;  %v2265_v56 = vld [vmem:[%s8179_s8 + $0x2d0] sm:$0xff]  ;;  %v1905_v20 = vld [vmem:[%s7035_s16 + $0x20] sm:$0xff] }
 0x378   : > { %v1836_v15 = vpop.permute.xlu1 %1835  ;;  %v2213_v26 = vld [vmem:[%s8179_s8 + $0x130] sm:$0xff] }
 0x379   : > { %v1868_v41 = vmul.f32 %v1836_v15, %v1740_v5  ;;  %4010 = vmatmul.mubr.msk.f32.gmra.mrb[60].mxu1 %vm1933_vm0, %v1883_v29  ;;  %v1906_v5 = vld [vmem:[%s7035_s16 + $0x28] sm:$0xff] }
 0x37a   : > { %2136 = vmatprep.mubr.f32.mxu1 %v5428_v23  ;;  %v2272_v23 = vld [vmem:[%s8179_s8 + $0x308] sm:$0xff]  ;;  %4619 = vmatpush1.bf16.msra.mxu1 %v4618_v35  ;;  %v2205_v35 = vld [vmem:[%s8179_s8 + $0xf0] sm:$0xff] }
 0x37b   : > { %v1884_v47 = vadd.f32 %v1868_v41, %v6608_v0  ;;  %v6991_v0 = vpack.c.bf16 %v2272_v23, %v2265_v56  ;;  %4621 = vmatprep.subr.bf16.mxu1 %v4620_v13  ;;  %v4630_v41 = vpack.c.bf16 %v2198_v17, %v2191_v16  ;;  %v4632_v56 = vpack.c.bf16 %v2213_v26, %v2206_v25  ;;  %v2212_v23 = vld [vmem:[%s8179_s8 + $0x128] sm:$0xff]  ;;  %v2227_v13 = vld [vmem:[%s8179_s8 + $0x1a0] sm:$0xff] }
 0x37c   : > { %v4634_v45 = vpack.c.bf16 %v2212_v23, %v2205_v35  ;;  %v4636_v22 = vpack.c.bf16 %v2227_v13, %v2220_v42  ;;  %v2248_v16 = vld [vmem:[%s8179_s8 + $0x248] sm:$0xff]  ;;  %v2255_v17 = vld [vmem:[%s8179_s8 + $0x280] sm:$0xff] }
 0x37d   : > { %4011 = vmatmul.mubr.msk.f32.gmra.mrb[62].mxu1 %vm1933_vm0, %v1884_v47  ;;  %4779 = vmatpush3.bf16.msra.mxu0 %v6991_v0  ;;  %v1913_v23 = vld [vmem:[%s7035_s16 + $0x60] sm:$0xff]  ;;  %v1914_v42 = vld [vmem:[%s7035_s16 + $0x68] sm:$0xff] }
 0x37e   : > { %4781 = vmatprep.subr.bf16.mxu0 %v7009_v21  ;;  %4623 = vmatpush1.bf16.msra.mxu1 %v4622_v51 }
 0x37f   : > { %4625 = vmatprep.subr.bf16.mxu1 %v4624_v58  ;;  %v2219_v58 = vld [vmem:[%s8179_s8 + $0x160] sm:$0xff] }
 0x381   : > { %4783 = vmatpush3.bf16.msra.mxu0 %v7020_v52 }
 0x414   : > { %v2048_v61 = vpop.f32.mrb[32].mxu1 }
 0x415   : > { %v2049_v55 = vadd.f32 %v2048_v61, %v1901_v59  ;;  %v2050_v28 = vpop.f32.mrb[33].mxu1  ;;  %v2226_v59 = vld [vmem:[%s8179_s8 + $0x198] sm:$0xff]  ;;  %v1909_v61 = vld [vmem:[%s7035_s16 + $0x40] sm:$0xff] }
 0x416   : > { %v2051_v4 = vadd.f32 %v2050_v28, %v1902_v60  ;;  %v2241_v28 = vld [vmem:[%s8179_s8 + $0x210] sm:$0xff] }
 0x417   : > { %v7055_v10 = vmax.f32 %v2049_v55, 0.0  ;;  %v2234_v55 = vld [vmem:[%s8179_s8 + $0x1d8] sm:$0xff] }
 0x418   : > { %v7053_v8 = vmax.f32 %v2051_v4, 0.0  ;;  %v2054_v9 = vpop.f32.mrb[34].mxu1 }
 0x419   : > { %v2055_v34 = vadd.f32 %v2054_v9, %v1903_v31  ;;  %v2056_v39 = vpop.f32.mrb[35].mxu1  ;;  %v4638_v31 = vpack.c.bf16 %v2226_v59, %v2219_v58  ;;  %v4640_v9 = vpack.c.bf16 %v2241_v28, %v2234_v55  ;;  %v2261_v58 = vld [vmem:[%s8179_s8 + $0x2b0] sm:$0xff]  ;;  %v2268_v59 = vld [vmem:[%s8179_s8 + $0x2e8] sm:$0xff]  ;;  %v2283_v28 = vld [vmem:[%s8179_s8 + $0x360] sm:$0xff] }
 0x41a   : > { %v2057_v19 = vadd.f32 %v2056_v39, %v1904_v7  ;;  %2500 = vmatprep.mubr.f32.mxu1 %v7053_v8  ;;  %2983 = vmatprep.mubr.f32.mxu0 %v7053_v8  ;;  %v2276_v55 = vld [vmem:[%s8179_s8 + $0x328] sm:$0xff] }
 0x41b   : > { %2501 = vmatmul.mubr.f32.vlgmr.msra.gmra.mrb[64].mxu1 %v7055_v10  ;;  %2984 = vmatmul.mubr.f32.vlgmr.msra.gmra.mrb[32].mxu0 %v7055_v10  ;;  %v7077_v47 = vmax.f32 %v2055_v34, 0.0  ;;  %v2240_v34 = vld [vmem:[%s8179_s8 + $0x208] sm:$0xff] }
 0x41c   : > { %v7075_v29 = vmax.f32 %v2057_v19, 0.0  ;;  %v2060_v15 = vpop.f32.mrb[36].mxu1  ;;  %4627 = vmatpush1.bf16.msra.mxu1 %v4626_v62  ;;  %v2233_v62 = vld [vmem:[%s8179_s8 + $0x1d0] sm:$0xff]  ;;  %v1912_v19 = vld [vmem:[%s7035_s16 + $0x58] sm:$0xff] }
 0x41d   : > { %v2061_v30 = vadd.f32 %v2060_v15, %v1905_v20  ;;  %v2062_v33 = vpop.f32.mrb[37].mxu1  ;;  %4629 = vmatprep.subr.bf16.mxu1 %v4628_v11  ;;  %v1911_v11 = vld [vmem:[%s7035_s16 + $0x50] sm:$0xff]  ;;  %v4642_v26 = vpack.c.bf16 %v2240_v34, %v2233_v62  ;;  %v4652_v34 = vpack.c.bf16 %v2283_v28, %v2276_v55 }
 0x41e   : > { %v2063_v36 = vadd.f32 %v2062_v33, %v1906_v5  ;;  %2506 = vmatprep.mubr.f32.mxu1 %v7075_v29  ;;  %2988 = vmatprep.mubr.f32.mxu0 %v7075_v29  ;;  %v2247_v33 = vld [vmem:[%s8179_s8 + $0x240] sm:$0xff] }
 0x41f   : > { %2507 = vmatmul.mubr.f32.gmra.mrb[66].mxu1 %v7077_v47  ;;  %2989 = vmatmul.mubr.f32.gmra.mrb[34].mxu0 %v7077_v47  ;;  %v7099_v50 = vmax.f32 %v2061_v30, 0.0  ;;  %v4644_v30 = vpack.c.bf16 %v2255_v17, %v2248_v16  ;;  %v1917_v17 = vld [vmem:[%s7035_s16 + $0x80] sm:$0xff] }
 0x420   : > { %v7097_v44 = vmax.f32 %v2063_v36, 0.0  ;;  %v2066_v48 = vpop.f32.mrb[38].mxu1  ;;  %4631 = vmatpush1.bf16.msra.mxu1 %v4630_v41  ;;  %v2262_v36 = vld [vmem:[%s8179_s8 + $0x2b8] sm:$0xff] }
 0x421   : > { %v2067_v51 = vadd.f32 %v2066_v48, %v1907_v37  ;;  %v2068_v53 = vpop.f32.mrb[39].mxu1  ;;  %4633 = vmatprep.subr.bf16.mxu1 %v4632_v56  ;;  %v2254_v56 = vld [vmem:[%s8179_s8 + $0x278] sm:$0xff]  ;;  %v2269_v37 = vld [vmem:[%s8179_s8 + $0x2f0] sm:$0xff] }
 0x422   : > { %v2069_v60 = vadd.f32 %v2068_v53, %v1908_v43  ;;  %2512 = vmatprep.mubr.f32.mxu1 %v7097_v44  ;;  %2993 = vmatprep.mubr.f32.mxu0 %v7097_v44  ;;  %v4646_v48 = vpack.c.bf16 %v2254_v56, %v2247_v33 }
 0x423   : > { %2513 = vmatmul.mubr.f32.gmra.mrb[68].mxu1 %v7099_v50  ;;  %2994 = vmatmul.mubr.f32.gmra.mrb[36].mxu0 %v7099_v50  ;;  %v7121_v6 = vmax.f32 %v2067_v51, 0.0 }
 0x424   : > { %v7119_v3 = vmax.f32 %v2069_v60, 0.0  ;;  %v2072_v4 = vpop.f32.mrb[40].mxu1  ;;  %4635 = vmatpush1.bf16.msra.mxu1 %v4634_v45 }
 0x425   : > { %v2073_v12 = vadd.f32 %v2072_v4, %v1909_v61  ;;  %v2074_v7 = vpop.f32.mrb[41].mxu1  ;;  %4637 = vmatprep.subr.bf16.mxu1 %v4636_v22  ;;  %v4648_v22 = vpack.c.bf16 %v2269_v37, %v2262_v36  ;;  %v1915_v61 = vld [vmem:[%s7035_s16 + $0x70] sm:$0xff]  ;;  %v2296_v37 = vld [vmem:[%s8179_s8 + $0x3c8] sm:$0xff] }
 0x426   : > { %v2075_v39 = vadd.f32 %v2074_v7, %v1910_v2  ;;  %2518 = vmatprep.mubr.f32.mxu1 %v7119_v3  ;;  %2998 = vmatprep.mubr.f32.mxu0 %v7119_v3  ;;  %v1916_v2 = vld [vmem:[%s7035_s16 + $0x78] sm:$0xff]  ;;  %v2289_v36 = vld [vmem:[%s8179_s8 + $0x390] sm:$0xff] }
 0x427   : > { %2519 = vmatmul.mubr.f32.gmra.mrb[70].mxu1 %v7121_v6  ;;  %2999 = vmatmul.mubr.f32.gmra.mrb[38].mxu0 %v7121_v6  ;;  %v7143_v5 = vmax.f32 %v2073_v12, 0.0  ;;  %v4650_v12 = vpack.c.bf16 %v2268_v59, %v2261_v58  ;;  %v4658_v59 = vpack.c.bf16 %v2296_v37, %v2289_v36  ;;  %v2332_v36 = vld [vmem:[%s8179_s8 + $0x4e8] sm:$0xff]  ;;  %v2339_v37 = vld [vmem:[%s8179_s8 + $0x520] sm:$0xff] }
 0x428   : > { %v7141_v20 = vmax.f32 %v2075_v39, 0.0  ;;  %v2078_v25 = vpop.f32.mrb[42].mxu1  ;;  %4639 = vmatpush1.bf16.msra.mxu1 %v4638_v31  ;;  %v2275_v39 = vld [vmem:[%s8179_s8 + $0x320] sm:$0xff] }
 0x429   : > { %v2079_v15 = vadd.f32 %v2078_v25, %v1911_v11  ;;  %v2080_v41 = vpop.f32.mrb[43].mxu1  ;;  %4641 = vmatprep.subr.bf16.mxu1 %v4640_v9  ;;  %v2282_v11 = vld [vmem:[%s8179_s8 + $0x358] sm:$0xff]  ;;  %v2297_v25 = vld [vmem:[%s8179_s8 + $0x3d0] sm:$0xff] }
 0x42a   : > { %v2081_v35 = vadd.f32 %v2080_v41, %v1912_v19  ;;  %2524 = vmatprep.mubr.f32.mxu1 %v7141_v20  ;;  %3003 = vmatprep.mubr.f32.mxu0 %v7141_v20  ;;  %v2290_v19 = vld [vmem:[%s8179_s8 + $0x398] sm:$0xff] }
 0x42b   : > { %2525 = vmatmul.mubr.f32.gmra.mrb[72].mxu1 %v7143_v5  ;;  %3004 = vmatmul.mubr.f32.gmra.mrb[40].mxu0 %v7143_v5  ;;  %v7165_v45 = vmax.f32 %v2079_v15, 0.0 }
 0x42c   : > { %v7163_v13 = vmax.f32 %v2081_v35, 0.0  ;;  %v2084_v43 = vpop.f32.mrb[44].mxu1  ;;  %4643 = vmatpush1.bf16.msra.mxu1 %v4642_v26  ;;  %v1918_v26 = vld [vmem:[%s7035_s16 + $0x88] sm:$0xff] }
 0x42d   : > { %v2085_v51 = vadd.f32 %v2084_v43, %v1913_v23  ;;  %v2086_v53 = vpop.f32.mrb[45].mxu1  ;;  %4645 = vmatprep.subr.bf16.mxu1 %v4644_v30  ;;  %v4654_v30 = vpack.c.bf16 %v2282_v11, %v2275_v39  ;;  %v4656_v23 = vpack.c.bf16 %v2297_v25, %v2290_v19  ;;  %v1919_v43 = vld [vmem:[%s7035_s16 + $0x90] sm:$0xff]  ;;  %v1922_v39 = vld [vmem:[%s7035_s16 + $0xa8] sm:$0xff] }
 0x42e   : > { %v2087_v60 = vadd.f32 %v2086_v53, %v1914_v42  ;;  %2530 = vmatprep.mubr.f32.mxu1 %v7163_v13  ;;  %3008 = vmatprep.mubr.f32.mxu0 %v7163_v13  ;;  %v1920_v53 = vld [vmem:[%s7035_s16 + $0x98] sm:$0xff] }
 0x42f   : > { %2531 = vmatmul.mubr.f32.gmra.mrb[74].mxu1 %v7165_v45  ;;  %3009 = vmatmul.mubr.f32.gmra.mrb[42].mxu0 %v7165_v45  ;;  %v7187_v7 = vmax.f32 %v2085_v51, 0.0  ;;  %v2311_v51 = vld [vmem:[%s8179_s8 + $0x440] sm:$0xff] }
 0x430   : > { %v7185_v4 = vmax.f32 %v2087_v60, 0.0  ;;  %v2090_v31 = vpop.f32.mrb[46].mxu1  ;;  %4647 = vmatpush1.bf16.msra.mxu1 %v4646_v48  ;;  %v2304_v48 = vld [vmem:[%s8179_s8 + $0x408] sm:$0xff] }
 0x431   : > { %v2091_v9 = vadd.f32 %v2090_v31, %v1915_v61  ;;  %v2092_v62 = vpop.f32.mrb[47].mxu1  ;;  %4649 = vmatprep.subr.bf16.mxu1 %v4648_v22  ;;  %v4660_v28 = vpack.c.bf16 %v2311_v51, %v2304_v48  ;;  %v2310_v31 = vld [vmem:[%s8179_s8 + $0x438] sm:$0xff] }
 0x432   : > { %v2093_v16 = vadd.f32 %v2092_v62, %v1916_v2  ;;  %2536 = vmatprep.mubr.f32.mxu1 %v7185_v4  ;;  %3013 = vmatprep.mubr.f32.mxu0 %v7185_v4  ;;  %v2303_v2 = vld [vmem:[%s8179_s8 + $0x400] sm:$0xff]  ;;  %v2318_v62 = vld [vmem:[%s8179_s8 + $0x478] sm:$0xff] }
 0x433   : > { %2537 = vmatmul.mubr.f32.gmra.mrb[76].mxu1 %v7187_v7  ;;  %3014 = vmatmul.mubr.f32.gmra.mrb[44].mxu0 %v7187_v7  ;;  %v7209_v33 = vmax.f32 %v2091_v9, 0.0  ;;  %v1921_v9 = vld [vmem:[%s7035_s16 + $0xa0] sm:$0xff] }
 0x434   : > { %v7207_v15 = vmax.f32 %v2093_v16, 0.0  ;;  %v2096_v41 = vpop.f32.mrb[48].mxu1  ;;  %4651 = vmatpush1.bf16.msra.mxu1 %v4650_v12 }
 0x435   : > { %v2097_v56 = vadd.f32 %v2096_v41, %v1917_v17  ;;  %v2098_v35 = vpop.f32.mrb[49].mxu1  ;;  %4653 = vmatprep.subr.bf16.mxu1 %v4652_v34  ;;  %v2325_v34 = vld [vmem:[%s8179_s8 + $0x4b0] sm:$0xff]  ;;  %v4662_v17 = vpack.c.bf16 %v2310_v31, %v2303_v2  ;;  %v1925_v31 = vld [vmem:[%s7035_s16 + $0xc0] sm:$0xff] }
 0x436   : > { %v2099_v42 = vadd.f32 %v2098_v35, %v1918_v26  ;;  %2542 = vmatprep.mubr.f32.mxu1 %v7207_v15  ;;  %3018 = vmatprep.mubr.f32.mxu0 %v7207_v15  ;;  %v4664_v41 = vpack.c.bf16 %v2325_v34, %v2318_v62  ;;  %v1926_v62 = vld [vmem:[%s7035_s16 + $0xc8] sm:$0xff] }
 0x437   : > { %2543 = vmatmul.mubr.f32.gmra.mrb[78].mxu1 %v7209_v33  ;;  %3019 = vmatmul.mubr.f32.gmra.mrb[46].mxu0 %v7209_v33  ;;  %v7231_v60 = vmax.f32 %v2097_v56, 0.0  ;;  %v2324_v56 = vld [vmem:[%s8179_s8 + $0x4a8] sm:$0xff] }
 0x438   : > { %v7229_v22 = vmax.f32 %v2099_v42, 0.0  ;;  %v2102_v58 = vpop.f32.mrb[50].mxu1  ;;  %4655 = vmatpush1.bf16.msra.mxu1 %v4654_v30  ;;  %v2317_v30 = vld [vmem:[%s8179_s8 + $0x470] sm:$0xff]  ;;  %v1924_v42 = vld [vmem:[%s7035_s16 + $0xb8] sm:$0xff] }
 0x439   : > { %v2103_v61 = vadd.f32 %v2102_v58, %v1919_v43  ;;  %v2104_v55 = vpop.f32.mrb[51].mxu1  ;;  %4657 = vmatprep.subr.bf16.mxu1 %v4656_v23  ;;  %v1923_v23 = vld [vmem:[%s7035_s16 + $0xb0] sm:$0xff]  ;;  %v4666_v51 = vpack.c.bf16 %v2324_v56, %v2317_v30  ;;  %v2352_v56 = vld [vmem:[%s8179_s8 + $0x588] sm:$0xff] }
 0x43a   : > { %v2105_v12 = vadd.f32 %v2104_v55, %v1920_v53  ;;  %2548 = vmatprep.mubr.f32.mxu1 %v7229_v22  ;;  %3023 = vmatprep.mubr.f32.mxu0 %v7229_v22  ;;  %v2331_v55 = vld [vmem:[%s8179_s8 + $0x4e0] sm:$0xff]  ;;  %v2345_v30 = vld [vmem:[%s8179_s8 + $0x550] sm:$0xff] }
 0x43b   : > { %2549 = vmatmul.mubr.f32.gmra.mrb[80].mxu1 %v7231_v60  ;;  %3024 = vmatmul.mubr.f32.gmra.mrb[48].mxu0 %v7231_v60  ;;  %v7253_v19 = vmax.f32 %v2103_v61, 0.0  ;;  %v4668_v61 = vpack.c.bf16 %v2339_v37, %v2332_v36  ;;  %v2360_v36 = vld [vmem:[%s8179_s8 + $0x5c8] sm:$0xff]  ;;  %v2367_v37 = vld [vmem:[%s8179_s8 + $0x600] sm:$0xff] }
 0x43c   : > { %v7251_v11 = vmax.f32 %v2105_v12, 0.0  ;;  %v2108_v16 = vpop.f32.mrb[52].mxu1  ;;  %4659 = vmatpush1.bf16.msra.mxu1 %v4658_v59  ;;  %v2346_v12 = vld [vmem:[%s8179_s8 + $0x558] sm:$0xff] }
 0x43d   : > { %v2109_v25 = vadd.f32 %v2108_v16, %v1921_v9  ;;  %v2110_v26 = vpop.f32.mrb[53].mxu1  ;;  %4661 = vmatprep.subr.bf16.mxu1 %v4660_v28  ;;  %v2338_v28 = vld [vmem:[%s8179_s8 + $0x518] sm:$0xff]  ;;  %v2353_v9 = vld [vmem:[%s8179_s8 + $0x590] sm:$0xff] }
 0x43e   : > { %v2111_v35 = vadd.f32 %v2110_v26, %v1922_v39  ;;  %2554 = vmatprep.mubr.f32.mxu1 %v7251_v11  ;;  %3028 = vmatprep.mubr.f32.mxu0 %v7251_v11  ;;  %v4670_v16 = vpack.c.bf16 %v2338_v28, %v2331_v55  ;;  %v4676_v28 = vpack.c.bf16 %v2367_v37, %v2360_v36  ;;  %v2373_v36 = vld [vmem:[%s8179_s8 + $0x630] sm:$0xff]  ;;  %v2380_v37 = vld [vmem:[%s8179_s8 + $0x668] sm:$0xff] }
 0x43f   : > { %2555 = vmatmul.mubr.f32.gmra.mrb[82].mxu1 %v7253_v19  ;;  %3029 = vmatmul.mubr.f32.gmra.mrb[50].mxu0 %v7253_v19  ;;  %v7275_v53 = vmax.f32 %v2109_v25, 0.0 }
 0x440   : > { %v7273_v43 = vmax.f32 %v2111_v35, 0.0  ;;  %v2114_v48 = vpop.f32.mrb[54].mxu1  ;;  %4663 = vmatpush1.bf16.msra.mxu1 %v4662_v17 }
 0x441   : > { %v2115_v58 = vadd.f32 %v2114_v48, %v1923_v23  ;;  %v2116_v59 = vpop.f32.mrb[55].mxu1  ;;  %4665 = vmatprep.subr.bf16.mxu1 %v4664_v41  ;;  %v4672_v41 = vpack.c.bf16 %v2353_v9, %v2346_v12  ;;  %v1927_v23 = vld [vmem:[%s7035_s16 + $0xd0] sm:$0xff]  ;;  %v1929_v9 = vld [vmem:[%s7035_s16 + $0xe0] sm:$0xff] }
 0x442   : > { %v2117_v2 = vadd.f32 %v2116_v59, %v1924_v42  ;;  %2560 = vmatprep.mubr.f32.mxu1 %v7273_v43  ;;  %3033 = vmatprep.mubr.f32.mxu0 %v7273_v43  ;;  %v1928_v42 = vld [vmem:[%s7035_s16 + $0xd8] sm:$0xff] }
 0x443   : > { %2561 = vmatmul.mubr.f32.gmra.mrb[84].mxu1 %v7275_v53  ;;  %3034 = vmatmul.mubr.f32.gmra.mrb[52].mxu0 %v7275_v53  ;;  %v7297_v17 = vmax.f32 %v2115_v58, 0.0  ;;  %v4674_v58 = vpack.c.bf16 %v2352_v56, %v2345_v30 }
 0x444   : > { %v7295_v34 = vmax.f32 %v2117_v2, 0.0  ;;  %v2120_v39 = vpop.f32.mrb[56].mxu1  ;;  %4667 = vmatpush1.bf16.msra.mxu1 %v4666_v51  ;;  %v2359_v2 = vld [vmem:[%s8179_s8 + $0x5c0] sm:$0xff] }
 0x445   : > { %v2121_v25 = vadd.f32 %v2120_v39, %v1925_v31  ;;  %v2122_v26 = vpop.f32.mrb[57].mxu1  ;;  %4669 = vmatprep.subr.bf16.mxu1 %v4668_v61  ;;  %v2366_v31 = vld [vmem:[%s8179_s8 + $0x5f8] sm:$0xff]  ;;  %v2381_v39 = vld [vmem:[%s8179_s8 + $0x670] sm:$0xff] }
 0x446   : > { %v2123_v35 = vadd.f32 %v2122_v26, %v1926_v62  ;;  %2566 = vmatprep.mubr.f32.mxu1 %v7295_v34  ;;  %3038 = vmatprep.mubr.f32.mxu0 %v7295_v34  ;;  %v2374_v62 = vld [vmem:[%s8179_s8 + $0x638] sm:$0xff] }
 0x447   : > { %2567 = vmatmul.mubr.f32.gmra.mrb[86].mxu1 %v7297_v17  ;;  %3039 = vmatmul.mubr.f32.gmra.mrb[54].mxu0 %v7297_v17  ;;  %v7319_v59 = vmax.f32 %v2121_v25, 0.0 }
 0x448   : > { %v7317_v48 = vmax.f32 %v2123_v35, 0.0  ;;  %v2126_v51 = vpop.f32.mrb[58].mxu1  ;;  %4671 = vmatpush1.bf16.msra.mxu1 %v4670_v16  ;;  %v1930_v16 = vld [vmem:[%s7035_s16 + $0xe8] sm:$0xff] }
 0x449   : > { %v2127_v61 = vadd.f32 %v2126_v51, %v1927_v23  ;;  %v2128_v55 = vpop.f32.mrb[59].mxu1  ;;  %4673 = vmatprep.subr.bf16.mxu1 %v4672_v41  ;;  %v4678_v41 = vpack.c.bf16 %v2366_v31, %v2359_v2  ;;  %v4680_v23 = vpack.c.bf16 %v2381_v39, %v2374_v62  ;;  %v1931_v51 = vld [vmem:[%s7035_s16 + $0xf0] sm:$0xff]  ;;  %v4682_v31 = vpack.c.bf16 %v2380_v37, %v2373_v36 }
 0x44a   : > { %v2129_v12 = vadd.f32 %v2128_v55, %v1928_v42  ;;  %2572 = vmatprep.mubr.f32.mxu1 %v7317_v48  ;;  %v1932_v55 = vld [vmem:[%s7035_s16 + $0xf8] sm:$0xff] }
 0x44b   : > { %2573 = vmatmul.mubr.f32.gmra.mrb[88].mxu1 %v7319_v59  ;;  %v7339_v30 = vmax.f32 %v2127_v61, 0.0  ;;  %v2395_v61 = vld [vmem:[%s8179_s8 + $0x6e0] sm:$0xff] }
 0x44c   : > { %v7337_v25 = vmax.f32 %v2129_v12, 0.0  ;;  %v2132_v26 = vpop.f32.mrb[60].mxu1  ;;  %4675 = vmatpush1.bf16.msra.mxu1 %v4674_v58  ;;  %v2388_v58 = vld [vmem:[%s8179_s8 + $0x6a8] sm:$0xff] }
 0x44d   : > { %v2133_v56 = vadd.f32 %v2132_v26, %v1929_v9  ;;  %v2134_v35 = vpop.f32.mrb[61].mxu1  ;;  %4677 = vmatprep.subr.bf16.mxu1 %v4676_v28  ;;  %v4684_v39 = vpack.c.bf16 %v2395_v61, %v2388_v58  ;;  %v2394_v26 = vld [vmem:[%s8179_s8 + $0x6d8] sm:$0xff] }
 0x44e   : > { %v2135_v42 = vadd.f32 %v2134_v35, %v1930_v16  ;;  %2578 = vmatprep.mubr.f32.mxu1 %v7337_v25  ;;  %v2387_v16 = vld [vmem:[%s8179_s8 + $0x6a0] sm:$0xff]  ;;  %v2186_v58 = vld [vmem:[%s8179_s8 + $0x58] sm:$0xff] }
 0x44f   : > { %2579 = vmatmul.mubr.f32.gmra.mrb[90].mxu1 %v7339_v30  ;;  %v7359_v12 = vmax.f32 %v2133_v56, 0.0  ;;  %v2187_v56 = vld [vmem:[%s8179_s8 + $0x60] sm:$0xff]  ;;  %v4686_v36 = vpack.c.bf16 %v2394_v26, %v2387_v16  ;;  %v2194_v61 = vld [vmem:[%s8179_s8 + $0x98] sm:$0xff] }
 0x450   : > { %v7357_v28 = vmax.f32 %v2135_v42, 0.0  ;;  %v2138_v2 = vpop.f32.mrb[62].mxu1  ;;  %4679 = vmatpush1.bf16.msra.mxu1 %v4678_v41  ;;  %v2180_v41 = vld [vmem:[%s8179_s8 + $0x28] sm:$0xff]  ;;  %v2215_v16 = vld [vmem:[%s8179_s8 + $0x140] sm:$0xff] }
 0x451   : > { %v2139_v9 = vadd.f32 %v2138_v2, %v1931_v51  ;;  %v2140_v62 = vpop.f32.mrb[63].mxu1  ;;  %4681 = vmatprep.subr.bf16.mxu1 %v4680_v23  ;;  %v4688_v42 = vpack.c.bf16 %v2187_v56, %v2180_v41  ;;  %v2179_v51 = vld [vmem:[%s8179_s8 + $0x20] sm:$0xff]  ;;  %v2214_v56 = vld [vmem:[%s8179_s8 + $0x138] sm:$0xff] }
 0x452   : > { %v2141_v35 = vadd.f32 %v2140_v62, %v1932_v55  ;;  %2584 = vmatprep.mubr.f32.mxu1 %v7357_v28  ;;  %v2201_v55 = vld [vmem:[%s8179_s8 + $0xd0] sm:$0xff]  ;;  %v4690_v2 = vpack.c.bf16 %v2186_v58, %v2179_v51  ;;  %v2200_v62 = vld [vmem:[%s8179_s8 + $0xc8] sm:$0xff]  ;;  %v2207_v41 = vld [vmem:[%s8179_s8 + $0x100] sm:$0xff] }
 0x453   : > { %2585 = vmatmul.mubr.f32.gmra.mrb[92].mxu1 %v7359_v12  ;;  %v7377_v37 = vmax.f32 %v2139_v9, 0.0  ;;  %v2193_v9 = vld [vmem:[%s8179_s8 + $0x90] sm:$0xff]  ;;  %v4698_v51 = vpack.c.bf16 %v2214_v56, %v2207_v41 }
 0x454   : > { %v7375_v23 = vmax.f32 %v2141_v35, 0.0  ;;  %4683 = vmatpush1.bf16.msra.mxu1 %v4682_v31  ;;  %v4692_v31 = vpack.c.bf16 %v2201_v55, %v2194_v61  ;;  %v4694_v26 = vpack.c.bf16 %v2200_v62, %v2193_v9  ;;  %v2221_v61 = vld [vmem:[%s8179_s8 + $0x170] sm:$0xff]  ;;  %v2228_v55 = vld [vmem:[%s8179_s8 + $0x1a8] sm:$0xff] }
 0x455   : > { %4685 = vmatprep.subr.bf16.mxu1 %v4684_v39  ;;  %v2208_v39 = vld [vmem:[%s8179_s8 + $0x108] sm:$0xff]  ;;  %v4702_v9 = vpack.c.bf16 %v2228_v55, %v2221_v61 }
 0x456   : > { %2590 = vmatprep.mubr.f32.mxu1 %v7375_v23  ;;  %v4696_v35 = vpack.c.bf16 %v2215_v16, %v2208_v39  ;;  %v2235_v39 = vld [vmem:[%s8179_s8 + $0x1e0] sm:$0xff]  ;;  %v2242_v16 = vld [vmem:[%s8179_s8 + $0x218] sm:$0xff] }
 0x457   : > { %2591 = vmatmul.mubr.f32.gmra.mrb[94].mxu1 %v7377_v37  ;;  %v4706_v41 = vpack.c.bf16 %v2242_v16, %v2235_v39 }
 0x458   : > { %4687 = vmatpush1.bf16.msra.mxu1 %v4686_v36  ;;  %2661 = vmatprep.mubr.f32.mxu1 %v7053_v8  ;;  %v2222_v36 = vld [vmem:[%s8179_s8 + $0x178] sm:$0xff] }
 0x459   : > { %4689 = vmatprep.subr.bf16.mxu1 %v4688_v42  ;;  %v2229_v42 = vld [vmem:[%s8179_s8 + $0x1b0] sm:$0xff] }
 0x45a   : > { %v4700_v58 = vpack.c.bf16 %v2229_v42, %v2222_v36  ;;  %v2249_v36 = vld [vmem:[%s8179_s8 + $0x250] sm:$0xff]  ;;  %v2256_v42 = vld [vmem:[%s8179_s8 + $0x288] sm:$0xff] }
 0x45b   : > { %2662 = vmatmul.mubr.f32.vlgmr.msra.gmra.mrb[96].mxu1 %v7055_v10  ;;  %v4710_v61 = vpack.c.bf16 %v2256_v42, %v2249_v36 }
 0x45c   : > { %2667 = vmatprep.mubr.f32.mxu1 %v7075_v29  ;;  %4691 = vmatpush1.bf16.msra.mxu1 %v4690_v2  ;;  %v2236_v2 = vld [vmem:[%s8179_s8 + $0x1e8] sm:$0xff] }
 0x45d   : > { %4693 = vmatprep.subr.bf16.mxu1 %v4692_v31  ;;  %v2243_v31 = vld [vmem:[%s8179_s8 + $0x220] sm:$0xff] }
 0x45e   : > { %v4704_v62 = vpack.c.bf16 %v2243_v31, %v2236_v2  ;;  %v2263_v2 = vld [vmem:[%s8179_s8 + $0x2c0] sm:$0xff]  ;;  %v2270_v31 = vld [vmem:[%s8179_s8 + $0x2f8] sm:$0xff] }
 0x45f   : > { %2668 = vmatmul.mubr.f32.gmra.mrb[98].mxu1 %v7077_v47  ;;  %v4714_v39 = vpack.c.bf16 %v2270_v31, %v2263_v2 }
 0x460   : > { %2673 = vmatprep.mubr.f32.mxu1 %v7097_v44  ;;  %4695 = vmatpush1.bf16.msra.mxu1 %v4694_v26  ;;  %v2250_v26 = vld [vmem:[%s8179_s8 + $0x258] sm:$0xff] }
 0x461   : > { %4697 = vmatprep.subr.bf16.mxu1 %v4696_v35  ;;  %v2257_v35 = vld [vmem:[%s8179_s8 + $0x290] sm:$0xff] }
 0x462   : > { %v4708_v56 = vpack.c.bf16 %v2257_v35, %v2250_v26  ;;  %v2277_v26 = vld [vmem:[%s8179_s8 + $0x330] sm:$0xff]  ;;  %v2284_v35 = vld [vmem:[%s8179_s8 + $0x368] sm:$0xff] }
 0x463   : > { %2674 = vmatmul.mubr.f32.gmra.mrb[100].mxu1 %v7099_v50  ;;  %v4718_v36 = vpack.c.bf16 %v2284_v35, %v2277_v26 }
 0x464   : > { %2679 = vmatprep.mubr.f32.mxu1 %v7119_v3  ;;  %4699 = vmatpush1.bf16.msra.mxu1 %v4698_v51  ;;  %v2264_v51 = vld [vmem:[%s8179_s8 + $0x2c8] sm:$0xff] }
 0x465   : > { %4701 = vmatprep.subr.bf16.mxu1 %v4700_v58  ;;  %v2271_v58 = vld [vmem:[%s8179_s8 + $0x300] sm:$0xff] }
 0x466   : > { %v4712_v55 = vpack.c.bf16 %v2271_v58, %v2264_v51  ;;  %v2291_v51 = vld [vmem:[%s8179_s8 + $0x3a0] sm:$0xff]  ;;  %v2298_v58 = vld [vmem:[%s8179_s8 + $0x3d8] sm:$0xff] }
 0x467   : > { %2680 = vmatmul.mubr.f32.gmra.mrb[102].mxu1 %v7121_v6  ;;  %v4722_v2 = vpack.c.bf16 %v2298_v58, %v2291_v51 }
 0x468   : > { %2685 = vmatprep.mubr.f32.mxu1 %v7141_v20  ;;  %4703 = vmatpush1.bf16.msra.mxu1 %v4702_v9  ;;  %v2278_v9 = vld [vmem:[%s8179_s8 + $0x338] sm:$0xff] }
 0x469   : > { %4705 = vmatprep.subr.bf16.mxu1 %v4704_v62  ;;  %v2285_v62 = vld [vmem:[%s8179_s8 + $0x370] sm:$0xff] }
 0x46a   : > { %v4716_v16 = vpack.c.bf16 %v2285_v62, %v2278_v9  ;;  %v2305_v9 = vld [vmem:[%s8179_s8 + $0x410] sm:$0xff]  ;;  %v2312_v62 = vld [vmem:[%s8179_s8 + $0x448] sm:$0xff] }
 0x46b   : > { %2686 = vmatmul.mubr.f32.gmra.mrb[104].mxu1 %v7143_v5  ;;  %v4726_v26 = vpack.c.bf16 %v2312_v62, %v2305_v9 }
 0x46c   : > { %2691 = vmatprep.mubr.f32.mxu1 %v7163_v13  ;;  %4707 = vmatpush1.bf16.msra.mxu1 %v4706_v41  ;;  %v2292_v41 = vld [vmem:[%s8179_s8 + $0x3a8] sm:$0xff] }
 0x46d   : > { %4709 = vmatprep.subr.bf16.mxu1 %v4708_v56  ;;  %v2299_v56 = vld [vmem:[%s8179_s8 + $0x3e0] sm:$0xff] }
 0x46e   : > { %v4720_v42 = vpack.c.bf16 %v2299_v56, %v2292_v41  ;;  %v2319_v41 = vld [vmem:[%s8179_s8 + $0x480] sm:$0xff]  ;;  %v2326_v56 = vld [vmem:[%s8179_s8 + $0x4b8] sm:$0xff] }
 0x46f   : > { %2692 = vmatmul.mubr.f32.gmra.mrb[106].mxu1 %v7165_v45  ;;  %v4730_v51 = vpack.c.bf16 %v2326_v56, %v2319_v41 }
 0x470   : > { %2697 = vmatprep.mubr.f32.mxu1 %v7185_v4  ;;  %4711 = vmatpush1.bf16.msra.mxu1 %v4710_v61  ;;  %v2306_v61 = vld [vmem:[%s8179_s8 + $0x418] sm:$0xff] }
 0x471   : > { %4713 = vmatprep.subr.bf16.mxu1 %v4712_v55  ;;  %v2313_v55 = vld [vmem:[%s8179_s8 + $0x450] sm:$0xff] }
 0x472   : > { %v4724_v31 = vpack.c.bf16 %v2313_v55, %v2306_v61  ;;  %v2333_v61 = vld [vmem:[%s8179_s8 + $0x4f0] sm:$0xff]  ;;  %v2340_v55 = vld [vmem:[%s8179_s8 + $0x528] sm:$0xff] }
 0x473   : > { %2698 = vmatmul.mubr.f32.gmra.mrb[108].mxu1 %v7187_v7  ;;  %v4734_v9 = vpack.c.bf16 %v2340_v55, %v2333_v61 }
 0x474   : > { %2703 = vmatprep.mubr.f32.mxu1 %v7207_v15  ;;  %4715 = vmatpush1.bf16.msra.mxu1 %v4714_v39  ;;  %v2320_v39 = vld [vmem:[%s8179_s8 + $0x488] sm:$0xff] }
 0x475   : > { %4717 = vmatprep.subr.bf16.mxu1 %v4716_v16  ;;  %v2327_v16 = vld [vmem:[%s8179_s8 + $0x4c0] sm:$0xff] }
 0x476   : > { %v4728_v35 = vpack.c.bf16 %v2327_v16, %v2320_v39  ;;  %v2347_v39 = vld [vmem:[%s8179_s8 + $0x560] sm:$0xff]  ;;  %v2354_v16 = vld [vmem:[%s8179_s8 + $0x598] sm:$0xff] }
 0x477   : > { %2704 = vmatmul.mubr.f32.gmra.mrb[110].mxu1 %v7209_v33  ;;  %v4738_v41 = vpack.c.bf16 %v2354_v16, %v2347_v39 }
 0x478   : > { %2709 = vmatprep.mubr.f32.mxu1 %v7229_v22  ;;  %4719 = vmatpush1.bf16.msra.mxu1 %v4718_v36  ;;  %v2334_v36 = vld [vmem:[%s8179_s8 + $0x4f8] sm:$0xff] }
 0x479   : > { %4721 = vmatprep.subr.bf16.mxu1 %v4720_v42  ;;  %v2341_v42 = vld [vmem:[%s8179_s8 + $0x530] sm:$0xff] }
 0x47a   : > { %v4732_v58 = vpack.c.bf16 %v2341_v42, %v2334_v36  ;;  %v2361_v36 = vld [vmem:[%s8179_s8 + $0x5d0] sm:$0xff]  ;;  %v2368_v42 = vld [vmem:[%s8179_s8 + $0x608] sm:$0xff] }
 0x47b   : > { %2710 = vmatmul.mubr.f32.gmra.mrb[112].mxu1 %v7231_v60  ;;  %v4742_v61 = vpack.c.bf16 %v2368_v42, %v2361_v36 }
 0x47c   : > { %2715 = vmatprep.mubr.f32.mxu1 %v7251_v11  ;;  %4723 = vmatpush1.bf16.msra.mxu1 %v4722_v2  ;;  %v2348_v2 = vld [vmem:[%s8179_s8 + $0x568] sm:$0xff] }
 0x47d   : > { %4725 = vmatprep.subr.bf16.mxu1 %v4724_v31  ;;  %v2355_v31 = vld [vmem:[%s8179_s8 + $0x5a0] sm:$0xff] }
 0x47e   : > { %v4736_v62 = vpack.c.bf16 %v2355_v31, %v2348_v2  ;;  %v2375_v2 = vld [vmem:[%s8179_s8 + $0x640] sm:$0xff]  ;;  %v2382_v31 = vld [vmem:[%s8179_s8 + $0x678] sm:$0xff] }
 0x47f   : > { %2716 = vmatmul.mubr.f32.gmra.mrb[114].mxu1 %v7253_v19  ;;  %v4746_v39 = vpack.c.bf16 %v2382_v31, %v2375_v2 }
 0x480   : > { %2721 = vmatprep.mubr.f32.mxu1 %v7273_v43  ;;  %4727 = vmatpush1.bf16.msra.mxu1 %v4726_v26  ;;  %v2362_v26 = vld [vmem:[%s8179_s8 + $0x5d8] sm:$0xff] }
 0x481   : > { %4729 = vmatprep.subr.bf16.mxu1 %v4728_v35  ;;  %v2369_v35 = vld [vmem:[%s8179_s8 + $0x610] sm:$0xff] }
 0x482   : > { %v4740_v56 = vpack.c.bf16 %v2369_v35, %v2362_v26  ;;  %v2389_v26 = vld [vmem:[%s8179_s8 + $0x6b0] sm:$0xff]  ;;  %v2396_v35 = vld [vmem:[%s8179_s8 + $0x6e8] sm:$0xff] }
 0x483   : > { %2722 = vmatmul.mubr.f32.gmra.mrb[116].mxu1 %v7275_v53 }
 0x484   : > { %2727 = vmatprep.mubr.f32.mxu1 %v7295_v34  ;;  %4731 = vmatpush1.bf16.msra.mxu1 %v4730_v51  ;;  %v2376_v51 = vld [vmem:[%s8179_s8 + $0x648] sm:$0xff] }
 0x485   : > { %4733 = vmatprep.subr.bf16.mxu1 %v4732_v58  ;;  %v2383_v58 = vld [vmem:[%s8179_s8 + $0x680] sm:$0xff] }
 0x486   : > { %v4744_v55 = vpack.c.bf16 %v2383_v58, %v2376_v51 }
 0x487   : > { %2728 = vmatmul.mubr.f32.gmra.mrb[118].mxu1 %v7297_v17 }
 0x488   : > { %2733 = vmatprep.mubr.f32.mxu1 %v7317_v48  ;;  %4735 = vmatpush1.bf16.msra.mxu1 %v4734_v9  ;;  %v2390_v9 = vld [vmem:[%s8179_s8 + $0x6b8] sm:$0xff] }
 0x489   : > { %4737 = vmatprep.subr.bf16.mxu1 %v4736_v62  ;;  %v2397_v62 = vld [vmem:[%s8179_s8 + $0x6f0] sm:$0xff] }
 0x48a   : > { %v4748_v16 = vpack.c.bf16 %v2397_v62, %v2390_v9 }
 0x48b   : > { %2734 = vmatmul.mubr.f32.gmra.mrb[120].mxu1 %v7319_v59 }
 0x48c   : > { %2739 = vmatprep.mubr.f32.mxu1 %v7337_v25  ;;  %4739 = vmatpush1.bf16.msra.mxu1 %v4738_v41  ;;  %v4750_v41 = vpack.c.bf16 %v2396_v35, %v2389_v26 }
 0x48d   : > { %4741 = vmatprep.subr.bf16.mxu1 %v4740_v56 }
 0x48f   : > { %2740 = vmatmul.mubr.f32.gmra.mrb[122].mxu1 %v7339_v30 }
 0x490   : > { %2745 = vmatprep.mubr.f32.mxu1 %v7357_v28  ;;  %4743 = vmatpush1.bf16.msra.mxu1 %v4742_v61 }
 0x491   : > { %4745 = vmatprep.subr.bf16.mxu1 %v4744_v55 }
 0x493   : > { %2746 = vmatmul.mubr.f32.gmra.mrb[124].mxu1 %v7359_v12 }
 0x494   : > { %2751 = vmatprep.mubr.f32.mxu1 %v7375_v23  ;;  %4747 = vmatpush1.bf16.msra.mxu1 %v4746_v39 }
 0x495   : > { %4749 = vmatprep.subr.bf16.mxu1 %v4748_v16 }
 0x497   : > { %2752 = vmatmul.mubr.f32.gmra.mrb[126].mxu1 %v7377_v37 }
 0x498   : > { %4751 = vmatpush1.bf16.msra.mxu1 %v4750_v41  ;;  %2822 = vmatprep.mubr.f32.mxu1 %v7053_v8 }
 0x499   : > { %4784 = vmatprep.subr.bf16.mxu1 %v6630_v14  ;;  %v2401_v14 = vlaneseq }
 0x49b   : > { %2823 = vmatmul.mubr.f32.vlgmr.msra.gmra.mrb[128].mxu1 %v7055_v10 }
 0x49c   : > { %2828 = vmatprep.mubr.f32.mxu1 %v7075_v29  ;;  %4792 = vmatpush3.bf16.msra.mxu1 %v6639_v18  ;;  %v7653_v18 = vshrl.u32 %v2401_v14, 7 }
 0x49d   : > { %4785 = vmatprep.subr.bf16.mxu1 %v6647_v24 }
 0x49e   : > { %v2403_v24 = vsub.s32 0, %v7653_v18 }
 0x49f   : > { %2829 = vmatmul.mubr.f32.gmra.mrb[130].mxu1 %v7077_v47 }
 0x4a0   : > { %2834 = vmatprep.mubr.f32.mxu1 %v7097_v44  ;;  %4793 = vmatpush3.bf16.msra.mxu1 %v6656_v27  ;;  %v7661_v27 = vld [vmem:[%s8180_s9] sm:$0xff] }
 0x4a1   : > { %4786 = vmatprep.subr.bf16.mxu1 %v6665_v32  ;;  %v2407_v32 = vsub.s32 1, %v7653_v18 }
 0x4a3   : > { %2835 = vmatmul.mubr.f32.gmra.mrb[132].mxu1 %v7099_v50 }
 0x4a4   : > { %2840 = vmatprep.mubr.f32.mxu1 %v7119_v3  ;;  %4794 = vmatpush3.bf16.msra.mxu1 %v6680_v38  ;;  %v2427_v38 = vsub.s32 6, %v7653_v18 }
 0x4a5   : > { %4787 = vmatprep.subr.bf16.mxu1 %v6683_v40  ;;  %v7666_v40 = vrot.slane %v7661_v27, %v2403_v24 }
 0x4a7   : > { %2841 = vmatmul.mubr.f32.gmra.mrb[134].mxu1 %v7121_v6 }
 0x4a8   : > { %2846 = vmatprep.mubr.f32.mxu1 %v7141_v20  ;;  %4795 = vmatpush3.bf16.msra.mxu1 %v6698_v46  ;;  %v7669_v46 = vrot.slane %v7661_v27, %v2407_v32 }
 0x4a9   : > { %4788 = vmatprep.subr.bf16.mxu1 %v6701_v49 }
 0x4ab   : > { %2847 = vmatmul.mubr.f32.gmra.mrb[136].mxu1 %v7143_v5 }
 0x4ac   : > { %2852 = vmatprep.mubr.f32.mxu1 %v7163_v13  ;;  %4796 = vmatpush3.bf16.msra.mxu1 %v6716_v54 }
 0x4ad   : > { %4789 = vmatprep.subr.bf16.mxu1 %v6719_v57  ;;  %v7672_v57 = vrot.slane %v7661_v27, %v2427_v38 }
 0x4af   : > { %2853 = vmatmul.mubr.f32.gmra.mrb[138].mxu1 %v7165_v45 }
 0x4b0   : > { %2858 = vmatprep.mubr.f32.mxu1 %v7185_v4  ;;  %4797 = vmatpush3.bf16.msra.mxu1 %v6734_v63 }
 0x4b1   : > { %4790 = vmatprep.subr.bf16.mxu1 %v6737_v1 }
 0x4b3   : > { %2859 = vmatmul.mubr.f32.gmra.mrb[140].mxu1 %v7187_v7 }
 0x4b4   : > { %2864 = vmatprep.mubr.f32.mxu1 %v7207_v15  ;;  %4798 = vmatpush3.bf16.msra.mxu1 %v6991_v0 }
 0x4b5   : > { %4791 = vmatprep.subr.bf16.mxu1 %v7009_v21 }
 0x4b7   : > { %2865 = vmatmul.mubr.f32.gmra.mrb[142].mxu1 %v7209_v33 }
 0x4b8   : > { %2870 = vmatprep.mubr.f32.mxu1 %v7229_v22  ;;  %4799 = vmatpush3.bf16.msra.mxu1 %v7020_v52 }
 0x4bb   : > { %2871 = vmatmul.mubr.f32.gmra.mrb[144].mxu1 %v7231_v60 }
 0x4bc   : > { %2876 = vmatprep.mubr.f32.mxu1 %v7251_v11 }
 0x4bf   : > { %2877 = vmatmul.mubr.f32.gmra.mrb[146].mxu1 %v7253_v19 }
 0x4c0   : > { %2882 = vmatprep.mubr.f32.mxu1 %v7273_v43 }
 0x4c3   : > { %2883 = vmatmul.mubr.f32.gmra.mrb[148].mxu1 %v7275_v53 }
 0x4c4   : > { %2888 = vmatprep.mubr.f32.mxu1 %v7295_v34 }
 0x4c7   : > { %2889 = vmatmul.mubr.f32.gmra.mrb[150].mxu1 %v7297_v17 }
 0x4c8   : > { %2894 = vmatprep.mubr.f32.mxu1 %v7317_v48 }
 0x4cb   : > { %2895 = vmatmul.mubr.f32.gmra.mrb[152].mxu1 %v7319_v59 }
 0x4cc   : > { %2900 = vmatprep.mubr.f32.mxu1 %v7337_v25 }
 0x4cf   : > { %2901 = vmatmul.mubr.f32.gmra.mrb[154].mxu1 %v7339_v30 }
 0x4d0   : > { %2906 = vmatprep.mubr.f32.mxu1 %v7357_v28 }
 0x4d3   : > { %2907 = vmatmul.mubr.f32.gmra.mrb[156].mxu1 %v7359_v12 }
 0x4d4   : > { %2912 = vmatprep.mubr.f32.mxu1 %v7375_v23 }
 0x4d7   : > { %2913 = vmatmul.mubr.f32.gmra.mrb[158].mxu1 %v7377_v37 }
 0x4d8   : > { %3043 = vmatprep.mubr.f32.mxu1 %v7317_v48 }
 0x4db   : > { %3044 = vmatmul.mubr.f32.vlgmr.msra.gmra.mrb[160].mxu1 %v7319_v59 }
 0x4dc   : > { %3048 = vmatprep.mubr.f32.mxu1 %v7337_v25 }
 0x4df   : > { %3049 = vmatmul.mubr.f32.gmra.mrb[162].mxu1 %v7339_v30 }
 0x4e0   : > { %3053 = vmatprep.mubr.f32.mxu1 %v7357_v28 }
 0x4e3   : > { %3054 = vmatmul.mubr.f32.gmra.mrb[164].mxu1 %v7359_v12 }
 0x4e4   : > { %3058 = vmatprep.mubr.f32.mxu1 %v7375_v23 }
 0x4e7   : > { %3059 = vmatmul.mubr.f32.gmra.mrb[166].mxu1 %v7377_v37 }
 0x4ee   : > { %v2502_v49 = vpop.f32.mrb[64].mxu1  ;;  %v4240_v54 = vpop.f32.mrb[32].mxu0 }
 0x4ef   : > { %v2503_v63 = vadd.f32 %v2502_v49, %v7666_v40  ;;  %v2504_v1 = vpop.f32.mrb[65].mxu1  ;;  %v4241_v0 = vpop.f32.mrb[33].mxu0 }
 0x4f0   : > { %v2505_v21 = vadd.f32 %v2504_v1, %v7669_v46  ;;  %v4242_v52 = vadd.f32 %v4241_v0, %v4240_v54 }
 0x4f1   : > { %v4012_v8 = vmul.f32 -1.442695, %v2503_v63 }
 0x4f2   : > { %v4013_v10 = vmul.f32 -1.442695, %v2505_v21  ;;  %v2986_v29 = vadd.f32 %v4242_v52, %v7672_v57  ;;  %v2508_v47 = vpop.f32.mrb[66].mxu1  ;;  %v4243_v44 = vpop.f32.mrb[34].mxu0 }
 0x4f3   : > { %4971 = vpow2.f32 %v4012_v8  ;;  %v2509_v50 = vadd.f32 %v2508_v47, %v7666_v40  ;;  %v2510_v3 = vpop.f32.mrb[67].mxu1  ;;  %v4244_v6 = vpop.f32.mrb[35].mxu0 }
 0x4f4   : > { %4973 = vpow2.f32 %v4013_v10  ;;  %v4018_v20 = vmul.f32 -1.442695, %v2986_v29  ;;  %v2511_v5 = vadd.f32 %v2510_v3, %v7669_v46  ;;  %v4245_v13 = vadd.f32 %v4244_v6, %v4243_v44 }
 0x4f5   : > { %v4019_v45 = vmul.f32 -1.442695, %v2509_v50 }
 0x4f6   : > { %4975 = vpow2.f32 %v4018_v20  ;;  %v4020_v4 = vmul.f32 -1.442695, %v2511_v5  ;;  %v2991_v7 = vadd.f32 %v4245_v13, %v7672_v57  ;;  %v2514_v15 = vpop.f32.mrb[68].mxu1  ;;  %v4246_v33 = vpop.f32.mrb[36].mxu0 }
 0x4f7   : > { %4977 = vpow2.f32 %v4019_v45  ;;  %v2515_v22 = vadd.f32 %v2514_v15, %v7666_v40  ;;  %v2516_v60 = vpop.f32.mrb[69].mxu1  ;;  %v4247_v11 = vpop.f32.mrb[37].mxu0 }
 0x4f8   : > { %4979 = vpow2.f32 %v4020_v4  ;;  %v4025_v19 = vmul.f32 -1.442695, %v2991_v7  ;;  %v2517_v43 = vadd.f32 %v2516_v60, %v7669_v46  ;;  %v4248_v53 = vadd.f32 %v4247_v11, %v4246_v33 }
 0x4f9   : > { %v4026_v34 = vmul.f32 -1.442695, %v2515_v22 }
 0x4fa   : > { %4981 = vpow2.f32 %v4025_v19  ;;  %v4027_v17 = vmul.f32 -1.442695, %v2517_v43  ;;  %v2996_v48 = vadd.f32 %v4248_v53, %v7672_v57  ;;  %v2520_v59 = vpop.f32.mrb[70].mxu1  ;;  %v4249_v25 = vpop.f32.mrb[38].mxu0 }
 0x4fb   : > { %4983 = vpow2.f32 %v4026_v34  ;;  %v2521_v30 = vadd.f32 %v2520_v59, %v7666_v40  ;;  %v2522_v28 = vpop.f32.mrb[71].mxu1  ;;  %v4250_v12 = vpop.f32.mrb[39].mxu0 }
 0x4fc   : > { %4985 = vpow2.f32 %v4027_v17  ;;  %v4032_v23 = vmul.f32 -1.442695, %v2996_v48  ;;  %v2523_v37 = vadd.f32 %v2522_v28, %v7669_v46  ;;  %v4251_v56 = vadd.f32 %v4250_v12, %v4249_v25 }
 0x4fd   : > { %v4972_v36 = vpop.eup %4971  ;;  %v4033_v42 = vmul.f32 -1.442695, %v2521_v30 }
 0x4fe   : > { %v4974_v51 = vpop.eup %4973  ;;  %v3400_v58 = vadd.f32 1.0, %v4972_v36  ;;  %4987 = vpow2.f32 %v4032_v23  ;;  %v4034_v61 = vmul.f32 -1.442695, %v2523_v37  ;;  %v3001_v55 = vadd.f32 %v4251_v56, %v7672_v57  ;;  %v2526_v2 = vpop.f32.mrb[72].mxu1 }
 0x4ff   : > { %v4252_v31 = vpop.f32.mrb[40].mxu0  ;;  %v3401_v9 = vadd.f32 1.0, %v4974_v51  ;;  %4989 = vpow2.f32 %v4033_v42  ;;  %v2528_v62 = vpop.f32.mrb[73].mxu1  ;;  %v2527_v38 = vadd.f32 %v2526_v2, %v7666_v40 }
 0x500   : > { %v4253_v39 = vpop.f32.mrb[41].mxu0  ;;  %v4976_v16 = vpop.eup %4975  ;;  %4991 = vrcp.f32 %v3400_v58  ;;  %v4039_v32 = vmul.f32 -1.442695, %v3001_v55  ;;  %v2529_v29 = vadd.f32 %v2528_v62, %v7669_v46 }
 0x501   : > { %v4254_v26 = vadd.f32 %v4253_v39, %v4252_v31  ;;  %v4978_v35 = vpop.eup %4977  ;;  %4993 = vrcp.f32 %v3401_v9  ;;  %v3406_v41 = vadd.f32 1.0, %v4976_v16  ;;  %v4040_v50 = vmul.f32 -1.442695, %v2527_v38 }
 0x502   : > { %v4980_v14 = vpop.eup %4979  ;;  %v3407_v24 = vadd.f32 1.0, %v4978_v35  ;;  %4995 = vpow2.f32 %v4034_v61  ;;  %v2532_v49 = vpop.f32.mrb[74].mxu1  ;;  %v4041_v60 = vmul.f32 -1.442695, %v2529_v29 }
 0x503   : > { %v4255_v54 = vpop.f32.mrb[42].mxu0  ;;  %4997 = vrcp.f32 %v3406_v41  ;;  %v3408_v63 = vadd.f32 1.0, %v4980_v14  ;;  %v2534_v1 = vpop.f32.mrb[75].mxu1  ;;  %v3006_v3 = vadd.f32 %v4254_v26, %v7672_v57  ;;  %v2533_v7 = vadd.f32 %v2532_v49, %v7666_v40 }
 0x504   : > { %v4256_v0 = vpop.f32.mrb[43].mxu0  ;;  %v4982_v21 = vpop.eup %4981  ;;  %4999 = vrcp.f32 %v3407_v24  ;;  %v2535_v11 = vadd.f32 %v2534_v1, %v7669_v46 }
 0x505   : > { %v4257_v52 = vadd.f32 %v4256_v0, %v4255_v54  ;;  %v4984_v8 = vpop.eup %4983  ;;  %5001 = vrcp.f32 %v3408_v63  ;;  %v3413_v10 = vadd.f32 1.0, %v4982_v21  ;;  %v4046_v53 = vmul.f32 -1.442695, %v3006_v3 }
 0x506   : > { %v4986_v47 = vpop.eup %4985  ;;  %v3414_v44 = vadd.f32 1.0, %v4984_v8  ;;  %5003 = vpow2.f32 %v4039_v32  ;;  %v2538_v6 = vpop.f32.mrb[76].mxu1  ;;  %v4047_v12 = vmul.f32 -1.442695, %v2533_v7  ;;  %v4048_v42 = vmul.f32 -1.442695, %v2535_v11 }
 0x507   : > { %v4258_v20 = vpop.f32.mrb[44].mxu0  ;;  %5005 = vrcp.f32 %v3413_v10  ;;  %v3415_v5 = vadd.f32 1.0, %v4986_v47  ;;  %v2540_v13 = vpop.f32.mrb[77].mxu1  ;;  %v3011_v34 = vadd.f32 %v4257_v52, %v7672_v57  ;;  %v2539_v23 = vadd.f32 %v2538_v6, %v7666_v40 }
 0x508   : > { %v4259_v45 = vpop.f32.mrb[45].mxu0  ;;  %v4988_v4 = vpop.eup %4987  ;;  %5007 = vrcp.f32 %v3414_v44  ;;  %v2541_v51 = vadd.f32 %v2540_v13, %v7669_v46 }
 0x509   : > { %v4260_v15 = vadd.f32 %v4259_v45, %v4258_v20  ;;  %v4990_v33 = vpop.eup %4989  ;;  %5009 = vrcp.f32 %v3415_v5  ;;  %v3420_v22 = vadd.f32 1.0, %v4988_v4  ;;  %v4053_v61 = vmul.f32 -1.442695, %v3011_v34 }
 0x50a   : > { %v4992_v19 = vpop.eup %4991  ;;  %v3421_v43 = vadd.f32 1.0, %v4990_v33  ;;  %5011 = vpow2.f32 %v4040_v50  ;;  %v2544_v17 = vpop.f32.mrb[78].mxu1  ;;  %v4054_v26 = vmul.f32 -1.442695, %v2539_v23  ;;  %v4055_v32 = vmul.f32 -1.442695, %v2541_v51 }
 0x50b   : > { %v4261_v48 = vpop.f32.mrb[46].mxu0  ;;  %v4994_v59 = vpop.eup %4993  ;;  %3736 = vst [vmem:[%s7694_s27] sm:$0xff] %v4992_v19  ;;  %5013 = vrcp.f32 %v3420_v22  ;;  %v3016_v55 = vadd.f32 %v4260_v15, %v7672_v57  ;;  %v2545_v35 = vadd.f32 %v2544_v17, %v7666_v40 }
 0x50c   : > { %v2546_v25 = vpop.f32.mrb[79].mxu1  ;;  %v4262_v30 = vpop.f32.mrb[47].mxu0  ;;  %3737 = vst [vmem:[%s7694_s27 + $0x8] sm:$0xff] %v4994_v59  ;;  %5015 = vrcp.f32 %v3421_v43 }
 0x50d   : > { %v4996_v28 = vpop.eup %4995  ;;  %v4263_v37 = vadd.f32 %v4262_v30, %v4261_v48  ;;  %5017 = vpow2.f32 %v4041_v60  ;;  %v2547_v38 = vadd.f32 %v2546_v25, %v7669_v46  ;;  %v4060_v54 = vmul.f32 -1.442695, %v3016_v55 }
 0x50e   : > { %v4998_v56 = vpop.eup %4997  ;;  %v3422_v36 = vadd.f32 1.0, %v4996_v28  ;;  %5019 = vpow2.f32 %v4046_v53  ;;  %v2550_v2 = vpop.f32.mrb[80].mxu1  ;;  %v4061_v10 = vmul.f32 -1.442695, %v2545_v35 }
 0x50f   : > { %v5000_v58 = vpop.eup %4999  ;;  %3742 = vst [vmem:[%s7694_s27 + $0x30] sm:$0xff] %v4998_v56  ;;  %v4264_v31 = vpop.f32.mrb[48].mxu0  ;;  %v3021_v29 = vadd.f32 %v4263_v37, %v7672_v57  ;;  %v4062_v3 = vmul.f32 -1.442695, %v2547_v38  ;;  %v2551_v22 = vadd.f32 %v2550_v2, %v7666_v40 }
 0x510   : > { %v5002_v9 = vpop.eup %5001  ;;  %3743 = vst [vmem:[%s7694_s27 + $0x38] sm:$0xff] %v5000_v58  ;;  %5021 = vrcp.f32 %v3422_v36  ;;  %v2552_v62 = vpop.f32.mrb[81].mxu1 }
 0x511   : > { %v4265_v39 = vpop.f32.mrb[49].mxu0  ;;  %v5004_v16 = vpop.eup %5003  ;;  %3744 = vst [vmem:[%s7694_s27 + $0x40] sm:$0xff] %v5002_v9  ;;  %5023 = vpow2.f32 %v4047_v12  ;;  %v4067_v33 = vmul.f32 -1.442695, %v3021_v29  ;;  %v2553_v59 = vadd.f32 %v2552_v62, %v7669_v46  ;;  %v4068_v23 = vmul.f32 -1.442695, %v2551_v22 }
 0x512   : > { %v7708_v41 = vadd.f32 %v4265_v39, %v4264_v31  ;;  %v5006_v14 = vpop.eup %5005  ;;  %v3427_v24 = vadd.f32 1.0, %v5004_v16  ;;  %5025 = vpow2.f32 %v4048_v42  ;;  %v2556_v63 = vpop.f32.mrb[82].mxu1 }
 0x513   : > { %v5008_v49 = vpop.eup %5007  ;;  %3749 = vst [vmem:[%s7694_s27 + $0x68] sm:$0xff] %v5006_v14  ;;  %5027 = vpow2.f32 %v4053_v61  ;;  %v4267_v1 = vpop.f32.mrb[50].mxu0  ;;  %v2557_v58 = vadd.f32 %v2556_v63, %v7666_v40  ;;  %v4069_v16 = vmul.f32 -1.442695, %v2553_v59 }
 0x514   : > { %v5010_v0 = vpop.eup %5009  ;;  %3750 = vst [vmem:[%s7694_s27 + $0x70] sm:$0xff] %v5008_v49  ;;  %5029 = vrcp.f32 %v3427_v24  ;;  %v7713_v21 = vpop.f32.mrb[83].mxu1  ;;  %v3026_v51 = vadd.f32 %v7708_v41, %v7672_v57 }
 0x515   : > { %v4268_v52 = vpop.f32.mrb[51].mxu0  ;;  %v5012_v8 = vpop.eup %5011  ;;  %3751 = vst [vmem:[%s7694_s27 + $0x78] sm:$0xff] %v5010_v0  ;;  %5031 = vpow2.f32 %v4054_v26  ;;  %v2559_v38 = vadd.f32 %v7713_v21, %v7669_v46 }
 0x516   : > { %v7717_v47 = vadd.f32 %v4268_v52, %v4267_v1  ;;  %v5014_v44 = vpop.eup %5013  ;;  %v3428_v50 = vadd.f32 1.0, %v5012_v8  ;;  %5033 = vpow2.f32 %v4055_v32  ;;  %v7720_v20 = vpop.f32.mrb[84].mxu1  ;;  %v4074_v24 = vmul.f32 -1.442695, %v3026_v51 }
 0x517   : > { %v5016_v6 = vpop.eup %5015  ;;  %3756 = vst [vmem:[%s7694_s27 + $0xa0] sm:$0xff] %v5014_v44  ;;  %5035 = vpow2.f32 %v4060_v54  ;;  %v4270_v5 = vpop.f32.mrb[52].mxu0  ;;  %v4075_v32 = vmul.f32 -1.442695, %v2557_v58  ;;  %v2563_v29 = vadd.f32 %v7720_v20, %v7666_v40 }
 0x518   : > { %v5018_v13 = vpop.eup %5017  ;;  %3757 = vst [vmem:[%s7694_s27 + $0xa8] sm:$0xff] %v5016_v6  ;;  %5037 = vrcp.f32 %v3428_v50  ;;  %v7723_v45 = vpop.f32.mrb[85].mxu1  ;;  %v3031_v1 = vadd.f32 %v7717_v47, %v7672_v57  ;;  %v4076_v47 = vmul.f32 -1.442695, %v2559_v38 }
 0x519   : > { %v4271_v4 = vpop.f32.mrb[53].mxu0  ;;  %v5020_v7 = vpop.eup %5019  ;;  %v3429_v15 = vadd.f32 1.0, %v5018_v13  ;;  %5039 = vpow2.f32 %v4061_v10  ;;  %v4082_v22 = vmul.f32 -1.442695, %v2563_v29  ;;  %v2411_v29 = vsub.s32 2, %v7653_v18 }
 0x51a   : > { %v5022_v60 = vpop.eup %5021  ;;  %v3434_v11 = vadd.f32 1.0, %v5020_v7  ;;  %5041 = vpow2.f32 %v4062_v3  ;;  %v7726_v19 = vadd.f32 %v4271_v4, %v4270_v5  ;;  %v7729_v53 = vpop.f32.mrb[86].mxu1  ;;  %v2565_v3 = vadd.f32 %v7723_v45, %v7669_v46 }
 0x51b   : > { %v5024_v43 = vpop.eup %5023  ;;  %3758 = vst [vmem:[%s7694_s27 + $0xb0] sm:$0xff] %v5022_v60  ;;  %5043 = vrcp.f32 %v3429_v15  ;;  %v4273_v34 = vpop.f32.mrb[54].mxu0  ;;  %v4081_v4 = vmul.f32 -1.442695, %v3031_v1  ;;  %v2569_v45 = vadd.f32 %v7729_v53, %v7666_v40 }
 0x51c   : > { %v5026_v17 = vpop.eup %5025  ;;  %5045 = vrcp.f32 %v3434_v11  ;;  %v3435_v48 = vadd.f32 1.0, %v5024_v43  ;;  %v7732_v25 = vpop.f32.mrb[87].mxu1  ;;  %v3036_v6 = vadd.f32 %v7726_v19, %v7672_v57  ;;  %v4083_v43 = vmul.f32 -1.442695, %v2565_v3 }
 0x51d   : > { %v4274_v30 = vpop.f32.mrb[55].mxu0  ;;  %v5028_v28 = vpop.eup %5027  ;;  %v3436_v12 = vadd.f32 1.0, %v5026_v17  ;;  %5047 = vpow2.f32 %v4067_v33  ;;  %v2571_v17 = vadd.f32 %v7732_v25, %v7669_v46 }
 0x51e   : > { %v7734_v37 = vadd.f32 %v4274_v30, %v4273_v34  ;;  %v5030_v56 = vpop.eup %5029  ;;  %5049 = vrcp.f32 %v3435_v48  ;;  %v3441_v36 = vadd.f32 1.0, %v5028_v28  ;;  %v2574_v61 = vpop.f32.mrb[88].mxu1  ;;  %v4088_v34 = vmul.f32 -1.442695, %v3036_v6 }
 0x51f   : > { %v5032_v42 = vpop.eup %5031  ;;  %3763 = vst [vmem:[%s7694_s27 + $0xd8] sm:$0xff] %v5030_v56  ;;  %5051 = vrcp.f32 %v3436_v12  ;;  %v7741_v31 = vadd.f32 %v2574_v61, %v7666_v40  ;;  %v2576_v9 = vpop.f32.mrb[89].mxu1  ;;  %v4089_v56 = vmul.f32 -1.442695, %v2569_v45 }
 0x520   : > { %v5034_v55 = vpop.eup %5033  ;;  %5053 = vrcp.f32 %v3441_v36  ;;  %v3442_v2 = vadd.f32 1.0, %v5032_v42  ;;  %v7744_v26 = vadd.f32 %v2576_v9, %v7669_v46  ;;  %v3041_v30 = vadd.f32 %v7734_v37, %v7672_v57 }
 0x521   : > { %v5036_v62 = vpop.eup %5035  ;;  %v3443_v39 = vadd.f32 1.0, %v5034_v55  ;;  %5055 = vpow2.f32 %v4068_v23  ;;  %v4090_v37 = vmul.f32 -1.442695, %v2571_v17 }
 0x522   : > { %v5038_v35 = vpop.eup %5037  ;;  %5057 = vrcp.f32 %v3442_v2  ;;  %v3448_v41 = vadd.f32 1.0, %v5036_v62  ;;  %v2580_v49 = vpop.f32.mrb[90].mxu1  ;;  %v4095_v61 = vmul.f32 -1.442695, %v3041_v30 }
 0x523   : > { %v5040_v14 = vpop.eup %5039  ;;  %3764 = vst [vmem:[%s7694_s27 + $0xe0] sm:$0xff] %v5038_v35  ;;  %5059 = vrcp.f32 %v3443_v39  ;;  %v7752_v0 = vadd.f32 %v2580_v49, %v7666_v40  ;;  %v2582_v52 = vpop.f32.mrb[91].mxu1  ;;  %v4096_v39 = vmul.f32 -1.442695, %v7741_v31 }
 0x524   : > { %v5042_v54 = vpop.eup %5041  ;;  %5061 = vrcp.f32 %v3448_v41  ;;  %v3449_v63 = vadd.f32 1.0, %v5040_v14  ;;  %v7757_v21 = vadd.f32 %v2582_v52, %v7669_v46 }
 0x525   : > { %v5044_v8 = vpop.eup %5043  ;;  %v3450_v10 = vadd.f32 1.0, %v5042_v54  ;;  %5063 = vpow2.f32 %v4069_v16  ;;  %v4103_v6 = vmul.f32 -1.442695, %v7752_v0 }
 0x526   : > { %v5046_v44 = vpop.eup %5045  ;;  %3765 = vst [vmem:[%s7694_s27 + $0xe8] sm:$0xff] %v5044_v8  ;;  %5065 = vrcp.f32 %v3449_v63  ;;  %v2586_v5 = vpop.f32.mrb[92].mxu1  ;;  %v4097_v63 = vmul.f32 -1.442695, %v7744_v26  ;;  %v4104_v0 = vmul.f32 -1.442695, %v7757_v21 }
 0x527   : > { %v5048_v50 = vpop.eup %5047  ;;  %3770 = vst [vmem:[%s7694_s27 + $0x110] sm:$0xff] %v5046_v44  ;;  %5067 = vrcp.f32 %v3450_v10  ;;  %v7766_v7 = vadd.f32 %v2586_v5, %v7666_v40  ;;  %v2588_v15 = vpop.f32.mrb[93].mxu1 }
 0x528   : > { %v5050_v20 = vpop.eup %5049  ;;  %v3455_v13 = vadd.f32 1.0, %v5048_v50  ;;  %5069 = vpow2.f32 %v4074_v24  ;;  %v7772_v60 = vadd.f32 %v2588_v15, %v7669_v46 }
 0x529   : > { %v5052_v33 = vpop.eup %5051  ;;  %3771 = vst [vmem:[%s7694_s27 + $0x118] sm:$0xff] %v5050_v20  ;;  %5071 = vpow2.f32 %v4075_v32 }
 0x52a   : > { %v5054_v11 = vpop.eup %5053  ;;  %3772 = vst [vmem:[%s7694_s27 + $0x120] sm:$0xff] %v5052_v33  ;;  %5073 = vrcp.f32 %v3455_v13  ;;  %v2592_v48 = vpop.f32.mrb[94].mxu1  ;;  %v7816_v33 = vrot.slane %v7661_v27, %v2411_v29 }
 0x52b   : > { %v5056_v19 = vpop.eup %5055  ;;  %3777 = vst [vmem:[%s7694_s27 + $0x148] sm:$0xff] %v5054_v11  ;;  %5075 = vpow2.f32 %v4076_v47  ;;  %v7781_v28 = vadd.f32 %v2592_v48, %v7666_v40  ;;  %v2594_v12 = vpop.f32.mrb[95].mxu1  ;;  %v2415_v47 = vsub.s32 3, %v7653_v18 }
 0x52c   : > { %v5058_v59 = vpop.eup %5057  ;;  %v3456_v53 = vadd.f32 1.0, %v5056_v19  ;;  %5077 = vpow2.f32 %v4081_v4  ;;  %v7785_v36 = vadd.f32 %v2594_v12, %v7669_v46 }
 0x52d   : > { %v5060_v23 = vpop.eup %5059  ;;  %3778 = vst [vmem:[%s7694_s27 + $0x150] sm:$0xff] %v5058_v59  ;;  %5079 = vpow2.f32 %v4082_v22  ;;  %v7820_v11 = vrot.slane %v7661_v27, %v2415_v47  ;;  %v4111_v27 = vmul.f32 -1.442695, %v7772_v60  ;;  %v4117_v12 = vmul.f32 -1.442695, %v7781_v28 }
 0x52e   : > { %v5062_v25 = vpop.eup %5061  ;;  %3779 = vst [vmem:[%s7694_s27 + $0x158] sm:$0xff] %v5060_v23  ;;  %5081 = vrcp.f32 %v3456_v53  ;;  %v7789_v51 = vpop.f32.mrb[96].mxu1 }
 0x52f   : > { %v5064_v42 = vpop.eup %5063  ;;  %3784 = vst [vmem:[%s7694_s27 + $0x180] sm:$0xff] %v5062_v25  ;;  %5083 = vpow2.f32 %v4083_v43  ;;  %v7791_v55 = vpop.f32.mrb[97].mxu1  ;;  %v2664_v21 = vadd.f32 %v7789_v51, %v7816_v33  ;;  %v4118_v25 = vmul.f32 -1.442695, %v7785_v36 }
 0x530   : > { %v5066_v40 = vpop.eup %5065  ;;  %v3457_v58 = vadd.f32 1.0, %v5064_v42  ;;  %5085 = vpow2.f32 %v4088_v34  ;;  %v4110_v34 = vmul.f32 -1.442695, %v7766_v7  ;;  %v2666_v23 = vadd.f32 %v7791_v55, %v7820_v11 }
 0x531   : > { %v5068_v2 = vpop.eup %5067  ;;  %3785 = vst [vmem:[%s7694_s27 + $0x188] sm:$0xff] %v5066_v40  ;;  %5087 = vpow2.f32 %v4089_v56  ;;  %v4014_v40 = vmul.f32 -1.442695, %v2664_v21 }
 0x532   : > { %v5070_v46 = vpop.eup %5069  ;;  %3786 = vst [vmem:[%s7694_s27 + $0x190] sm:$0xff] %v5068_v2  ;;  %5089 = vrcp.f32 %v3457_v58  ;;  %v7796_v16 = vpop.f32.mrb[98].mxu1  ;;  %v4015_v55 = vmul.f32 -1.442695, %v2666_v23 }
 0x533   : > { %v5072_v9 = vpop.eup %5071  ;;  %v3462_v62 = vadd.f32 1.0, %v5070_v46  ;;  %5091 = vpow2.f32 %v4090_v37  ;;  %v7798_v14 = vpop.f32.mrb[99].mxu1  ;;  %v2670_v60 = vadd.f32 %v7796_v16, %v7816_v33 }
 0x534   : > { %v5074_v35 = vpop.eup %5073  ;;  %v3463_v41 = vadd.f32 1.0, %v5072_v9  ;;  %5093 = vpow2.f32 %v4095_v61  ;;  %v2672_v58 = vadd.f32 %v7798_v14, %v7820_v11 }
 0x535   : > { %v5076_v24 = vpop.eup %5075  ;;  %3791 = vst [vmem:[%s7694_s27 + $0x1b8] sm:$0xff] %v5074_v35  ;;  %5095 = vrcp.f32 %v3462_v62  ;;  %v4021_v9 = vmul.f32 -1.442695, %v2670_v60 }
 0x536   : > { %v5078_v32 = vpop.eup %5077  ;;  %5097 = vrcp.f32 %v3463_v41  ;;  %v3464_v38 = vadd.f32 1.0, %v5076_v24  ;;  %v7802_v31 = vpop.f32.mrb[100].mxu1  ;;  %v4022_v41 = vmul.f32 -1.442695, %v2672_v58 }
 0x537   : > { %v5080_v49 = vpop.eup %5079  ;;  %v3469_v54 = vadd.f32 1.0, %v5078_v32  ;;  %5099 = vpow2.f32 %v4096_v39  ;;  %v7804_v8 = vpop.f32.mrb[101].mxu1  ;;  %v2676_v2 = vadd.f32 %v7802_v31, %v7816_v33 }
 0x538   : > { %v5082_v1 = vpop.eup %5081  ;;  %5101 = vrcp.f32 %v3464_v38  ;;  %v3470_v52 = vadd.f32 1.0, %v5080_v49  ;;  %v2678_v14 = vadd.f32 %v7804_v8, %v7820_v11 }
 0x539   : > { %v5084_v10 = vpop.eup %5083  ;;  %3792 = vst [vmem:[%s7694_s27 + $0x1c0] sm:$0xff] %v5082_v1  ;;  %5103 = vrcp.f32 %v3469_v54  ;;  %v4028_v38 = vmul.f32 -1.442695, %v2676_v2 }
 0x53a   : > { %v5086_v44 = vpop.eup %5085  ;;  %5105 = vrcp.f32 %v3470_v52  ;;  %v3471_v50 = vadd.f32 1.0, %v5084_v10  ;;  %v7810_v5 = vpop.f32.mrb[102].mxu1  ;;  %v4029_v10 = vmul.f32 -1.442695, %v2678_v14 }
 0x53b   : > { %v5088_v3 = vpop.eup %5087  ;;  %v3476_v26 = vadd.f32 1.0, %v5086_v44  ;;  %5107 = vpow2.f32 %v4097_v63  ;;  %v7812_v4 = vpop.f32.mrb[103].mxu1  ;;  %v2682_v8 = vadd.f32 %v7810_v5, %v7816_v33 }
 0x53c   : > { %v5090_v20 = vpop.eup %5089  ;;  %5109 = vrcp.f32 %v3471_v50  ;;  %v3477_v13 = vadd.f32 1.0, %v5088_v3  ;;  %v2684_v5 = vadd.f32 %v7812_v4, %v7820_v11 }
 0x53d   : > { %v5092_v15 = vpop.eup %5091  ;;  %3793 = vst [vmem:[%s7694_s27 + $0x1c8] sm:$0xff] %v5090_v20  ;;  %5111 = vrcp.f32 %v3476_v26 }
 0x53e   : > { %v5094_v22 = vpop.eup %5093  ;;  %5113 = vrcp.f32 %v3477_v13  ;;  %v3478_v45 = vadd.f32 1.0, %v5092_v15  ;;  %v7823_v17 = vpop.f32.mrb[104].mxu1  ;;  %v4035_v15 = vmul.f32 -1.442695, %v2682_v8  ;;  %v4036_v4 = vmul.f32 -1.442695, %v2684_v5 }
 0x53f   : > { %v5096_v19 = vpop.eup %5095  ;;  %v3483_v43 = vadd.f32 1.0, %v5094_v22  ;;  %5115 = vpow2.f32 %v4103_v6  ;;  %v7826_v59 = vpop.f32.mrb[105].mxu1 }
 0x540   : > { %v5098_v48 = vpop.eup %5097  ;;  %3798 = vst [vmem:[%s7694_s27 + $0x1f0] sm:$0xff] %v5096_v19  ;;  %5117 = vrcp.f32 %v3478_v45 }
 0x541   : > { %v5100_v53 = vpop.eup %5099  ;;  %3799 = vst [vmem:[%s7694_s27 + $0x1f8] sm:$0xff] %v5098_v48  ;;  %5119 = vrcp.f32 %v3483_v43  ;;  %v2688_v48 = vadd.f32 %v7823_v17, %v7816_v33 }
 0x542   : > { %v5102_v30 = vpop.eup %5101  ;;  %v3484_v7 = vadd.f32 1.0, %v5100_v53  ;;  %5121 = vpow2.f32 %v4104_v0  ;;  %v7839_v42 = vpop.f32.mrb[106].mxu1 }
 0x543   : > { %v5104_v56 = vpop.eup %5103  ;;  %3800 = vst [vmem:[%s7694_s27 + $0x200] sm:$0xff] %v5102_v30  ;;  %5123 = vpow2.f32 %v4110_v34  ;;  %v7842_v51 = vpop.f32.mrb[107].mxu1  ;;  %v2690_v30 = vadd.f32 %v7826_v59, %v7820_v11 }
 0x544   : > { %v5106_v37 = vpop.eup %5105  ;;  %3805 = vst [vmem:[%s7694_s27 + $0x228] sm:$0xff] %v5104_v56  ;;  %5125 = vrcp.f32 %v3484_v7  ;;  %v2694_v56 = vadd.f32 %v7839_v42, %v7816_v33  ;;  %v2696_v59 = vadd.f32 %v7842_v51, %v7820_v11 }
 0x545   : > { %v5108_v28 = vpop.eup %5107  ;;  %3806 = vst [vmem:[%s7694_s27 + $0x230] sm:$0xff] %v5106_v37  ;;  %5127 = vpow2.f32 %v4111_v27  ;;  %v4042_v37 = vmul.f32 -1.442695, %v2688_v48 }
 0x546   : > { %v5110_v36 = vpop.eup %5109  ;;  %v3485_v61 = vadd.f32 1.0, %v5108_v28  ;;  %5129 = vpow2.f32 %v4117_v12  ;;  %v7850_v62 = vpop.f32.mrb[108].mxu1  ;;  %v4049_v2 = vmul.f32 -1.442695, %v2694_v56 }
 0x547   : > { %v5112_v46 = vpop.eup %5111  ;;  %3807 = vst [vmem:[%s7694_s27 + $0x238] sm:$0xff] %v5110_v36  ;;  %5131 = vpow2.f32 %v4118_v25  ;;  %v7853_v16 = vpop.f32.mrb[109].mxu1  ;;  %v4043_v36 = vmul.f32 -1.442695, %v2690_v30 }
 0x548   : > { %v5114_v39 = vpop.eup %5113  ;;  %3812 = vst [vmem:[%s7694_s27 + $0x260] sm:$0xff] %v5112_v46  ;;  %5133 = vrcp.f32 %v3485_v61  ;;  %v2700_v61 = vadd.f32 %v7850_v62, %v7816_v33  ;;  %v2702_v51 = vadd.f32 %v7853_v16, %v7820_v11 }
 0x549   : > { %v5116_v35 = vpop.eup %5115  ;;  %3813 = vst [vmem:[%s7694_s27 + $0x268] sm:$0xff] %v5114_v39  ;;  %5135 = vpow2.f32 %v4014_v40 }
 0x54a   : > { %v5118_v24 = vpop.eup %5117  ;;  %v3491_v32 = vadd.f32 1.0, %v5116_v35  ;;  %5137 = vpow2.f32 %v4015_v55  ;;  %v7859_v54 = vpop.f32.mrb[110].mxu1  ;;  %v4050_v35 = vmul.f32 -1.442695, %v2696_v59 }
 0x54b   : > { %v5120_v49 = vpop.eup %5119  ;;  %3814 = vst [vmem:[%s7694_s27 + $0x270] sm:$0xff] %v5118_v24  ;;  %5139 = vpow2.f32 %v4021_v9  ;;  %v7862_v31 = vpop.f32.mrb[111].mxu1  ;;  %v2706_v62 = vadd.f32 %v7859_v54, %v7816_v33  ;;  %v4056_v24 = vmul.f32 -1.442695, %v2700_v61 }
 0x54c   : > { %v5122_v63 = vpop.eup %5121  ;;  %3819 = vst [vmem:[%s7694_s27 + $0x298] sm:$0xff] %v5120_v49  ;;  %5141 = vrcp.f32 %v3491_v32  ;;  %v2708_v32 = vadd.f32 %v7862_v31, %v7820_v11  ;;  %v4057_v49 = vmul.f32 -1.442695, %v2702_v51 }
 0x54d   : > { %v5124_v1 = vpop.eup %5123  ;;  %v3492_v52 = vadd.f32 1.0, %v5122_v63  ;;  %5143 = vpow2.f32 %v4022_v41 }
 0x54e   : > { %v5126_v29 = vpop.eup %5125  ;;  %v3498_v44 = vadd.f32 1.0, %v5124_v1  ;;  %5145 = vpow2.f32 %v4028_v38  ;;  %v7867_v47 = vpop.f32.mrb[112].mxu1 }
 0x54f   : > { %v5128_v50 = vpop.eup %5127  ;;  %3820 = vst [vmem:[%s7694_s27 + $0x2a0] sm:$0xff] %v5126_v29  ;;  %5147 = vrcp.f32 %v3492_v52  ;;  %v7869_v6 = vpop.f32.mrb[113].mxu1  ;;  %v2712_v54 = vadd.f32 %v7867_v47, %v7816_v33 }
 0x550   : > { %v5130_v3 = vpop.eup %5129  ;;  %5149 = vrcp.f32 %v3498_v44  ;;  %v3499_v26 = vadd.f32 1.0, %v5128_v50  ;;  %v2714_v31 = vadd.f32 %v7869_v6, %v7820_v11  ;;  %v4064_v44 = vmul.f32 -1.442695, %v2708_v32 }
 0x551   : > { %v5132_v20 = vpop.eup %5131  ;;  %v3505_v13 = vadd.f32 1.0, %v5130_v3  ;;  %5151 = vpow2.f32 %v4029_v10  ;;  %v4063_v10 = vmul.f32 -1.442695, %v2706_v62  ;;  %v4070_v3 = vmul.f32 -1.442695, %v2712_v54 }
 0x552   : > { %v5134_v22 = vpop.eup %5133  ;;  %5153 = vrcp.f32 %v3499_v26  ;;  %v3506_v45 = vadd.f32 1.0, %v5132_v20  ;;  %v7874_v19 = vpop.f32.mrb[114].mxu1 }
 0x553   : > { %v5136_v0 = vpop.eup %5135  ;;  %3821 = vst [vmem:[%s7694_s27 + $0x2a8] sm:$0xff] %v5134_v22  ;;  %5155 = vrcp.f32 %v3505_v13  ;;  %v7878_v53 = vpop.f32.mrb[115].mxu1  ;;  %v2718_v26 = vadd.f32 %v7874_v19, %v7816_v33 }
 0x554   : > { %v5138_v43 = vpop.eup %5137  ;;  %5157 = vrcp.f32 %v3506_v45  ;;  %v3402_v34 = vadd.f32 1.0, %v5136_v0  ;;  %v2720_v19 = vadd.f32 %v7878_v53, %v7820_v11 }
 0x555   : > { %v5140_v27 = vpop.eup %5139  ;;  %v3403_v21 = vadd.f32 1.0, %v5138_v43  ;;  %5159 = vpow2.f32 %v4035_v15  ;;  %v4071_v15 = vmul.f32 -1.442695, %v2714_v31 }
 0x556   : > { %v5142_v7 = vpop.eup %5141  ;;  %5161 = vrcp.f32 %v3402_v34  ;;  %v3409_v12 = vadd.f32 1.0, %v5140_v27  ;;  %v7885_v17 = vpop.f32.mrb[116].mxu1  ;;  %v4077_v34 = vmul.f32 -1.442695, %v2718_v26 }
 0x557   : > { %v5144_v23 = vpop.eup %5143  ;;  %3827 = vst [vmem:[%s7694_s27 + $0x2d8] sm:$0xff] %v5142_v7  ;;  %5163 = vrcp.f32 %v3403_v21  ;;  %v7889_v28 = vpop.f32.mrb[117].mxu1  ;;  %v2724_v53 = vadd.f32 %v7885_v17, %v7816_v33 }
 0x558   : > { %v5146_v25 = vpop.eup %5145  ;;  %5165 = vrcp.f32 %v3409_v12  ;;  %v3410_v60 = vadd.f32 1.0, %v5144_v23 }
 0x559   : > { %v5148_v40 = vpop.eup %5147  ;;  %v3416_v58 = vadd.f32 1.0, %v5146_v25  ;;  %5167 = vpow2.f32 %v4036_v4  ;;  %v4078_v25 = vmul.f32 -1.442695, %v2720_v19  ;;  %v4084_v17 = vmul.f32 -1.442695, %v2724_v53 }
 0x55a   : > { %v5150_v42 = vpop.eup %5149  ;;  %3828 = vst [vmem:[%s7694_s27 + $0x2e0] sm:$0xff] %v5148_v40  ;;  %5169 = vrcp.f32 %v3410_v60  ;;  %v7897_v46 = vpop.f32.mrb[118].mxu1 }
 0x55b   : > { %v5152_v55 = vpop.eup %5151  ;;  %3834 = vst [vmem:[%s7694_s27 + $0x310] sm:$0xff] %v5150_v42  ;;  %5171 = vrcp.f32 %v3416_v58  ;;  %v7901_v41 = vpop.f32.mrb[119].mxu1  ;;  %v2726_v42 = vadd.f32 %v7889_v28, %v7820_v11  ;;  %v2730_v51 = vadd.f32 %v7897_v46, %v7816_v33 }
 0x55c   : > { %v5154_v9 = vpop.eup %5153  ;;  %v3417_v39 = vadd.f32 1.0, %v5152_v55  ;;  %5173 = vpow2.f32 %v4042_v37  ;;  %v2732_v28 = vadd.f32 %v7901_v41, %v7820_v11 }
 0x55d   : > { %v5156_v14 = vpop.eup %5155  ;;  %3835 = vst [vmem:[%s7694_s27 + $0x318] sm:$0xff] %v5154_v9  ;;  %5175 = vpow2.f32 %v4043_v36  ;;  %v4091_v54 = vmul.f32 -1.442695, %v2730_v51 }
 0x55e   : > { %v5158_v16 = vpop.eup %5157  ;;  %3841 = vst [vmem:[%s7694_s27 + $0x348] sm:$0xff] %v5156_v14  ;;  %5177 = vrcp.f32 %v3417_v39  ;;  %v7910_v63 = vpop.f32.mrb[120].mxu1 }
 0x55f   : > { %v5160_v38 = vpop.eup %5159  ;;  %3842 = vst [vmem:[%s7694_s27 + $0x350] sm:$0xff] %v5158_v16  ;;  %5179 = vpow2.f32 %v4049_v2  ;;  %v7914_v8 = vpop.f32.mrb[121].mxu1  ;;  %v4085_v16 = vmul.f32 -1.442695, %v2726_v42  ;;  %v2736_v46 = vadd.f32 %v7910_v63, %v7816_v33  ;;  %v4092_v63 = vmul.f32 -1.442695, %v2732_v28 }
 0x560   : > { %v5162_v1 = vpop.eup %5161  ;;  %v3423_v52 = vadd.f32 1.0, %v5160_v38  ;;  %5181 = vpow2.f32 %v4050_v35 }
 0x561   : > { %v5164_v29 = vpop.eup %5163  ;;  %3738 = vst [vmem:[%s7694_s27 + $0x10] sm:$0xff] %v5162_v1  ;;  %5183 = vpow2.f32 %v4056_v24  ;;  %v2738_v1 = vadd.f32 %v7914_v8, %v7820_v11  ;;  %v4098_v8 = vmul.f32 -1.442695, %v2736_v46 }
 0x562   : > { %v5166_v50 = vpop.eup %5165  ;;  %3739 = vst [vmem:[%s7694_s27 + $0x18] sm:$0xff] %v5164_v29  ;;  %5185 = vrcp.f32 %v3423_v52  ;;  %v7921_v20 = vpop.f32.mrb[122].mxu1 }
 0x563   : > { %v5168_v47 = vpop.eup %5167  ;;  %3745 = vst [vmem:[%s7694_s27 + $0x48] sm:$0xff] %v5166_v50  ;;  %5187 = vpow2.f32 %v4057_v49  ;;  %v7923_v5 = vpop.f32.mrb[123].mxu1  ;;  %v2742_v29 = vadd.f32 %v7921_v20, %v7816_v33  ;;  %v4099_v26 = vmul.f32 -1.442695, %v2738_v1 }
 0x564   : > { %v5170_v6 = vpop.eup %5169  ;;  %v3424_v13 = vadd.f32 1.0, %v5168_v47  ;;  %5189 = vpow2.f32 %v4063_v10  ;;  %v2744_v47 = vadd.f32 %v7923_v5, %v7820_v11 }
 0x565   : > { %v5172_v22 = vpop.eup %5171  ;;  %3746 = vst [vmem:[%s7694_s27 + $0x50] sm:$0xff] %v5170_v6  ;;  %5191 = vpow2.f32 %v4064_v44  ;;  %v4105_v5 = vmul.f32 -1.442695, %v2742_v29 }
 0x566   : > { %v5174_v45 = vpop.eup %5173  ;;  %3752 = vst [vmem:[%s7694_s27 + $0x80] sm:$0xff] %v5172_v22  ;;  %5193 = vrcp.f32 %v3424_v13  ;;  %v7929_v48 = vpop.f32.mrb[124].mxu1  ;;  %v4106_v19 = vmul.f32 -1.442695, %v2744_v47 }
 0x567   : > { %v5176_v0 = vpop.eup %5175  ;;  %v3430_v43 = vadd.f32 1.0, %v5174_v45  ;;  %5195 = vpow2.f32 %v4070_v3  ;;  %v7931_v4 = vpop.f32.mrb[125].mxu1  ;;  %v2748_v6 = vadd.f32 %v7929_v48, %v7816_v33 }
 0x568   : > { %v5178_v27 = vpop.eup %5177  ;;  %v3431_v21 = vadd.f32 1.0, %v5176_v0  ;;  %5197 = vpow2.f32 %v4071_v15  ;;  %v2750_v45 = vadd.f32 %v7931_v4, %v7820_v11  ;;  %v2419_v0 = vsub.s32 4, %v7653_v18 }
 0x569   : > { %v5180_v30 = vpop.eup %5179  ;;  %3753 = vst [vmem:[%s7694_s27 + $0x88] sm:$0xff] %v5178_v27  ;;  %5199 = vrcp.f32 %v3430_v43  ;;  %v2423_v4 = vsub.s32 5, %v7653_v18 }
 0x56a   : > { %v5182_v7 = vpop.eup %5181  ;;  %5201 = vrcp.f32 %v3431_v21  ;;  %v3437_v12 = vadd.f32 1.0, %v5180_v30  ;;  %v7936_v60 = vpop.f32.mrb[126].mxu1  ;;  %v4112_v21 = vmul.f32 -1.442695, %v2748_v6 }
 0x56b   : > { %v5184_v23 = vpop.eup %5183  ;;  %v3438_v56 = vadd.f32 1.0, %v5182_v7  ;;  %5203 = vpow2.f32 %v4077_v34  ;;  %v7938_v40 = vpop.f32.mrb[127].mxu1  ;;  %v2754_v48 = vadd.f32 %v7936_v60, %v7816_v33 }
 0x56c   : > { %v5186_v37 = vpop.eup %5185  ;;  %5205 = vrcp.f32 %v3437_v12  ;;  %v3444_v59 = vadd.f32 1.0, %v5184_v23  ;;  %v2756_v33 = vadd.f32 %v7938_v40, %v7820_v11 }
 0x56d   : > { %v5188_v58 = vpop.eup %5187  ;;  %3759 = vst [vmem:[%s7694_s27 + $0xb8] sm:$0xff] %v5186_v37  ;;  %5207 = vrcp.f32 %v3438_v56  ;;  %v4113_v56 = vmul.f32 -1.442695, %v2750_v45  ;;  %v4119_v18 = vmul.f32 -1.442695, %v2754_v48 }
 0x56e   : > { %v5190_v36 = vpop.eup %5189  ;;  %5209 = vrcp.f32 %v3444_v59  ;;  %v3445_v61 = vadd.f32 1.0, %v5188_v58  ;;  %v7945_v9 = vpop.f32.mrb[128].mxu1 }
 0x56f   : > { %v5192_v55 = vpop.eup %5191  ;;  %v3451_v2 = vadd.f32 1.0, %v5190_v36  ;;  %5211 = vpow2.f32 %v4078_v25  ;;  %v7947_v62 = vpop.f32.mrb[129].mxu1  ;;  %v5419_v25 = vld [vmem:[%s8180_s9] sm:$0xff] }
 0x570   : > { %v5194_v39 = vpop.eup %5193  ;;  %5213 = vrcp.f32 %v3445_v61  ;;  %v3452_v35 = vadd.f32 1.0, %v5192_v55  ;;  %v7993_v53 = vrot.slane %v5419_v25, %v2419_v0  ;;  %v7999_v11 = vrot.slane %v5419_v25, %v2423_v4 }
 0x571   : > { %v5196_v14 = vpop.eup %5195  ;;  %3760 = vst [vmem:[%s7694_s27 + $0xc0] sm:$0xff] %v5194_v39  ;;  %5215 = vrcp.f32 %v3451_v2  ;;  %v4120_v55 = vmul.f32 -1.442695, %v2756_v33 }
 0x572   : > { %v5198_v24 = vpop.eup %5197  ;;  %5217 = vrcp.f32 %v3452_v35  ;;  %v3458_v32 = vadd.f32 1.0, %v5196_v14  ;;  %v7956_v52 = vpop.f32.mrb[130].mxu1  ;;  %v2825_v2 = vadd.f32 %v7945_v9, %v7993_v53  ;;  %v2827_v9 = vadd.f32 %v7947_v62, %v7999_v11 }
 0x573   : > { %v5200_v38 = vpop.eup %5199  ;;  %v3459_v49 = vadd.f32 1.0, %v5198_v24  ;;  %5219 = vpow2.f32 %v4084_v17  ;;  %v7959_v41 = vpop.f32.mrb[131].mxu1 }
 0x574   : > { %v5202_v10 = vpop.eup %5201  ;;  %3766 = vst [vmem:[%s7694_s27 + $0xf0] sm:$0xff] %v5200_v38  ;;  %5221 = vrcp.f32 %v3458_v32  ;;  %v4016_v46 = vmul.f32 -1.442695, %v2825_v2  ;;  %v4017_v62 = vmul.f32 -1.442695, %v2827_v9 }
 0x575   : > { %v5204_v31 = vpop.eup %5203  ;;  %3767 = vst [vmem:[%s7694_s27 + $0xf8] sm:$0xff] %v5202_v10  ;;  %5223 = vrcp.f32 %v3459_v49 }
 0x576   : > { %v5206_v44 = vpop.eup %5205  ;;  %v3465_v50 = vadd.f32 1.0, %v5204_v31  ;;  %5225 = vpow2.f32 %v4085_v16  ;;  %v7969_v13 = vpop.f32.mrb[132].mxu1 }
 0x577   : > { %v5208_v3 = vpop.eup %5207  ;;  %3773 = vst [vmem:[%s7694_s27 + $0x128] sm:$0xff] %v5206_v44  ;;  %5227 = vpow2.f32 %v4091_v54  ;;  %v7972_v20 = vpop.f32.mrb[133].mxu1  ;;  %v2837_v6 = vadd.f32 %v7969_v13, %v7993_v53 }
 0x578   : > { %v5210_v15 = vpop.eup %5209  ;;  %3774 = vst [vmem:[%s7694_s27 + $0x130] sm:$0xff] %v5208_v3  ;;  %5229 = vrcp.f32 %v3465_v50 }
 0x579   : > { %v5212_v22 = vpop.eup %5211  ;;  %3780 = vst [vmem:[%s7694_s27 + $0x160] sm:$0xff] %v5210_v15  ;;  %5231 = vpow2.f32 %v4092_v63  ;;  %v2831_v63 = vadd.f32 %v7956_v52, %v7993_v53 }
 0x57a   : > { %v5214_v43 = vpop.eup %5213  ;;  %v3466_v34 = vadd.f32 1.0, %v5212_v22  ;;  %5233 = vpow2.f32 %v4098_v8  ;;  %v7981_v30 = vpop.f32.mrb[134].mxu1  ;;  %v2833_v8 = vadd.f32 %v7959_v41, %v7999_v11  ;;  %v2839_v41 = vadd.f32 %v7972_v20, %v7999_v11 }
 0x57b   : > { %v5216_v27 = vpop.eup %5215  ;;  %3781 = vst [vmem:[%s7694_s27 + $0x168] sm:$0xff] %v5214_v43  ;;  %5235 = vpow2.f32 %v4099_v26  ;;  %v7985_v12 = vpop.f32.mrb[135].mxu1 }
 0x57c   : > { %v5218_v7 = vpop.eup %5217  ;;  %3787 = vst [vmem:[%s7694_s27 + $0x198] sm:$0xff] %v5216_v27  ;;  %5237 = vrcp.f32 %v3466_v34  ;;  %v4024_v34 = vmul.f32 -1.442695, %v2833_v8  ;;  %v4030_v27 = vmul.f32 -1.442695, %v2837_v6  ;;  %v2845_v20 = vadd.f32 %v7985_v12, %v7999_v11 }
 0x57d   : > { %v5220_v23 = vpop.eup %5219  ;;  %3788 = vst [vmem:[%s7694_s27 + $0x1a0] sm:$0xff] %v5218_v7  ;;  %5239 = vpow2.f32 %v4105_v5  ;;  %v4023_v5 = vmul.f32 -1.442695, %v2831_v63 }
 0x57e   : > { %v5222_v60 = vpop.eup %5221  ;;  %v3472_v37 = vadd.f32 1.0, %v5220_v23  ;;  %5241 = vpow2.f32 %v4106_v19  ;;  %v7996_v58 = vpop.f32.mrb[136].mxu1  ;;  %v2843_v19 = vadd.f32 %v7981_v30, %v7993_v53  ;;  %v4031_v23 = vmul.f32 -1.442695, %v2839_v41 }
 0x57f   : > { %v5224_v59 = vpop.eup %5223  ;;  %3794 = vst [vmem:[%s7694_s27 + $0x1d0] sm:$0xff] %v5222_v60  ;;  %5243 = vpow2.f32 %v4112_v21  ;;  %v8001_v40 = vpop.f32.mrb[137].mxu1  ;;  %v2849_v30 = vadd.f32 %v7996_v58, %v7993_v53 }
 0x580   : > { %v5226_v36 = vpop.eup %5225  ;;  %3795 = vst [vmem:[%s7694_s27 + $0x1d8] sm:$0xff] %v5224_v59  ;;  %5245 = vrcp.f32 %v3472_v37  ;;  %v4037_v25 = vmul.f32 -1.442695, %v2843_v19  ;;  %v2851_v60 = vadd.f32 %v8001_v40, %v7999_v11 }
 0x581   : > { %v5228_v61 = vpop.eup %5227  ;;  %v3473_v42 = vadd.f32 1.0, %v5226_v36  ;;  %5247 = vpow2.f32 %v4113_v56 }
 0x582   : > { %v5230_v17 = vpop.eup %5229  ;;  %v3479_v51 = vadd.f32 1.0, %v5228_v61  ;;  %5249 = vpow2.f32 %v4119_v18  ;;  %v8006_v35 = vpop.f32.mrb[138].mxu1  ;;  %v4038_v18 = vmul.f32 -1.442695, %v2845_v20 }
 0x583   : > { %v5232_v39 = vpop.eup %5231  ;;  %3801 = vst [vmem:[%s7694_s27 + $0x208] sm:$0xff] %v5230_v17  ;;  %5251 = vrcp.f32 %v3473_v42  ;;  %v8008_v24 = vpop.f32.mrb[139].mxu1  ;;  %v2855_v59 = vadd.f32 %v8006_v35, %v7993_v53  ;;  %v4044_v42 = vmul.f32 -1.442695, %v2849_v30  ;;  %v4045_v17 = vmul.f32 -1.442695, %v2851_v60 }
 0x584   : > { %v5234_v14 = vpop.eup %5233  ;;  %5253 = vrcp.f32 %v3479_v51  ;;  %v3480_v28 = vadd.f32 1.0, %v5232_v39  ;;  %v2857_v40 = vadd.f32 %v8008_v24, %v7999_v11 }
 0x585   : > { %v5236_v32 = vpop.eup %5235  ;;  %v3486_v16 = vadd.f32 1.0, %v5234_v14  ;;  %5255 = vpow2.f32 %v4120_v55  ;;  %v4051_v35 = vmul.f32 -1.442695, %v2855_v59 }
 0x586   : > { %v5238_v38 = vpop.eup %5237  ;;  %5257 = vrcp.f32 %v3480_v28  ;;  %v3487_v49 = vadd.f32 1.0, %v5236_v32  ;;  %v8013_v1 = vpop.f32.mrb[140].mxu1 }
 0x587   : > { %v5240_v54 = vpop.eup %5239  ;;  %3802 = vst [vmem:[%s7694_s27 + $0x210] sm:$0xff] %v5238_v38  ;;  %5259 = vrcp.f32 %v3486_v16  ;;  %v8017_v29 = vpop.f32.mrb[141].mxu1  ;;  %v2861_v14 = vadd.f32 %v8013_v1, %v7993_v53  ;;  %v4052_v16 = vmul.f32 -1.442695, %v2857_v40 }
 0x588   : > { %v5242_v10 = vpop.eup %5241  ;;  %5261 = vrcp.f32 %v3487_v49  ;;  %v3493_v31 = vadd.f32 1.0, %v5240_v54  ;;  %v2863_v1 = vadd.f32 %v8017_v29, %v7999_v11 }
 0x589   : > { %v5244_v44 = vpop.eup %5243  ;;  %v3494_v50 = vadd.f32 1.0, %v5242_v10  ;;  %5263 = vpow2.f32 %v4016_v46  ;;  %v4058_v10 = vmul.f32 -1.442695, %v2861_v14 }
 0x58a   : > { %v5246_v47 = vpop.eup %5245  ;;  %5265 = vrcp.f32 %v3493_v31  ;;  %v3500_v3 = vadd.f32 1.0, %v5244_v44  ;;  %v8024_v52 = vpop.f32.mrb[142].mxu1  ;;  %v4059_v6 = vmul.f32 -1.442695, %v2863_v1 }
 0x58b   : > { %v5248_v26 = vpop.eup %5247  ;;  %3808 = vst [vmem:[%s7694_s27 + $0x240] sm:$0xff] %v5246_v47  ;;  %5267 = vrcp.f32 %v3494_v50  ;;  %v8028_v45 = vpop.f32.mrb[143].mxu1  ;;  %v2867_v29 = vadd.f32 %v8024_v52, %v7993_v53 }
 0x58c   : > { %v5250_v15 = vpop.eup %5249  ;;  %5269 = vrcp.f32 %v3500_v3  ;;  %v3501_v22 = vadd.f32 1.0, %v5248_v26  ;;  %v2869_v19 = vadd.f32 %v8028_v45, %v7999_v11 }
 0x58d   : > { %v5252_v0 = vpop.eup %5251  ;;  %v3507_v43 = vadd.f32 1.0, %v5250_v15  ;;  %5271 = vpow2.f32 %v4017_v62  ;;  %v4065_v52 = vmul.f32 -1.442695, %v2867_v29 }
 0x58e   : > { %v5254_v13 = vpop.eup %5253  ;;  %3809 = vst [vmem:[%s7694_s27 + $0x248] sm:$0xff] %v5252_v0  ;;  %5273 = vrcp.f32 %v3501_v22  ;;  %v8036_v21 = vpop.f32.mrb[144].mxu1  ;;  %v4066_v60 = vmul.f32 -1.442695, %v2869_v19 }
 0x58f   : > { %v5256_v48 = vpop.eup %5255  ;;  %3815 = vst [vmem:[%s7694_s27 + $0x278] sm:$0xff] %v5254_v13  ;;  %5275 = vrcp.f32 %v3507_v43  ;;  %v8040_v56 = vpop.f32.mrb[145].mxu1 }
 0x590   : > { %v5258_v7 = vpop.eup %5257  ;;  %v3508_v4 = vadd.f32 1.0, %v5256_v48  ;;  %5277 = vpow2.f32 %v4023_v5  ;;  %v2875_v45 = vadd.f32 %v8040_v56, %v7999_v11 }
 0x591   : > { %v5260_v33 = vpop.eup %5259  ;;  %3816 = vst [vmem:[%s7694_s27 + $0x280] sm:$0xff] %v5258_v7  ;;  %5279 = vpow2.f32 %v4024_v34 }
 0x592   : > { %v5262_v12 = vpop.eup %5261  ;;  %3822 = vst [vmem:[%s7694_s27 + $0x2b0] sm:$0xff] %v5260_v33  ;;  %5281 = vrcp.f32 %v3508_v4  ;;  %v8049_v58 = vpop.f32.mrb[146].mxu1 }
 0x593   : > { %v5264_v37 = vpop.eup %5263  ;;  %3823 = vst [vmem:[%s7694_s27 + $0x2b8] sm:$0xff] %v5262_v12  ;;  %5283 = vpow2.f32 %v4030_v27  ;;  %v8053_v55 = vpop.f32.mrb[147].mxu1  ;;  %v2873_v27 = vadd.f32 %v8036_v21, %v7993_v53  ;;  %v2879_v21 = vadd.f32 %v8049_v58, %v7993_v53  ;;  %v4073_v58 = vmul.f32 -1.442695, %v2875_v45 }
 0x594   : > { %v5266_v36 = vpop.eup %5265  ;;  %v3404_v61 = vadd.f32 1.0, %v5264_v37  ;;  %5285 = vpow2.f32 %v4031_v23  ;;  %v2881_v59 = vadd.f32 %v8053_v55, %v7999_v11 }
 0x595   : > { %v5268_v2 = vpop.eup %5267  ;;  %3829 = vst [vmem:[%s7694_s27 + $0x2e8] sm:$0xff] %v5266_v36  ;;  %5287 = vpow2.f32 %v4037_v25  ;;  %v4079_v55 = vmul.f32 -1.442695, %v2879_v21 }
 0x596   : > { %v5270_v51 = vpop.eup %5269  ;;  %3830 = vst [vmem:[%s7694_s27 + $0x2f0] sm:$0xff] %v5268_v2  ;;  %5289 = vrcp.f32 %v3404_v61  ;;  %v8060_v28 = vpop.f32.mrb[148].mxu1 }
 0x597   : > { %v5272_v39 = vpop.eup %5271  ;;  %3836 = vst [vmem:[%s7694_s27 + $0x320] sm:$0xff] %v5270_v51  ;;  %5291 = vpow2.f32 %v4038_v18  ;;  %v8062_v46 = vpop.f32.mrb[149].mxu1  ;;  %v4072_v18 = vmul.f32 -1.442695, %v2873_v27  ;;  %v2885_v40 = vadd.f32 %v8060_v28, %v7993_v53 }
 0x598   : > { %v5274_v24 = vpop.eup %5273  ;;  %v3405_v32 = vadd.f32 1.0, %v5272_v39  ;;  %5293 = vpow2.f32 %v4044_v42  ;;  %v2887_v51 = vadd.f32 %v8062_v46, %v7999_v11 }
 0x599   : > { %v5276_v9 = vpop.eup %5275  ;;  %3837 = vst [vmem:[%s7694_s27 + $0x328] sm:$0xff] %v5274_v24  ;;  %5295 = vpow2.f32 %v4045_v17  ;;  %v4086_v46 = vmul.f32 -1.442695, %v2885_v40 }
 0x59a   : > { %v5278_v38 = vpop.eup %5277  ;;  %3843 = vst [vmem:[%s7694_s27 + $0x358] sm:$0xff] %v5276_v9  ;;  %5297 = vrcp.f32 %v3405_v32  ;;  %v8068_v31 = vpop.f32.mrb[150].mxu1 }
 0x59b   : > { %v5280_v49 = vpop.eup %5279  ;;  %v3411_v54 = vadd.f32 1.0, %v5278_v38  ;;  %5299 = vpow2.f32 %v4051_v35  ;;  %v8070_v50 = vpop.f32.mrb[151].mxu1  ;;  %v4080_v35 = vmul.f32 -1.442695, %v2881_v59  ;;  %v2891_v14 = vadd.f32 %v8068_v31, %v7993_v53 }
 0x59c   : > { %v5282_v63 = vpop.eup %5281  ;;  %v3412_v44 = vadd.f32 1.0, %v5280_v49  ;;  %5301 = vpow2.f32 %v4052_v16  ;;  %v2893_v9 = vadd.f32 %v8070_v50, %v7999_v11 }
 0x59d   : > { %v5284_v62 = vpop.eup %5283  ;;  %3844 = vst [vmem:[%s7694_s27 + $0x360] sm:$0xff] %v5282_v63  ;;  %5303 = vrcp.f32 %v3411_v54  ;;  %v4087_v54 = vmul.f32 -1.442695, %v2887_v51  ;;  %v4093_v31 = vmul.f32 -1.442695, %v2891_v14 }
 0x59e   : > { %v5286_v8 = vpop.eup %5285  ;;  %5305 = vrcp.f32 %v3412_v44  ;;  %v3418_v47 = vadd.f32 1.0, %v5284_v62  ;;  %v8075_v15 = vpop.f32.mrb[152].mxu1 }
 0x59f   : > { %v5288_v3 = vpop.eup %5287  ;;  %v3419_v26 = vadd.f32 1.0, %v5286_v8  ;;  %5307 = vpow2.f32 %v4058_v10  ;;  %v8077_v41 = vpop.f32.mrb[153].mxu1  ;;  %v2897_v10 = vadd.f32 %v8075_v15, %v7993_v53 }
 0x5a0   : > { %v5290_v22 = vpop.eup %5289  ;;  %5309 = vrcp.f32 %v3418_v47  ;;  %v3425_v5 = vadd.f32 1.0, %v5288_v3  ;;  %v2899_v50 = vadd.f32 %v8077_v41, %v7999_v11  ;;  %v4094_v47 = vmul.f32 -1.442695, %v2893_v9 }
 0x5a1   : > { %v5292_v0 = vpop.eup %5291  ;;  %3740 = vst [vmem:[%s7694_s27 + $0x20] sm:$0xff] %v5290_v22  ;;  %5311 = vrcp.f32 %v3419_v26  ;;  %v4100_v29 = vmul.f32 -1.442695, %v2897_v10 }
 0x5a2   : > { %v5294_v43 = vpop.eup %5293  ;;  %5313 = vrcp.f32 %v3425_v5  ;;  %v3426_v34 = vadd.f32 1.0, %v5292_v0  ;;  %v8084_v20 = vpop.f32.mrb[154].mxu1  ;;  %v4101_v41 = vmul.f32 -1.442695, %v2899_v50 }
 0x5a3   : > { %v5296_v13 = vpop.eup %5295  ;;  %v3432_v48 = vadd.f32 1.0, %v5294_v43  ;;  %5315 = vpow2.f32 %v4059_v6  ;;  %v8086_v23 = vpop.f32.mrb[155].mxu1  ;;  %v2903_v19 = vadd.f32 %v8084_v20, %v7993_v53 }
 0x5a4   : > { %v5298_v7 = vpop.eup %5297  ;;  %5317 = vrcp.f32 %v3426_v34  ;;  %v3433_v4 = vadd.f32 1.0, %v5296_v13  ;;  %v2905_v45 = vadd.f32 %v8086_v23, %v7999_v11 }
 0x5a5   : > { %v5300_v30 = vpop.eup %5299  ;;  %3741 = vst [vmem:[%s7694_s27 + $0x28] sm:$0xff] %v5298_v7  ;;  %5319 = vrcp.f32 %v3432_v48  ;;  %v4107_v20 = vmul.f32 -1.442695, %v2903_v19 }
 0x5a6   : > { %v5302_v33 = vpop.eup %5301  ;;  %5321 = vrcp.f32 %v3433_v4  ;;  %v3439_v25 = vadd.f32 1.0, %v5300_v30  ;;  %v8095_v36 = vpop.f32.mrb[156].mxu1 }
 0x5a7   : > { %v5304_v12 = vpop.eup %5303  ;;  %v3440_v37 = vadd.f32 1.0, %v5302_v33  ;;  %5323 = vpow2.f32 %v4065_v52  ;;  %v8098_v56 = vpop.f32.mrb[157].mxu1  ;;  %v2909_v23 = vadd.f32 %v8095_v36, %v7993_v53 }
 0x5a8   : > { %v5306_v61 = vpop.eup %5305  ;;  %3747 = vst [vmem:[%s7694_s27 + $0x58] sm:$0xff] %v5304_v12  ;;  %5325 = vrcp.f32 %v3439_v25 }
 0x5a9   : > { %v5308_v42 = vpop.eup %5307  ;;  %3748 = vst [vmem:[%s7694_s27 + $0x60] sm:$0xff] %v5306_v61  ;;  %5327 = vrcp.f32 %v3440_v37 }
 0x5aa   : > { %v5310_v2 = vpop.eup %5309  ;;  %v3446_v17 = vadd.f32 1.0, %v5308_v42  ;;  %5329 = vpow2.f32 %v4066_v60  ;;  %v8108_v24 = vpop.f32.mrb[158].mxu1 }
 0x5ab   : > { %v5312_v39 = vpop.eup %5311  ;;  %3754 = vst [vmem:[%s7694_s27 + $0x90] sm:$0xff] %v5310_v2  ;;  %5331 = vpow2.f32 %v4072_v18  ;;  %v8111_v28 = vpop.f32.mrb[159].mxu1 }
 0x5ac   : > { %v5314_v32 = vpop.eup %5313  ;;  %3755 = vst [vmem:[%s7694_s27 + $0x98] sm:$0xff] %v5312_v39  ;;  %5333 = vrcp.f32 %v3446_v17  ;;  %v2917_v9 = vadd.f32 %v8111_v28, %v7999_v11 }
 0x5ad   : > { %v5316_v16 = vpop.eup %5315  ;;  %3761 = vst [vmem:[%s7694_s27 + $0xc8] sm:$0xff] %v5314_v32  ;;  %5335 = vpow2.f32 %v4073_v58  ;;  %v4108_v58 = vmul.f32 -1.442695, %v2905_v45  ;;  %v2915_v32 = vadd.f32 %v8108_v24, %v7993_v53 }
 0x5ae   : > { %v5318_v38 = vpop.eup %5317  ;;  %v3447_v49 = vadd.f32 1.0, %v5316_v16  ;;  %5337 = vpow2.f32 %v4079_v55  ;;  %v4276_v63 = vpop.f32.mrb[160].mxu1  ;;  %v2911_v55 = vadd.f32 %v8098_v56, %v7999_v11 }
 0x5af   : > { %v5320_v1 = vpop.eup %5319  ;;  %3762 = vst [vmem:[%s7694_s27 + $0xd0] sm:$0xff] %v5318_v38  ;;  %5339 = vpow2.f32 %v4080_v35  ;;  %v4277_v62 = vpop.f32.mrb[161].mxu1  ;;  %v4121_v53 = vmul.f32 -1.442695, %v2915_v32 }
 0x5b0   : > { %v5322_v44 = vpop.eup %5321  ;;  %3768 = vst [vmem:[%s7694_s27 + $0x100] sm:$0xff] %v5320_v1  ;;  %5341 = vrcp.f32 %v3447_v49  ;;  %v8123_v3 = vadd.f32 %v4277_v62, %v4276_v63  ;;  %v4115_v49 = vmul.f32 -1.442695, %v2911_v55 }
 0x5b1   : > { %v5324_v8 = vpop.eup %5323  ;;  %3769 = vst [vmem:[%s7694_s27 + $0x108] sm:$0xff] %v5322_v44  ;;  %5343 = vpow2.f32 %v4086_v46  ;;  %v4114_v46 = vmul.f32 -1.442695, %v2909_v23 }
 0x5b2   : > { %v5326_v26 = vpop.eup %5325  ;;  %v3453_v6 = vadd.f32 1.0, %v5324_v8  ;;  %5345 = vpow2.f32 %v4087_v54  ;;  %v4279_v22 = vpop.f32.mrb[162].mxu1  ;;  %v3046_v54 = vadd.f32 %v8123_v3, %v7672_v57 }
 0x5b3   : > { %v5328_v15 = vpop.eup %5327  ;;  %3775 = vst [vmem:[%s7694_s27 + $0x138] sm:$0xff] %v5326_v26  ;;  %5347 = vpow2.f32 %v4093_v31  ;;  %v4280_v0 = vpop.f32.mrb[163].mxu1  ;;  %v4122_v31 = vmul.f32 -1.442695, %v2917_v9 }
 0x5b4   : > { %v5330_v5 = vpop.eup %5329  ;;  %3776 = vst [vmem:[%s7694_s27 + $0x140] sm:$0xff] %v5328_v15  ;;  %5349 = vrcp.f32 %v3453_v6  ;;  %v4281_v13 = vadd.f32 %v4280_v0, %v4279_v22  ;;  %v4102_v50 = vmul.f32 -1.442695, %v3046_v54 }
 0x5b5   : > { %v5332_v43 = vpop.eup %5331  ;;  %v3454_v34 = vadd.f32 1.0, %v5330_v5  ;;  %5351 = vpow2.f32 %v4094_v47 }
 0x5b6   : > { %v5334_v48 = vpop.eup %5333  ;;  %v3460_v52 = vadd.f32 1.0, %v5332_v43  ;;  %5353 = vpow2.f32 %v4100_v29  ;;  %v4282_v7 = vpop.f32.mrb[164].mxu1  ;;  %v3051_v24 = vadd.f32 %v4281_v13, %v7672_v57 }
 0x5b7   : > { %v5336_v27 = vpop.eup %5335  ;;  %3782 = vst [vmem:[%s7694_s27 + $0x170] sm:$0xff] %v5334_v48  ;;  %5355 = vrcp.f32 %v3454_v34  ;;  %v4283_v33 = vpop.f32.mrb[165].mxu1 }
 0x5b8   : > { %v5338_v4 = vpop.eup %5337  ;;  %5357 = vrcp.f32 %v3460_v52  ;;  %v3461_v30 = vadd.f32 1.0, %v5336_v27  ;;  %v4284_v21 = vadd.f32 %v4283_v33, %v4282_v7  ;;  %v4109_v3 = vmul.f32 -1.442695, %v3051_v24 }
 0x5b9   : > { %v5340_v25 = vpop.eup %5339  ;;  %v3467_v60 = vadd.f32 1.0, %v5338_v4  ;;  %5359 = vpow2.f32 %v4101_v41 }
 0x5ba   : > { %v5342_v12 = vpop.eup %5341  ;;  %5361 = vrcp.f32 %v3461_v30  ;;  %v3468_v37 = vadd.f32 1.0, %v5340_v25  ;;  %v4285_v59 = vpop.f32.mrb[166].mxu1  ;;  %v3056_v63 = vadd.f32 %v4284_v21, %v7672_v57 }
 0x5bb   : > { %v5344_v18 = vpop.eup %5343  ;;  %3783 = vst [vmem:[%s7694_s27 + $0x178] sm:$0xff] %v5342_v12  ;;  %5363 = vrcp.f32 %v3467_v60  ;;  %v4286_v40 = vpop.f32.mrb[167].mxu1 }
 0x5bc   : > { %v5346_v61 = vpop.eup %5345  ;;  %5365 = vrcp.f32 %v3468_v37  ;;  %v3474_v42 = vadd.f32 1.0, %v5344_v18  ;;  %v4287_v51 = vadd.f32 %v4286_v40, %v4285_v59  ;;  %v4116_v29 = vmul.f32 -1.442695, %v3056_v63 }
 0x5bd   : > { %v5348_v2 = vpop.eup %5347  ;;  %v3475_v17 = vadd.f32 1.0, %v5346_v61  ;;  %5367 = vpow2.f32 %v4107_v20 }
 0x5be   : > { %v5350_v39 = vpop.eup %5349  ;;  %5369 = vrcp.f32 %v3474_v42  ;;  %v3481_v35 = vadd.f32 1.0, %v5348_v2  ;;  %v3061_v62 = vadd.f32 %v4287_v51, %v7672_v57 }
 0x5bf   : > { %v5352_v14 = vpop.eup %5351  ;;  %3789 = vst [vmem:[%s7694_s27 + $0x1a8] sm:$0xff] %v5350_v39  ;;  %5371 = vrcp.f32 %v3475_v17 }
 0x5c0   : > { %v5354_v36 = vpop.eup %5353  ;;  %5373 = vrcp.f32 %v3481_v35  ;;  %v3482_v16 = vadd.f32 1.0, %v5352_v14  ;;  %v4123_v22 = vmul.f32 -1.442695, %v3061_v62 }
 0x5c1   : > { %v5356_v56 = vpop.eup %5355  ;;  %v3488_v38 = vadd.f32 1.0, %v5354_v36  ;;  %5375 = vpow2.f32 %v4108_v58 }
 0x5c2   : > { %v5358_v10 = vpop.eup %5357  ;;  %3790 = vst [vmem:[%s7694_s27 + $0x1b0] sm:$0xff] %v5356_v56  ;;  %5377 = vrcp.f32 %v3482_v16 }
 0x5c3   : > { %v5360_v1 = vpop.eup %5359  ;;  %3796 = vst [vmem:[%s7694_s27 + $0x1e0] sm:$0xff] %v5358_v10  ;;  %5379 = vrcp.f32 %v3488_v38 }
 0x5c4   : > { %v5362_v11 = vpop.eup %5361  ;;  %v3489_v28 = vadd.f32 1.0, %v5360_v1  ;;  %5381 = vpow2.f32 %v4114_v46 }
 0x5c5   : > { %v5364_v44 = vpop.eup %5363  ;;  %3797 = vst [vmem:[%s7694_s27 + $0x1e8] sm:$0xff] %v5362_v11  ;;  %5383 = vpow2.f32 %v4115_v49 }
 0x5c6   : > { %v5366_v8 = vpop.eup %5365  ;;  %3803 = vst [vmem:[%s7694_s27 + $0x218] sm:$0xff] %v5364_v44  ;;  %5385 = vrcp.f32 %v3489_v28 }
 0x5c7   : > { %v5368_v47 = vpop.eup %5367  ;;  %3804 = vst [vmem:[%s7694_s27 + $0x220] sm:$0xff] %v5366_v8  ;;  %5387 = vpow2.f32 %v4121_v53 }
 0x5c8   : > { %v5370_v26 = vpop.eup %5369  ;;  %v3495_v6 = vadd.f32 1.0, %v5368_v47  ;;  %5389 = vpow2.f32 %v4122_v31 }
 0x5c9   : > { %v5372_v15 = vpop.eup %5371  ;;  %3810 = vst [vmem:[%s7694_s27 + $0x250] sm:$0xff] %v5370_v26  ;;  %5391 = vpow2.f32 %v4102_v50 }
 0x5ca   : > { %v5374_v57 = vpop.eup %5373  ;;  %3811 = vst [vmem:[%s7694_s27 + $0x258] sm:$0xff] %v5372_v15  ;;  %5393 = vrcp.f32 %v3495_v6 }
 0x5cb   : > { %v5376_v5 = vpop.eup %5375  ;;  %3817 = vst [vmem:[%s7694_s27 + $0x288] sm:$0xff] %v5374_v57  ;;  %5395 = vpow2.f32 %v4109_v3 }
 0x5cc   : > { %v5378_v41 = vpop.eup %5377  ;;  %v3496_v0 = vadd.f32 1.0, %v5376_v5  ;;  %5397 = vpow2.f32 %v4116_v29 }
 0x5cd   : > { %v5380_v43 = vpop.eup %5379  ;;  %3818 = vst [vmem:[%s7694_s27 + $0x290] sm:$0xff] %v5378_v41  ;;  %5399 = vpow2.f32 %v4123_v22 }
 0x5ce   : > { %v5382_v34 = vpop.eup %5381  ;;  %3824 = vst [vmem:[%s7694_s27 + $0x2c0] sm:$0xff] %v5380_v43  ;;  %5401 = vrcp.f32 %v3496_v0 }
 0x5cf   : > { %v5384_v19 = vpop.eup %5383  ;;  %v3502_v13 = vadd.f32 1.0, %v5382_v34 }
 0x5d0   : > { %v5386_v48 = vpop.eup %5385  ;;  %v3503_v52 = vadd.f32 1.0, %v5384_v19 }
 0x5d1   : > { %v5388_v27 = vpop.eup %5387  ;;  %3825 = vst [vmem:[%s7694_s27 + $0x2c8] sm:$0xff] %v5386_v48  ;;  %5403 = vrcp.f32 %v3502_v13 }
 0x5d2   : > { %v5390_v7 = vpop.eup %5389  ;;  %5405 = vrcp.f32 %v3503_v52  ;;  %v3509_v4 = vadd.f32 1.0, %v5388_v27 }
 0x5d3   : > { %v5392_v30 = vpop.eup %5391  ;;  %v3510_v45 = vadd.f32 1.0, %v5390_v7 }
 0x5d4   : > { %v5394_v33 = vpop.eup %5393  ;;  %5407 = vrcp.f32 %v3509_v4  ;;  %v3490_v25 = vadd.f32 1.0, %v5392_v30 }
 0x5d5   : > { %v5396_v60 = vpop.eup %5395  ;;  %3831 = vst [vmem:[%s7694_s27 + $0x2f8] sm:$0xff] %v5394_v33  ;;  %5409 = vrcp.f32 %v3510_v45 }
 0x5d6   : > { %v5398_v20 = vpop.eup %5397  ;;  %5411 = vrcp.f32 %v3490_v25  ;;  %v3497_v21 = vadd.f32 1.0, %v5396_v60 }
 0x5d7   : > { %v5400_v12 = vpop.eup %5399  ;;  %v3504_v37 = vadd.f32 1.0, %v5398_v20 }
 0x5d8   : > { %v5402_v18 = vpop.eup %5401  ;;  %5413 = vrcp.f32 %v3497_v21  ;;  %v3511_v59 = vadd.f32 1.0, %v5400_v12 }
 0x5d9   : > { %3832 = vst [vmem:[%s7694_s27 + $0x300] sm:$0xff] %v5402_v18  ;;  %5415 = vrcp.f32 %v3504_v37 }
 0x5da   : > { %5417 = vrcp.f32 %v3511_v59 }
 0x5db   : > { %v5404_v61 = vpop.eup %5403 }
 0x5dc   : > { %v5406_v42 = vpop.eup %5405  ;;  %3838 = vst [vmem:[%s7694_s27 + $0x330] sm:$0xff] %v5404_v61 }
 0x5dd   : > { %3839 = vst [vmem:[%s7694_s27 + $0x338] sm:$0xff] %v5406_v42 }
 0x5de   : > { %v5408_v58 = vpop.eup %5407 }
 0x5df   : > { %v5410_v23 = vpop.eup %5409  ;;  %3845 = vst [vmem:[%s7694_s27 + $0x368] sm:$0xff] %v5408_v58 }
 0x5e0   : > { %v5412_v40 = vpop.eup %5411  ;;  %3846 = vst [vmem:[%s7694_s27 + $0x370] sm:$0xff] %v5410_v23 }
 0x5e1   : > { %3826 = vst [vmem:[%s7694_s27 + $0x2d0] sm:$0xff] %v5412_v40 }
 0x5e2   : > { %v5414_v2 = vpop.eup %5413 }
 0x5e3   : > { %v5416_v17 = vpop.eup %5415  ;;  %3833 = vst [vmem:[%s7694_s27 + $0x308] sm:$0xff] %v5414_v2 }
 0x5e4   : > { %v5418_v55 = vpop.eup %5417  ;;  %3840 = vst [vmem:[%s7694_s27 + $0x340] sm:$0xff] %v5416_v17 }
 0x5e5   : > { %3847 = vst [vmem:[%s7694_s27 + $0x378] sm:$0xff] %v5418_v55 }
 0x5e6 PF: > { %s22_s17 = sadd.s32 1, %s5426_s17  }
 0x5e7   : > { %p19_p4 = scmp.ge.s32.totalorder %s22_s17, 6  }
 0x5e9   :  { %21 = sbr.rel (!%p19_p4) target bundleno = 1 (0x1), region = 111 }

</bundles_post_ra>
